<compile_context>
chip_gen: v7x
topology: tpu7x:2x2x1
jax: 0.10.0
libtpu: 0.0.40
codegen_flags: <defaults>
</compile_context>

<pallas_src>
import math

import jax
import jax.numpy as jnp
from jax import lax
from jax.experimental import pallas as pl
from jax.experimental.pallas import tpu as pltpu


def _round_up(x, m):
    return ((x + m - 1) // m) * m


def _sigmoid(x):
    # 0.5*tanh(0.5*x)+0.5 == sigmoid(x); tanh runs on the EUP slot (no VPU divide).
    return 0.5 * jnp.tanh(0.5 * x) + 0.5


_LANE = 128
_SUBLANE_BF16 = 16      # scratch buffers are bf16 -> (16, 128) tile
_UNROLL_T_FULL = 32     # fully unroll (Python loop) the time recurrence up to this T


def make_gru_kernel(num_layers, T, Bt, Hp):
    """Fused-gate multi-layer GRU + output Linear; one batch tile per grid program.

    Ref order:
      x(T*Bt, Ep) bf16, zf(T*Bt, 1) f32,
      [w_i(in,3Hp) bf16, w_h(Hp,3Hp) bf16, b_i(1,3Hp) f32, b_hn(1,Hp) f32] * num_layers,
      w_out(Hp,Cp) bf16, b_out(1,Cp) f32, out(Bt,Cp) f32,
      scratch: gates(T*Bt,3Hp) bf16, seq(T*Bt,Hp) bf16
    """
    H3 = 3 * Hp

    def kernel(*refs):
        i = 0
        x_ref = refs[i]; i += 1            # (T*Bt, Ep)  layer-0 input, row = t*Bt + b
        zf_ref = refs[i]; i += 1           # (T*Bt, 1)   z-gate forcing: (1 - mask)*1e9
        layer_refs = []
        for _ in range(num_layers):
            layer_refs.append(refs[i:i + 4]); i += 4
        w_out_ref = refs[i]; i += 1        # (Hp, Cp)
        b_out_ref = refs[i]; i += 1        # (1, Cp)
        out_ref = refs[i]; i += 1          # (Bt, Cp)
        gates_scr = refs[i]; i += 1        # (T*Bt, 3*Hp)  hoisted input-side gates
        seq_scr = refs[i]; i += 1          # (T*Bt, Hp)    layer-to-layer sequence

        zf = zf_ref[...]                   # (T*Bt, 1) f32, loaded once

        h = None
        for l in range(num_layers):
            w_i_ref, w_h_ref, b_i_ref, b_hn_ref = layer_refs[l]

            # ---- hoisted input projection: one bf16 MXU matmul for all T steps ----
            x_all = x_ref[...] if l == 0 else seq_scr[...]
            g = (jnp.dot(x_all, w_i_ref[...], preferred_element_type=jnp.float32)
                 + b_i_ref[...])
            # Three lane-dense column-block stores; packed-sequence masking folded
            # into the z block (padded rows get +1e9 -> sigmoid saturates to 1.0).
            gates_scr[:, 0:Hp] = g[:, 0:Hp].astype(gates_scr.dtype)
            gates_scr[:, Hp:2 * Hp] = (g[:, Hp:2 * Hp] + zf).astype(gates_scr.dtype)
            gates_scr[:, 2 * Hp:H3] = g[:, 2 * Hp:H3].astype(gates_scr.dtype)

            # Loop-invariant values hoisted out of the serial recurrence.
            w_h = w_h_ref[...]                                   # (Hp, 3Hp) bf16
            bhn = jnp.broadcast_to(b_hn_ref[...], (Bt, Hp))      # (Bt, Hp) f32
            write_seq = l < num_layers - 1

            def step(row, h, *, w_h=w_h, bhn=bhn, write_seq=write_seq):
                # row = t*Bt, aligned to the bf16 sublane tile -> unmasked vld/vst.
                gx = gates_scr[pl.ds(row, Bt), :].astype(jnp.float32)   # (Bt, 3Hp)
                gh = jnp.dot(h.astype(w_h.dtype), w_h,
                             preferred_element_type=jnp.float32)        # (Bt, 3Hp)
                r = _sigmoid(gx[:, 0:Hp] + gh[:, 0:Hp])
                z = _sigmoid(gx[:, Hp:2 * Hp] + gh[:, Hp:2 * Hp])
                n = jnp.tanh(gx[:, 2 * Hp:H3] + r * (gh[:, 2 * Hp:H3] + bhn))
                # padded step: z == 1.0 exactly -> h_new == h (state held bit-exactly)
                h_new = (1.0 - z) * n + z * h
                if write_seq:
                    seq_scr[pl.ds(row, Bt), :] = h_new.astype(seq_scr.dtype)
                return h_new

            # Hidden state lives in vregs as the loop carry (no VMEM round trip).
            h = jnp.zeros((Bt, Hp), jnp.float32)
            if T <= _UNROLL_T_FULL:
                for t in range(T):                       # trace-time full unroll
                    h = step(t * Bt, h)
            else:
                # Scaling guard for long sequences: bounded unroll, dynamic row start.
                h = lax.fori_loop(
                    0, T,
                    lambda t, hh: step(pl.multiple_of(t * Bt, Bt), hh),
                    h, unroll=8)

        # fn_output(h_n[-1]) -- lane-dense (Bt, Cp); the wrapper slices [:B, :C].
        out_ref[...] = (
            jnp.dot(h.astype(w_out_ref.dtype), w_out_ref[...],
                    preferred_element_type=jnp.float32)
            + b_out_ref[...])

    return kernel


def _pack_gru_layer(w_ih, w_hh, b_ih, b_hh, H, Hp, in_dim_p, mx_dtype):
    """Fuse per-gate torch-layout GRU weights into lane-padded fused-gate matrices."""
    in_dim = w_ih.shape[1]
    w_i = jnp.zeros((in_dim_p, 3 * Hp), jnp.float32)
    w_h = jnp.zeros((Hp, 3 * Hp), jnp.float32)
    for g in range(3):  # torch gate order: r, z, n
        w_i = w_i.at[:in_dim, g * Hp:g * Hp + H].set(w_ih[g * H:(g + 1) * H, :].T)
        w_h = w_h.at[:H, g * Hp:g * Hp + H].set(w_hh[g * H:(g + 1) * H, :].T)
    b_i = jnp.zeros((1, 3 * Hp), jnp.float32)
    b_i = b_i.at[0, 0:H].set(b_ih[0:H] + b_hh[0:H])                 # r: both biases
    b_i = b_i.at[0, Hp:Hp + H].set(b_ih[H:2 * H] + b_hh[H:2 * H])   # z: both biases
    b_i = b_i.at[0, 2 * Hp:2 * Hp + H].set(b_ih[2 * H:3 * H])       # n: input bias only
    b_hn = jnp.zeros((1, Hp), jnp.float32).at[0, :H].set(b_hh[2 * H:3 * H])
    return w_i.astype(mx_dtype), w_h.astype(mx_dtype), b_i, b_hn


def pack_model_params(params, matmul_dtype=jnp.bfloat16):
    """One-time parameter packing (hoisted out of the per-forward path)."""
    embed = params["embed"]
    gru = params["gru"]
    w_out, b_out = params["out"]
    E = embed.shape[1]
    C, H = w_out.shape
    num_layers = len(gru)
    Hp = _round_up(H, _LANE)
    Cp = _round_up(C, _LANE)
    Ep = _round_up(E, _LANE)

    layers = []
    for l, (w_ih, w_hh, b_ih, b_hh) in enumerate(gru):
        in_dim_p = Ep if l == 0 else Hp
        layers.append(_pack_gru_layer(w_ih, w_hh, b_ih, b_hh, H, Hp, in_dim_p,
                                      matmul_dtype))
    w_out_p = jnp.zeros((Hp, Cp), jnp.float32).at[:H, :C].set(w_out.T).astype(matmul_dtype)
    b_out_p = jnp.zeros((1, Cp), jnp.float32).at[0, :C].set(b_out)
    return {
        "embed": embed,
        "layers": layers,
        "w_out": w_out_p,
        "b_out": b_out_p,
        "dims": dict(E=E, Ep=Ep, H=H, Hp=Hp, C=C, Cp=Cp, num_layers=num_layers,
                     matmul_dtype=matmul_dtype),
    }


def model_text_forward(inputs, seq_mask, packed):
    """inputs: (B, T) int32 token ids (0 = padding), seq_mask: (B, T) in {0,1}."""
    d = packed["dims"]
    E, Ep, H, Hp, C, Cp = d["E"], d["Ep"], d["H"], d["Hp"], d["C"], d["Cp"]
    num_layers = d["num_layers"]
    mx_dtype = d["matmul_dtype"]

    B, T = inputs.shape
    # Batch tile: multiple of the bf16 sublane tile (16) so every per-step slice in
    # the recurrence is tile-aligned; the grid shards batch tiles across TCs (v7x).
    Bt = min(128, _round_up(max(B, 1), _SUBLANE_BF16))
    Bp = _round_up(B, Bt)
    nbt = Bp // Bt

    # ---- glue (plain XLA): embedding gather, pad, time-major batch-tile layout ----
    emb = packed["embed"][inputs].astype(jnp.float32)              # (B, T, E)
    emb = jnp.pad(emb, ((0, Bp - B), (0, 0), (0, Ep - E)))         # (Bp, T, Ep)
    x = emb.astype(mx_dtype).reshape(nbt, Bt, T, Ep)
    x = jnp.transpose(x, (0, 2, 1, 3)).reshape(nbt, T * Bt, Ep)    # row = t*Bt + b

    mask = seq_mask.astype(jnp.float32)                            # (B, T)
    mask = jnp.pad(mask, ((0, Bp - B), (0, 0)))                    # padded rows: 0
    zf = (1.0 - mask) * 1e9
    zf = zf.reshape(nbt, Bt, T).transpose(0, 2, 1).reshape(nbt, T * Bt, 1)

    flat = [x, zf]
    for lyr in packed["layers"]:
        flat.extend(lyr)
    flat.extend([packed["w_out"], packed["b_out"]])

    # ---- specs: batch-tiled inputs/output, grid-invariant (resident) weights ----
    def tile_spec(arr):
        return pl.BlockSpec((None,) + arr.shape[1:], lambda b: (b, 0, 0))

    def full_spec(arr):
        return pl.BlockSpec(arr.shape, lambda b, _n=arr.ndim: (0,) * _n)

    in_specs = [tile_spec(x), tile_spec(zf)] + [full_spec(a) for a in flat[2:]]
    out_specs = pl.BlockSpec((None, Bt, Cp), lambda b: (b, 0, 0))

    # ---- explicit VMEM budget with headroom (safe on v5e/v6e/v7x) ----
    nbytes = lambda a: a.size * a.dtype.itemsize
    scratch_bytes = (T * Bt * 3 * Hp + T * Bt * Hp) * jnp.dtype(mx_dtype).itemsize
    io_bytes = 2 * (nbytes(x) // nbt + nbytes(zf) // nbt + Bt * Cp * 4)
    w_bytes = 2 * sum(nbytes(a) for a in flat[2:])
    vmem_limit = int(min(max(2 * (scratch_bytes + io_bytes + w_bytes), 8 << 20), 48 << 20))

    kernel = make_gru_kernel(num_layers, T, Bt, Hp)
    out_padded = pl.pallas_call(
        kernel,
        grid=(nbt,),
        out_shape=jax.ShapeDtypeStruct((nbt, Bt, Cp), jnp.float32),
        in_specs=in_specs,
        out_specs=out_specs,
        scratch_shapes=[
            pltpu.VMEM((T * Bt, 3 * Hp), mx_dtype),   # hoisted input-side gate pre-acts
            pltpu.VMEM((T * Bt, Hp), mx_dtype),       # layer-to-layer sequence buffer
        ],
        compiler_params=pltpu.CompilerParams(
            dimension_semantics=("parallel",),
            vmem_limit_bytes=vmem_limit),
    )(*flat)
    return out_padded.reshape(Bp, Cp)[:B, :C]


def init_params(key, dic_size, embed_dim, hidden_dim, num_layers, num_category):
    """Deterministic parameter init matching the PyTorch module's shapes (torch layout)."""
    keys = jax.random.split(key, 3 + 4 * num_layers)
    ki = iter(keys)

    # nn.Embedding(dic_size, embed_dim, padding_idx=0): N(0,1), row 0 zeroed.
    embed = jax.random.normal(next(ki), (dic_size, embed_dim), jnp.float32)
    embed = embed.at[0].set(0.0)

    k = 1.0 / math.sqrt(hidden_dim)
    gru = []
    for l in range(num_layers):
        in_dim = embed_dim if l == 0 else hidden_dim
        w_ih = jax.random.uniform(next(ki), (3 * hidden_dim, in_dim), jnp.float32, -k, k)
        w_hh = jax.random.uniform(next(ki), (3 * hidden_dim, hidden_dim), jnp.float32, -k, k)
        b_ih = jax.random.uniform(next(ki), (3 * hidden_dim,), jnp.float32, -k, k)
        b_hh = jax.random.uniform(next(ki), (3 * hidden_dim,), jnp.float32, -k, k)
        gru.append((w_ih, w_hh, b_ih, b_hh))

    ko = 1.0 / math.sqrt(hidden_dim)
    w_out = jax.random.uniform(next(ki), (num_category, hidden_dim), jnp.float32, -ko, ko)
    b_out = jax.random.uniform(next(ki), (num_category,), jnp.float32, -ko, ko)
    return {"embed": embed, "gru": gru, "out": (w_out, b_out)}


def reference_forward(inputs, seq_mask, params):
    """Pure-JAX f32 reference with identical masked-GRU (packed-sequence) semantics."""
    embed_table = params["embed"]
    w_out, b_out = params["out"]
    x = embed_table[inputs].astype(jnp.float32)      # (B, T, E)
    mask = seq_mask.astype(jnp.float32)              # (B, T)
    B, T, _ = x.shape
    H = w_out.shape[1]
    h = None
    for (w_ih, w_hh, b_ih, b_hh) in params["gru"]:
        wir, wiz, win = w_ih[:H].T, w_ih[H:2 * H].T, w_ih[2 * H:].T
        whr, whz, whn = w_hh[:H].T, w_hh[H:2 * H].T, w_hh[2 * H:].T
        bir, biz, bin_ = b_ih[:H], b_ih[H:2 * H], b_ih[2 * H:]
        bhr, bhz, bhn = b_hh[:H], b_hh[H:2 * H], b_hh[2 * H:]
        h = jnp.zeros((B, H), jnp.float32)
        outs = []
        for t in range(T):
            xt = x[:, t, :]
            r = jax.nn.sigmoid(xt @ wir + bir + h @ whr + bhr)
            z = jax.nn.sigmoid(xt @ wiz + biz + h @ whz + bhz)
            n = jnp.tanh(xt @ win + bin_ + r * (h @ whn + bhn))
            h_new = (1.0 - z) * n + z * h
            m = mask[:, t:t + 1]
            h = m * h_new + (1.0 - m) * h
            outs.append(h)
        x = jnp.stack(outs, axis=1)
    return h @ w_out.T + b_out


if __name__ == "__main__":
    # Small shapes consistent with the module.
    B, T = 2, 8
    dic_size, embed_dim, hidden_dim = 20, 16, 32
    num_layers, num_category = 2, 5

    key = jax.random.PRNGKey(0)
    kp, kd = jax.random.split(key)
    params = init_params(kp, dic_size, embed_dim, hidden_dim, num_layers, num_category)

    # Token ids with padding_idx=0 after each sequence's length.
    lengths = jnp.array([T, 5], dtype=jnp.int32)
    tokens = jax.random.randint(kd, (B, T), 1, dic_size, dtype=jnp.int32)
    pos = jnp.arange(T)[None, :]
    seq_mask = (pos < lengths[:, None]).astype(jnp.int32)   # (B, T)
    inputs = tokens * seq_mask                               # padded positions -> 0

    packed = pack_model_params(params)                       # one-time packing (hoisted)
    forward = jax.jit(lambda ids, m: model_text_forward(ids, m, packed))

    out = jax.block_until_ready(forward(inputs, seq_mask))
    ref = reference_forward(inputs, seq_mask, params)

    assert out.shape == (B, num_category)
    # Tolerance reflects bf16 MXU operands (f32 accumulation) vs the pure-f32 reference.
    assert jnp.allclose(out, ref, atol=3e-2, rtol=3e-2), (out, ref)

    print("KERNEL_OK")
</pallas_src>

<mosaic_0001>
module attributes {stable_mosaic.version = 11 : i64} {
  func.func @kernel(%arg0: i32, %arg1: memref<1x128x128xbf16, #tpu.memory_space<vmem>>, %arg2: memref<1x128x1xf32, #tpu.memory_space<vmem>>, %arg3: memref<128x384xbf16, #tpu.memory_space<vmem>>, %arg4: memref<128x384xbf16, #tpu.memory_space<vmem>>, %arg5: memref<1x384xf32, #tpu.memory_space<vmem>>, %arg6: memref<1x128xf32, #tpu.memory_space<vmem>>, %arg7: memref<128x384xbf16, #tpu.memory_space<vmem>>, %arg8: memref<128x384xbf16, #tpu.memory_space<vmem>>, %arg9: memref<1x384xf32, #tpu.memory_space<vmem>>, %arg10: memref<1x128xf32, #tpu.memory_space<vmem>>, %arg11: memref<128x128xbf16, #tpu.memory_space<vmem>>, %arg12: memref<1x128xf32, #tpu.memory_space<vmem>>, %arg13: memref<1x16x128xf32, #tpu.memory_space<vmem>>, %arg14: memref<128x384xbf16, #tpu.memory_space<vmem>>, %arg15: memref<128x128xbf16, #tpu.memory_space<vmem>>) attributes {dimension_semantics = [#tpu.dimension_semantics<parallel>], iteration_bounds = array<i64: 1>, scalar_prefetch = 0 : i64, scratch_operands = 2 : i64, tpu.core_type = #tpu.core_type<tc>, window_params = [{transform_indices = @transform_0, window_bounds = array<i64: 1, 128, 128>}, {transform_indices = @transform_1, window_bounds = array<i64: 1, 128, 1>}, {pipeline_mode = #tpu.pipeline_mode<synchronous>, transform_indices = @transform_2, window_bounds = array<i64: 128, 384>}, {pipeline_mode = #tpu.pipeline_mode<synchronous>, transform_indices = @transform_3, window_bounds = array<i64: 128, 384>}, {pipeline_mode = #tpu.pipeline_mode<synchronous>, transform_indices = @transform_4, window_bounds = array<i64: 1, 384>}, {pipeline_mode = #tpu.pipeline_mode<synchronous>, transform_indices = @transform_5, window_bounds = array<i64: 1, 128>}, {pipeline_mode = #tpu.pipeline_mode<synchronous>, transform_indices = @transform_6, window_bounds = array<i64: 128, 384>}, {pipeline_mode = #tpu.pipeline_mode<synchronous>, transform_indices = @transform_7, window_bounds = array<i64: 128, 384>}, {pipeline_mode = #tpu.pipeline_mode<synchronous>, transform_indices = @transform_8, window_bounds = array<i64: 1, 384>}, {pipeline_mode = #tpu.pipeline_mode<synchronous>, transform_indices = @transform_9, window_bounds = array<i64: 1, 128>}, {pipeline_mode = #tpu.pipeline_mode<synchronous>, transform_indices = @transform_10, window_bounds = array<i64: 128, 128>}, {pipeline_mode = #tpu.pipeline_mode<synchronous>, transform_indices = @transform_11, window_bounds = array<i64: 1, 128>}, {transform_indices = @transform_12, window_bounds = array<i64: 1, 16, 128>}]} {
    %c0 = arith.constant 0 : index
    %c0_0 = arith.constant 0 : index
    %c0_1 = arith.constant 0 : index
    %0 = vector.load %arg2[%c0, %c0_0, %c0_1] : memref<1x128x1xf32, #tpu.memory_space<vmem>>, vector<1x128x1xf32>
    %1 = vector.shape_cast %0 : vector<1x128x1xf32> to vector<128x1xf32>
    %c0_2 = arith.constant 0 : index
    %c0_3 = arith.constant 0 : index
    %c0_4 = arith.constant 0 : index
    %2 = vector.load %arg1[%c0_2, %c0_3, %c0_4] : memref<1x128x128xbf16, #tpu.memory_space<vmem>>, vector<1x128x128xbf16>
    %3 = vector.shape_cast %2 : vector<1x128x128xbf16> to vector<128x128xbf16>
    %c0_5 = arith.constant 0 : index
    %c0_6 = arith.constant 0 : index
    %4 = vector.load %arg3[%c0_5, %c0_6] : memref<128x384xbf16, #tpu.memory_space<vmem>>, vector<128x384xbf16>
    %cst = arith.constant dense<0.000000e+00> : vector<128x384xf32>
    %5 = tpu.matmul %3, %4, %cst {dimension_numbers = #tpu.dot_dimension_numbers<[1], [0], [0], [1], [0, 0, 1, 1], [], []>} : vector<128x128xbf16>, vector<128x384xbf16>, vector<128x384xf32> -> vector<128x384xf32>
    %c0_7 = arith.constant 0 : index
    %c0_8 = arith.constant 0 : index
    %6 = vector.load %arg5[%c0_7, %c0_8] : memref<1x384xf32, #tpu.memory_space<vmem>>, vector<1x384xf32>
    %7 = vector.broadcast %6 : vector<1x384xf32> to vector<128x384xf32>
    %8 = arith.addf %5, %7 : vector<128x384xf32>
    %9 = vector.extract_strided_slice %8 {offsets = [0, 0], sizes = [128, 128], strides = [1, 1]} : vector<128x384xf32> to vector<128x128xf32>
    %10 = arith.truncf %9 : vector<128x128xf32> to vector<128x128xbf16>
    %c0_9 = arith.constant 0 : index
    %c0_10 = arith.constant 0 : index
    %11 = vector.load %arg14[%c0_9, %c0_10] : memref<128x384xbf16, #tpu.memory_space<vmem>>, vector<128x128xbf16>
    tpu.vector_store %arg14[%c0_9, %c0_10], %10 {strides = array<i32>} : memref<128x384xbf16, #tpu.memory_space<vmem>>, vector<128x128xbf16>,
    %12 = vector.extract_strided_slice %8 {offsets = [0, 128], sizes = [128, 128], strides = [1, 1]} : vector<128x384xf32> to vector<128x128xf32>
    %13 = vector.broadcast %1 : vector<128x1xf32> to vector<128x128xf32>
    %14 = arith.addf %12, %13 : vector<128x128xf32>
    %15 = arith.truncf %14 : vector<128x128xf32> to vector<128x128xbf16>
    %c0_11 = arith.constant 0 : index
    %c128 = arith.constant 128 : index
    %16 = vector.load %arg14[%c0_11, %c128] : memref<128x384xbf16, #tpu.memory_space<vmem>>, vector<128x128xbf16>
    tpu.vector_store %arg14[%c0_11, %c128], %15 {strides = array<i32>} : memref<128x384xbf16, #tpu.memory_space<vmem>>, vector<128x128xbf16>,
    %17 = vector.extract_strided_slice %8 {offsets = [0, 256], sizes = [128, 128], strides = [1, 1]} : vector<128x384xf32> to vector<128x128xf32>
    %18 = arith.truncf %17 : vector<128x128xf32> to vector<128x128xbf16>
    %c0_12 = arith.constant 0 : index
    %c256 = arith.constant 256 : index
    %19 = vector.load %arg14[%c0_12, %c256] : memref<128x384xbf16, #tpu.memory_space<vmem>>, vector<128x128xbf16>
    tpu.vector_store %arg14[%c0_12, %c256], %18 {strides = array<i32>} : memref<128x384xbf16, #tpu.memory_space<vmem>>, vector<128x128xbf16>,
    %c0_13 = arith.constant 0 : index
    %c0_14 = arith.constant 0 : index
    %20 = vector.load %arg4[%c0_13, %c0_14] : memref<128x384xbf16, #tpu.memory_space<vmem>>, vector<128x384xbf16>
    %c0_15 = arith.constant 0 : index
    %c0_16 = arith.constant 0 : index
    %21 = vector.load %arg6[%c0_15, %c0_16] : memref<1x128xf32, #tpu.memory_space<vmem>>, vector<1x128xf32>
    %22 = vector.shape_cast %21 : vector<1x128xf32> to vector<1x128xf32>
    %23 = vector.broadcast %22 : vector<1x128xf32> to vector<16x128xf32>
    %cst_17 = arith.constant 0.000000e+00 : f32
    %24 = vector.broadcast %cst_17 : f32 to vector<16x128xf32>
    %c0_18 = arith.constant 0 : index
    %c0_19 = arith.constant 0 : index
    %25 = vector.load %arg14[%c0_18, %c0_19] : memref<128x384xbf16, #tpu.memory_space<vmem>>, vector<16x384xbf16>
    %26 = arith.extf %25 : vector<16x384xbf16> to vector<16x384xf32>
    %27 = arith.truncf %24 : vector<16x128xf32> to vector<16x128xbf16>
    %cst_20 = arith.constant dense<0.000000e+00> : vector<16x384xf32>
    %28 = tpu.matmul %27, %20, %cst_20 {dimension_numbers = #tpu.dot_dimension_numbers<[1], [0], [0], [1], [0, 0, 1, 1], [], []>} : vector<16x128xbf16>, vector<128x384xbf16>, vector<16x384xf32> -> vector<16x384xf32>
    %29 = vector.extract_strided_slice %26 {offsets = [0, 0], sizes = [16, 128], strides = [1, 1]} : vector<16x384xf32> to vector<16x128xf32>
    %30 = vector.extract_strided_slice %28 {offsets = [0, 0], sizes = [16, 128], strides = [1, 1]} : vector<16x384xf32> to vector<16x128xf32>
    %31 = arith.addf %29, %30 : vector<16x128xf32>
    %cst_21 = arith.constant 5.000000e-01 : f32
    %32 = vector.broadcast %cst_21 : f32 to vector<16x128xf32>
    %33 = arith.mulf %32, %31 : vector<16x128xf32>
    %34 = math.tanh %33 : vector<16x128xf32>
    %cst_22 = arith.constant 5.000000e-01 : f32
    %35 = vector.broadcast %cst_22 : f32 to vector<16x128xf32>
    %36 = arith.mulf %35, %34 : vector<16x128xf32>
    %cst_23 = arith.constant 5.000000e-01 : f32
    %37 = vector.broadcast %cst_23 : f32 to vector<16x128xf32>
    %38 = arith.addf %36, %37 : vector<16x128xf32>
    %39 = vector.extract_strided_slice %26 {offsets = [0, 128], sizes = [16, 128], strides = [1, 1]} : vector<16x384xf32> to vector<16x128xf32>
    %40 = vector.extract_strided_slice %28 {offsets = [0, 128], sizes = [16, 128], strides = [1, 1]} : vector<16x384xf32> to vector<16x128xf32>
    %41 = arith.addf %39, %40 : vector<16x128xf32>
    %cst_24 = arith.constant 5.000000e-01 : f32
    %42 = vector.broadcast %cst_24 : f32 to vector<16x128xf32>
    %43 = arith.mulf %42, %41 : vector<16x128xf32>
    %44 = math.tanh %43 : vector<16x128xf32>
    %cst_25 = arith.constant 5.000000e-01 : f32
    %45 = vector.broadcast %cst_25 : f32 to vector<16x128xf32>
    %46 = arith.mulf %45, %44 : vector<16x128xf32>
    %cst_26 = arith.constant 5.000000e-01 : f32
    %47 = vector.broadcast %cst_26 : f32 to vector<16x128xf32>
    %48 = arith.addf %46, %47 : vector<16x128xf32>
    %49 = vector.extract_strided_slice %26 {offsets = [0, 256], sizes = [16, 128], strides = [1, 1]} : vector<16x384xf32> to vector<16x128xf32>
    %50 = vector.extract_strided_slice %28 {offsets = [0, 256], sizes = [16, 128], strides = [1, 1]} : vector<16x384xf32> to vector<16x128xf32>
    %51 = arith.addf %50, %23 : vector<16x128xf32>
    %52 = arith.mulf %38, %51 : vector<16x128xf32>
    %53 = arith.addf %49, %52 : vector<16x128xf32>
    %54 = math.tanh %53 : vector<16x128xf32>
    %cst_27 = arith.constant 1.000000e+00 : f32
    %55 = vector.broadcast %cst_27 : f32 to vector<16x128xf32>
    %56 = arith.subf %55, %48 : vector<16x128xf32>
    %57 = arith.mulf %56, %54 : vector<16x128xf32>
    %58 = arith.mulf %48, %24 : vector<16x128xf32>
    %59 = arith.addf %57, %58 : vector<16x128xf32>
    %60 = arith.truncf %59 : vector<16x128xf32> to vector<16x128xbf16>
    %c0_28 = arith.constant 0 : index
    %c0_29 = arith.constant 0 : index
    %61 = vector.load %arg15[%c0_28, %c0_29] : memref<128x128xbf16, #tpu.memory_space<vmem>>, vector<16x128xbf16>
    tpu.vector_store %arg15[%c0_28, %c0_29], %60 {strides = array<i32>} : memref<128x128xbf16, #tpu.memory_space<vmem>>, vector<16x128xbf16>,
    %c16 = arith.constant 16 : index
    %c0_30 = arith.constant 0 : index
    %62 = vector.load %arg14[%c16, %c0_30] : memref<128x384xbf16, #tpu.memory_space<vmem>>, vector<16x384xbf16>
    %63 = arith.extf %62 : vector<16x384xbf16> to vector<16x384xf32>
    %64 = arith.truncf %59 : vector<16x128xf32> to vector<16x128xbf16>
    %cst_31 = arith.constant dense<0.000000e+00> : vector<16x384xf32>
    %65 = tpu.matmul %64, %20, %cst_31 {dimension_numbers = #tpu.dot_dimension_numbers<[1], [0], [0], [1], [0, 0, 1, 1], [], []>} : vector<16x128xbf16>, vector<128x384xbf16>, vector<16x384xf32> -> vector<16x384xf32>
    %66 = vector.extract_strided_slice %63 {offsets = [0, 0], sizes = [16, 128], strides = [1, 1]} : vector<16x384xf32> to vector<16x128xf32>
    %67 = vector.extract_strided_slice %65 {offsets = [0, 0], sizes = [16, 128], strides = [1, 1]} : vector<16x384xf32> to vector<16x128xf32>
    %68 = arith.addf %66, %67 : vector<16x128xf32>
    %cst_32 = arith.constant 5.000000e-01 : f32
    %69 = vector.broadcast %cst_32 : f32 to vector<16x128xf32>
    %70 = arith.mulf %69, %68 : vector<16x128xf32>
    %71 = math.tanh %70 : vector<16x128xf32>
    %cst_33 = arith.constant 5.000000e-01 : f32
    %72 = vector.broadcast %cst_33 : f32 to vector<16x128xf32>
    %73 = arith.mulf %72, %71 : vector<16x128xf32>
    %cst_34 = arith.constant 5.000000e-01 : f32
    %74 = vector.broadcast %cst_34 : f32 to vector<16x128xf32>
    %75 = arith.addf %73, %74 : vector<16x128xf32>
    %76 = vector.extract_strided_slice %63 {offsets = [0, 128], sizes = [16, 128], strides = [1, 1]} : vector<16x384xf32> to vector<16x128xf32>
    %77 = vector.extract_strided_slice %65 {offsets = [0, 128], sizes = [16, 128], strides = [1, 1]} : vector<16x384xf32> to vector<16x128xf32>
    %78 = arith.addf %76, %77 : vector<16x128xf32>
    %cst_35 = arith.constant 5.000000e-01 : f32
    %79 = vector.broadcast %cst_35 : f32 to vector<16x128xf32>
    %80 = arith.mulf %79, %78 : vector<16x128xf32>
    %81 = math.tanh %80 : vector<16x128xf32>
    %cst_36 = arith.constant 5.000000e-01 : f32
    %82 = vector.broadcast %cst_36 : f32 to vector<16x128xf32>
    %83 = arith.mulf %82, %81 : vector<16x128xf32>
    %cst_37 = arith.constant 5.000000e-01 : f32
    %84 = vector.broadcast %cst_37 : f32 to vector<16x128xf32>
    %85 = arith.addf %83, %84 : vector<16x128xf32>
    %86 = vector.extract_strided_slice %63 {offsets = [0, 256], sizes = [16, 128], strides = [1, 1]} : vector<16x384xf32> to vector<16x128xf32>
    %87 = vector.extract_strided_slice %65 {offsets = [0, 256], sizes = [16, 128], strides = [1, 1]} : vector<16x384xf32> to vector<16x128xf32>
    %88 = arith.addf %87, %23 : vector<16x128xf32>
    %89 = arith.mulf %75, %88 : vector<16x128xf32>
    %90 = arith.addf %86, %89 : vector<16x128xf32>
    %91 = math.tanh %90 : vector<16x128xf32>
    %cst_38 = arith.constant 1.000000e+00 : f32
    %92 = vector.broadcast %cst_38 : f32 to vector<16x128xf32>
    %93 = arith.subf %92, %85 : vector<16x128xf32>
    %94 = arith.mulf %93, %91 : vector<16x128xf32>
    %95 = arith.mulf %85, %59 : vector<16x128xf32>
    %96 = arith.addf %94, %95 : vector<16x128xf32>
    %97 = arith.truncf %96 : vector<16x128xf32> to vector<16x128xbf16>
    %c16_39 = arith.constant 16 : index
    %c0_40 = arith.constant 0 : index
    %98 = vector.load %arg15[%c16_39, %c0_40] : memref<128x128xbf16, #tpu.memory_space<vmem>>, vector<16x128xbf16>
    tpu.vector_store %arg15[%c16_39, %c0_40], %97 {strides = array<i32>} : memref<128x128xbf16, #tpu.memory_space<vmem>>, vector<16x128xbf16>,
    %c32 = arith.constant 32 : index
    %c0_41 = arith.constant 0 : index
    %99 = vector.load %arg14[%c32, %c0_41] : memref<128x384xbf16, #tpu.memory_space<vmem>>, vector<16x384xbf16>
    %100 = arith.extf %99 : vector<16x384xbf16> to vector<16x384xf32>
    %101 = arith.truncf %96 : vector<16x128xf32> to vector<16x128xbf16>
    %cst_42 = arith.constant dense<0.000000e+00> : vector<16x384xf32>
    %102 = tpu.matmul %101, %20, %cst_42 {dimension_numbers = #tpu.dot_dimension_numbers<[1], [0], [0], [1], [0, 0, 1, 1], [], []>} : vector<16x128xbf16>, vector<128x384xbf16>, vector<16x384xf32> -> vector<16x384xf32>
    %103 = vector.extract_strided_slice %100 {offsets = [0, 0], sizes = [16, 128], strides = [1, 1]} : vector<16x384xf32> to vector<16x128xf32>
    %104 = vector.extract_strided_slice %102 {offsets = [0, 0], sizes = [16, 128], strides = [1, 1]} : vector<16x384xf32> to vector<16x128xf32>
    %105 = arith.addf %103, %104 : vector<16x128xf32>
    %cst_43 = arith.constant 5.000000e-01 : f32
    %106 = vector.broadcast %cst_43 : f32 to vector<16x128xf32>
    %107 = arith.mulf %106, %105 : vector<16x128xf32>
    %108 = math.tanh %107 : vector<16x128xf32>
    %cst_44 = arith.constant 5.000000e-01 : f32
    %109 = vector.broadcast %cst_44 : f32 to vector<16x128xf32>
    %110 = arith.mulf %109, %108 : vector<16x128xf32>
    %cst_45 = arith.constant 5.000000e-01 : f32
    %111 = vector.broadcast %cst_45 : f32 to vector<16x128xf32>
    %112 = arith.addf %110, %111 : vector<16x128xf32>
    %113 = vector.extract_strided_slice %100 {offsets = [0, 128], sizes = [16, 128], strides = [1, 1]} : vector<16x384xf32> to vector<16x128xf32>
    %114 = vector.extract_strided_slice %102 {offsets = [0, 128], sizes = [16, 128], strides = [1, 1]} : vector<16x384xf32> to vector<16x128xf32>
    %115 = arith.addf %113, %114 : vector<16x128xf32>
    %cst_46 = arith.constant 5.000000e-01 : f32
    %116 = vector.broadcast %cst_46 : f32 to vector<16x128xf32>
    %117 = arith.mulf %116, %115 : vector<16x128xf32>
    %118 = math.tanh %117 : vector<16x128xf32>
    %cst_47 = arith.constant 5.000000e-01 : f32
    %119 = vector.broadcast %cst_47 : f32 to vector<16x128xf32>
    %120 = arith.mulf %119, %118 : vector<16x128xf32>
    %cst_48 = arith.constant 5.000000e-01 : f32
    %121 = vector.broadcast %cst_48 : f32 to vector<16x128xf32>
    %122 = arith.addf %120, %121 : vector<16x128xf32>
    %123 = vector.extract_strided_slice %100 {offsets = [0, 256], sizes = [16, 128], strides = [1, 1]} : vector<16x384xf32> to vector<16x128xf32>
    %124 = vector.extract_strided_slice %102 {offsets = [0, 256], sizes = [16, 128], strides = [1, 1]} : vector<16x384xf32> to vector<16x128xf32>
    %125 = arith.addf %124, %23 : vector<16x128xf32>
    %126 = arith.mulf %112, %125 : vector<16x128xf32>
    %127 = arith.addf %123, %126 : vector<16x128xf32>
    %128 = math.tanh %127 : vector<16x128xf32>
    %cst_49 = arith.constant 1.000000e+00 : f32
    %129 = vector.broadcast %cst_49 : f32 to vector<16x128xf32>
    %130 = arith.subf %129, %122 : vector<16x128xf32>
    %131 = arith.mulf %130, %128 : vector<16x128xf32>
    %132 = arith.mulf %122, %96 : vector<16x128xf32>
    %133 = arith.addf %131, %132 : vector<16x128xf32>
    %134 = arith.truncf %133 : vector<16x128xf32> to vector<16x128xbf16>
    %c32_50 = arith.constant 32 : index
    %c0_51 = arith.constant 0 : index
    %135 = vector.load %arg15[%c32_50, %c0_51] : memref<128x128xbf16, #tpu.memory_space<vmem>>, vector<16x128xbf16>
    tpu.vector_store %arg15[%c32_50, %c0_51], %134 {strides = array<i32>} : memref<128x128xbf16, #tpu.memory_space<vmem>>, vector<16x128xbf16>,
    %c48 = arith.constant 48 : index
    %c0_52 = arith.constant 0 : index
    %136 = vector.load %arg14[%c48, %c0_52] : memref<128x384xbf16, #tpu.memory_space<vmem>>, vector<16x384xbf16>
    %137 = arith.extf %136 : vector<16x384xbf16> to vector<16x384xf32>
    %138 = arith.truncf %133 : vector<16x128xf32> to vector<16x128xbf16>
    %cst_53 = arith.constant dense<0.000000e+00> : vector<16x384xf32>
    %139 = tpu.matmul %138, %20, %cst_53 {dimension_numbers = #tpu.dot_dimension_numbers<[1], [0], [0], [1], [0, 0, 1, 1], [], []>} : vector<16x128xbf16>, vector<128x384xbf16>, vector<16x384xf32> -> vector<16x384xf32>
    %140 = vector.extract_strided_slice %137 {offsets = [0, 0], sizes = [16, 128], strides = [1, 1]} : vector<16x384xf32> to vector<16x128xf32>
    %141 = vector.extract_strided_slice %139 {offsets = [0, 0], sizes = [16, 128], strides = [1, 1]} : vector<16x384xf32> to vector<16x128xf32>
    %142 = arith.addf %140, %141 : vector<16x128xf32>
    %cst_54 = arith.constant 5.000000e-01 : f32
    %143 = vector.broadcast %cst_54 : f32 to vector<16x128xf32>
    %144 = arith.mulf %143, %142 : vector<16x128xf32>
    %145 = math.tanh %144 : vector<16x128xf32>
    %cst_55 = arith.constant 5.000000e-01 : f32
    %146 = vector.broadcast %cst_55 : f32 to vector<16x128xf32>
    %147 = arith.mulf %146, %145 : vector<16x128xf32>
    %cst_56 = arith.constant 5.000000e-01 : f32
    %148 = vector.broadcast %cst_56 : f32 to vector<16x128xf32>
    %149 = arith.addf %147, %148 : vector<16x128xf32>
    %150 = vector.extract_strided_slice %137 {offsets = [0, 128], sizes = [16, 128], strides = [1, 1]} : vector<16x384xf32> to vector<16x128xf32>
    %151 = vector.extract_strided_slice %139 {offsets = [0, 128], sizes = [16, 128], strides = [1, 1]} : vector<16x384xf32> to vector<16x128xf32>
    %152 = arith.addf %150, %151 : vector<16x128xf32>
    %cst_57 = arith.constant 5.000000e-01 : f32
    %153 = vector.broadcast %cst_57 : f32 to vector<16x128xf32>
    %154 = arith.mulf %153, %152 : vector<16x128xf32>
    %155 = math.tanh %154 : vector<16x128xf32>
    %cst_58 = arith.constant 5.000000e-01 : f32
    %156 = vector.broadcast %cst_58 : f32 to vector<16x128xf32>
    %157 = arith.mulf %156, %155 : vector<16x128xf32>
    %cst_59 = arith.constant 5.000000e-01 : f32
    %158 = vector.broadcast %cst_59 : f32 to vector<16x128xf32>
    %159 = arith.addf %157, %158 : vector<16x128xf32>
    %160 = vector.extract_strided_slice %137 {offsets = [0, 256], sizes = [16, 128], strides = [1, 1]} : vector<16x384xf32> to vector<16x128xf32>
    %161 = vector.extract_strided_slice %139 {offsets = [0, 256], sizes = [16, 128], strides = [1, 1]} : vector<16x384xf32> to vector<16x128xf32>
    %162 = arith.addf %161, %23 : vector<16x128xf32>
    %163 = arith.mulf %149, %162 : vector<16x128xf32>
    %164 = arith.addf %160, %163 : vector<16x128xf32>
    %165 = math.tanh %164 : vector<16x128xf32>
    %cst_60 = arith.constant 1.000000e+00 : f32
    %166 = vector.broadcast %cst_60 : f32 to vector<16x128xf32>
    %167 = arith.subf %166, %159 : vector<16x128xf32>
    %168 = arith.mulf %167, %165 : vector<16x128xf32>
    %169 = arith.mulf %159, %133 : vector<16x128xf32>
    %170 = arith.addf %168, %169 : vector<16x128xf32>
    %171 = arith.truncf %170 : vector<16x128xf32> to vector<16x128xbf16>
    %c48_61 = arith.constant 48 : index
    %c0_62 = arith.constant 0 : index
    %172 = vector.load %arg15[%c48_61, %c0_62] : memref<128x128xbf16, #tpu.memory_space<vmem>>, vector<16x128xbf16>
    tpu.vector_store %arg15[%c48_61, %c0_62], %171 {strides = array<i32>} : memref<128x128xbf16, #tpu.memory_space<vmem>>, vector<16x128xbf16>,
    %c64 = arith.constant 64 : index
    %c0_63 = arith.constant 0 : index
    %173 = vector.load %arg14[%c64, %c0_63] : memref<128x384xbf16, #tpu.memory_space<vmem>>, vector<16x384xbf16>
    %174 = arith.extf %173 : vector<16x384xbf16> to vector<16x384xf32>
    %175 = arith.truncf %170 : vector<16x128xf32> to vector<16x128xbf16>
    %cst_64 = arith.constant dense<0.000000e+00> : vector<16x384xf32>
    %176 = tpu.matmul %175, %20, %cst_64 {dimension_numbers = #tpu.dot_dimension_numbers<[1], [0], [0], [1], [0, 0, 1, 1], [], []>} : vector<16x128xbf16>, vector<128x384xbf16>, vector<16x384xf32> -> vector<16x384xf32>
    %177 = vector.extract_strided_slice %174 {offsets = [0, 0], sizes = [16, 128], strides = [1, 1]} : vector<16x384xf32> to vector<16x128xf32>
    %178 = vector.extract_strided_slice %176 {offsets = [0, 0], sizes = [16, 128], strides = [1, 1]} : vector<16x384xf32> to vector<16x128xf32>
    %179 = arith.addf %177, %178 : vector<16x128xf32>
    %cst_65 = arith.constant 5.000000e-01 : f32
    %180 = vector.broadcast %cst_65 : f32 to vector<16x128xf32>
    %181 = arith.mulf %180, %179 : vector<16x128xf32>
    %182 = math.tanh %181 : vector<16x128xf32>
    %cst_66 = arith.constant 5.000000e-01 : f32
    %183 = vector.broadcast %cst_66 : f32 to vector<16x128xf32>
    %184 = arith.mulf %183, %182 : vector<16x128xf32>
    %cst_67 = arith.constant 5.000000e-01 : f32
    %185 = vector.broadcast %cst_67 : f32 to vector<16x128xf32>
    %186 = arith.addf %184, %185 : vector<16x128xf32>
    %187 = vector.extract_strided_slice %174 {offsets = [0, 128], sizes = [16, 128], strides = [1, 1]} : vector<16x384xf32> to vector<16x128xf32>
    %188 = vector.extract_strided_slice %176 {offsets = [0, 128], sizes = [16, 128], strides = [1, 1]} : vector<16x384xf32> to vector<16x128xf32>
    %189 = arith.addf %187, %188 : vector<16x128xf32>
    %cst_68 = arith.constant 5.000000e-01 : f32
    %190 = vector.broadcast %cst_68 : f32 to vector<16x128xf32>
    %191 = arith.mulf %190, %189 : vector<16x128xf32>
    %192 = math.tanh %191 : vector<16x128xf32>
    %cst_69 = arith.constant 5.000000e-01 : f32
    %193 = vector.broadcast %cst_69 : f32 to vector<16x128xf32>
    %194 = arith.mulf %193, %192 : vector<16x128xf32>
    %cst_70 = arith.constant 5.000000e-01 : f32
    %195 = vector.broadcast %cst_70 : f32 to vector<16x128xf32>
    %196 = arith.addf %194, %195 : vector<16x128xf32>
    %197 = vector.extract_strided_slice %174 {offsets = [0, 256], sizes = [16, 128], strides = [1, 1]} : vector<16x384xf32> to vector<16x128xf32>
    %198 = vector.extract_strided_slice %176 {offsets = [0, 256], sizes = [16, 128], strides = [1, 1]} : vector<16x384xf32> to vector<16x128xf32>
    %199 = arith.addf %198, %23 : vector<16x128xf32>
    %200 = arith.mulf %186, %199 : vector<16x128xf32>
    %201 = arith.addf %197, %200 : vector<16x128xf32>
    %202 = math.tanh %201 : vector<16x128xf32>
    %cst_71 = arith.constant 1.000000e+00 : f32
    %203 = vector.broadcast %cst_71 : f32 to vector<16x128xf32>
    %204 = arith.subf %203, %196 : vector<16x128xf32>
    %205 = arith.mulf %204, %202 : vector<16x128xf32>
    %206 = arith.mulf %196, %170 : vector<16x128xf32>
    %207 = arith.addf %205, %206 : vector<16x128xf32>
    %208 = arith.truncf %207 : vector<16x128xf32> to vector<16x128xbf16>
    %c64_72 = arith.constant 64 : index
    %c0_73 = arith.constant 0 : index
    %209 = vector.load %arg15[%c64_72, %c0_73] : memref<128x128xbf16, #tpu.memory_space<vmem>>, vector<16x128xbf16>
    tpu.vector_store %arg15[%c64_72, %c0_73], %208 {strides = array<i32>} : memref<128x128xbf16, #tpu.memory_space<vmem>>, vector<16x128xbf16>,
    %c80 = arith.constant 80 : index
    %c0_74 = arith.constant 0 : index
    %210 = vector.load %arg14[%c80, %c0_74] : memref<128x384xbf16, #tpu.memory_space<vmem>>, vector<16x384xbf16>
    %211 = arith.extf %210 : vector<16x384xbf16> to vector<16x384xf32>
    %212 = arith.truncf %207 : vector<16x128xf32> to vector<16x128xbf16>
    %cst_75 = arith.constant dense<0.000000e+00> : vector<16x384xf32>
    %213 = tpu.matmul %212, %20, %cst_75 {dimension_numbers = #tpu.dot_dimension_numbers<[1], [0], [0], [1], [0, 0, 1, 1], [], []>} : vector<16x128xbf16>, vector<128x384xbf16>, vector<16x384xf32> -> vector<16x384xf32>
    %214 = vector.extract_strided_slice %211 {offsets = [0, 0], sizes = [16, 128], strides = [1, 1]} : vector<16x384xf32> to vector<16x128xf32>
    %215 = vector.extract_strided_slice %213 {offsets = [0, 0], sizes = [16, 128], strides = [1, 1]} : vector<16x384xf32> to vector<16x128xf32>
    %216 = arith.addf %214, %215 : vector<16x128xf32>
    %cst_76 = arith.constant 5.000000e-01 : f32
    %217 = vector.broadcast %cst_76 : f32 to vector<16x128xf32>
    %218 = arith.mulf %217, %216 : vector<16x128xf32>
    %219 = math.tanh %218 : vector<16x128xf32>
    %cst_77 = arith.constant 5.000000e-01 : f32
    %220 = vector.broadcast %cst_77 : f32 to vector<16x128xf32>
    %221 = arith.mulf %220, %219 : vector<16x128xf32>
    %cst_78 = arith.constant 5.000000e-01 : f32
    %222 = vector.broadcast %cst_78 : f32 to vector<16x128xf32>
    %223 = arith.addf %221, %222 : vector<16x128xf32>
    %224 = vector.extract_strided_slice %211 {offsets = [0, 128], sizes = [16, 128], strides = [1, 1]} : vector<16x384xf32> to vector<16x128xf32>
    %225 = vector.extract_strided_slice %213 {offsets = [0, 128], sizes = [16, 128], strides = [1, 1]} : vector<16x384xf32> to vector<16x128xf32>
    %226 = arith.addf %224, %225 : vector<16x128xf32>
    %cst_79 = arith.constant 5.000000e-01 : f32
    %227 = vector.broadcast %cst_79 : f32 to vector<16x128xf32>
    %228 = arith.mulf %227, %226 : vector<16x128xf32>
    %229 = math.tanh %228 : vector<16x128xf32>
    %cst_80 = arith.constant 5.000000e-01 : f32
    %230 = vector.broadcast %cst_80 : f32 to vector<16x128xf32>
    %231 = arith.mulf %230, %229 : vector<16x128xf32>
    %cst_81 = arith.constant 5.000000e-01 : f32
    %232 = vector.broadcast %cst_81 : f32 to vector<16x128xf32>
    %233 = arith.addf %231, %232 : vector<16x128xf32>
    %234 = vector.extract_strided_slice %211 {offsets = [0, 256], sizes = [16, 128], strides = [1, 1]} : vector<16x384xf32> to vector<16x128xf32>
    %235 = vector.extract_strided_slice %213 {offsets = [0, 256], sizes = [16, 128], strides = [1, 1]} : vector<16x384xf32> to vector<16x128xf32>
    %236 = arith.addf %235, %23 : vector<16x128xf32>
    %237 = arith.mulf %223, %236 : vector<16x128xf32>
    %238 = arith.addf %234, %237 : vector<16x128xf32>
    %239 = math.tanh %238 : vector<16x128xf32>
    %cst_82 = arith.constant 1.000000e+00 : f32
    %240 = vector.broadcast %cst_82 : f32 to vector<16x128xf32>
    %241 = arith.subf %240, %233 : vector<16x128xf32>
    %242 = arith.mulf %241, %239 : vector<16x128xf32>
    %243 = arith.mulf %233, %207 : vector<16x128xf32>
    %244 = arith.addf %242, %243 : vector<16x128xf32>
    %245 = arith.truncf %244 : vector<16x128xf32> to vector<16x128xbf16>
    %c80_83 = arith.constant 80 : index
    %c0_84 = arith.constant 0 : index
    %246 = vector.load %arg15[%c80_83, %c0_84] : memref<128x128xbf16, #tpu.memory_space<vmem>>, vector<16x128xbf16>
    tpu.vector_store %arg15[%c80_83, %c0_84], %245 {strides = array<i32>} : memref<128x128xbf16, #tpu.memory_space<vmem>>, vector<16x128xbf16>,
    %c96 = arith.constant 96 : index
    %c0_85 = arith.constant 0 : index
    %247 = vector.load %arg14[%c96, %c0_85] : memref<128x384xbf16, #tpu.memory_space<vmem>>, vector<16x384xbf16>
    %248 = arith.extf %247 : vector<16x384xbf16> to vector<16x384xf32>
    %249 = arith.truncf %244 : vector<16x128xf32> to vector<16x128xbf16>
    %cst_86 = arith.constant dense<0.000000e+00> : vector<16x384xf32>
    %250 = tpu.matmul %249, %20, %cst_86 {dimension_numbers = #tpu.dot_dimension_numbers<[1], [0], [0], [1], [0, 0, 1, 1], [], []>} : vector<16x128xbf16>, vector<128x384xbf16>, vector<16x384xf32> -> vector<16x384xf32>
    %251 = vector.extract_strided_slice %248 {offsets = [0, 0], sizes = [16, 128], strides = [1, 1]} : vector<16x384xf32> to vector<16x128xf32>
    %252 = vector.extract_strided_slice %250 {offsets = [0, 0], sizes = [16, 128], strides = [1, 1]} : vector<16x384xf32> to vector<16x128xf32>
    %253 = arith.addf %251, %252 : vector<16x128xf32>
    %cst_87 = arith.constant 5.000000e-01 : f32
    %254 = vector.broadcast %cst_87 : f32 to vector<16x128xf32>
    %255 = arith.mulf %254, %253 : vector<16x128xf32>
    %256 = math.tanh %255 : vector<16x128xf32>
    %cst_88 = arith.constant 5.000000e-01 : f32
    %257 = vector.broadcast %cst_88 : f32 to vector<16x128xf32>
    %258 = arith.mulf %257, %256 : vector<16x128xf32>
    %cst_89 = arith.constant 5.000000e-01 : f32
    %259 = vector.broadcast %cst_89 : f32 to vector<16x128xf32>
    %260 = arith.addf %258, %259 : vector<16x128xf32>
    %261 = vector.extract_strided_slice %248 {offsets = [0, 128], sizes = [16, 128], strides = [1, 1]} : vector<16x384xf32> to vector<16x128xf32>
    %262 = vector.extract_strided_slice %250 {offsets = [0, 128], sizes = [16, 128], strides = [1, 1]} : vector<16x384xf32> to vector<16x128xf32>
    %263 = arith.addf %261, %262 : vector<16x128xf32>
    %cst_90 = arith.constant 5.000000e-01 : f32
    %264 = vector.broadcast %cst_90 : f32 to vector<16x128xf32>
    %265 = arith.mulf %264, %263 : vector<16x128xf32>
    %266 = math.tanh %265 : vector<16x128xf32>
    %cst_91 = arith.constant 5.000000e-01 : f32
    %267 = vector.broadcast %cst_91 : f32 to vector<16x128xf32>
    %268 = arith.mulf %267, %266 : vector<16x128xf32>
    %cst_92 = arith.constant 5.000000e-01 : f32
    %269 = vector.broadcast %cst_92 : f32 to vector<16x128xf32>
    %270 = arith.addf %268, %269 : vector<16x128xf32>
    %271 = vector.extract_strided_slice %248 {offsets = [0, 256], sizes = [16, 128], strides = [1, 1]} : vector<16x384xf32> to vector<16x128xf32>
    %272 = vector.extract_strided_slice %250 {offsets = [0, 256], sizes = [16, 128], strides = [1, 1]} : vector<16x384xf32> to vector<16x128xf32>
    %273 = arith.addf %272, %23 : vector<16x128xf32>
    %274 = arith.mulf %260, %273 : vector<16x128xf32>
    %275 = arith.addf %271, %274 : vector<16x128xf32>
    %276 = math.tanh %275 : vector<16x128xf32>
    %cst_93 = arith.constant 1.000000e+00 : f32
    %277 = vector.broadcast %cst_93 : f32 to vector<16x128xf32>
    %278 = arith.subf %277, %270 : vector<16x128xf32>
    %279 = arith.mulf %278, %276 : vector<16x128xf32>
    %280 = arith.mulf %270, %244 : vector<16x128xf32>
    %281 = arith.addf %279, %280 : vector<16x128xf32>
    %282 = arith.truncf %281 : vector<16x128xf32> to vector<16x128xbf16>
    %c96_94 = arith.constant 96 : index
    %c0_95 = arith.constant 0 : index
    %283 = vector.load %arg15[%c96_94, %c0_95] : memref<128x128xbf16, #tpu.memory_space<vmem>>, vector<16x128xbf16>
    tpu.vector_store %arg15[%c96_94, %c0_95], %282 {strides = array<i32>} : memref<128x128xbf16, #tpu.memory_space<vmem>>, vector<16x128xbf16>,
    %c112 = arith.constant 112 : index
    %c0_96 = arith.constant 0 : index
    %284 = vector.load %arg14[%c112, %c0_96] : memref<128x384xbf16, #tpu.memory_space<vmem>>, vector<16x384xbf16>
    %285 = arith.extf %284 : vector<16x384xbf16> to vector<16x384xf32>
    %286 = arith.truncf %281 : vector<16x128xf32> to vector<16x128xbf16>
    %cst_97 = arith.constant dense<0.000000e+00> : vector<16x384xf32>
    %287 = tpu.matmul %286, %20, %cst_97 {dimension_numbers = #tpu.dot_dimension_numbers<[1], [0], [0], [1], [0, 0, 1, 1], [], []>} : vector<16x128xbf16>, vector<128x384xbf16>, vector<16x384xf32> -> vector<16x384xf32>
    %288 = vector.extract_strided_slice %285 {offsets = [0, 0], sizes = [16, 128], strides = [1, 1]} : vector<16x384xf32> to vector<16x128xf32>
    %289 = vector.extract_strided_slice %287 {offsets = [0, 0], sizes = [16, 128], strides = [1, 1]} : vector<16x384xf32> to vector<16x128xf32>
    %290 = arith.addf %288, %289 : vector<16x128xf32>
    %cst_98 = arith.constant 5.000000e-01 : f32
    %291 = vector.broadcast %cst_98 : f32 to vector<16x128xf32>
    %292 = arith.mulf %291, %290 : vector<16x128xf32>
    %293 = math.tanh %292 : vector<16x128xf32>
    %cst_99 = arith.constant 5.000000e-01 : f32
    %294 = vector.broadcast %cst_99 : f32 to vector<16x128xf32>
    %295 = arith.mulf %294, %293 : vector<16x128xf32>
    %cst_100 = arith.constant 5.000000e-01 : f32
    %296 = vector.broadcast %cst_100 : f32 to vector<16x128xf32>
    %297 = arith.addf %295, %296 : vector<16x128xf32>
    %298 = vector.extract_strided_slice %285 {offsets = [0, 128], sizes = [16, 128], strides = [1, 1]} : vector<16x384xf32> to vector<16x128xf32>
    %299 = vector.extract_strided_slice %287 {offsets = [0, 128], sizes = [16, 128], strides = [1, 1]} : vector<16x384xf32> to vector<16x128xf32>
    %300 = arith.addf %298, %299 : vector<16x128xf32>
    %cst_101 = arith.constant 5.000000e-01 : f32
    %301 = vector.broadcast %cst_101 : f32 to vector<16x128xf32>
    %302 = arith.mulf %301, %300 : vector<16x128xf32>
    %303 = math.tanh %302 : vector<16x128xf32>
    %cst_102 = arith.constant 5.000000e-01 : f32
    %304 = vector.broadcast %cst_102 : f32 to vector<16x128xf32>
    %305 = arith.mulf %304, %303 : vector<16x128xf32>
    %cst_103 = arith.constant 5.000000e-01 : f32
    %306 = vector.broadcast %cst_103 : f32 to vector<16x128xf32>
    %307 = arith.addf %305, %306 : vector<16x128xf32>
    %308 = vector.extract_strided_slice %285 {offsets = [0, 256], sizes = [16, 128], strides = [1, 1]} : vector<16x384xf32> to vector<16x128xf32>
    %309 = vector.extract_strided_slice %287 {offsets = [0, 256], sizes = [16, 128], strides = [1, 1]} : vector<16x384xf32> to vector<16x128xf32>
    %310 = arith.addf %309, %23 : vector<16x128xf32>
    %311 = arith.mulf %297, %310 : vector<16x128xf32>
    %312 = arith.addf %308, %311 : vector<16x128xf32>
    %313 = math.tanh %312 : vector<16x128xf32>
    %cst_104 = arith.constant 1.000000e+00 : f32
    %314 = vector.broadcast %cst_104 : f32 to vector<16x128xf32>
    %315 = arith.subf %314, %307 : vector<16x128xf32>
    %316 = arith.mulf %315, %313 : vector<16x128xf32>
    %317 = arith.mulf %307, %281 : vector<16x128xf32>
    %318 = arith.addf %316, %317 : vector<16x128xf32>
    %319 = arith.truncf %318 : vector<16x128xf32> to vector<16x128xbf16>
    %c112_105 = arith.constant 112 : index
    %c0_106 = arith.constant 0 : index
    %320 = vector.load %arg15[%c112_105, %c0_106] : memref<128x128xbf16, #tpu.memory_space<vmem>>, vector<16x128xbf16>
    tpu.vector_store %arg15[%c112_105, %c0_106], %319 {strides = array<i32>} : memref<128x128xbf16, #tpu.memory_space<vmem>>, vector<16x128xbf16>,
    %c0_107 = arith.constant 0 : index
    %c0_108 = arith.constant 0 : index
    %321 = vector.load %arg15[%c0_107, %c0_108] : memref<128x128xbf16, #tpu.memory_space<vmem>>, vector<128x128xbf16>
    %c0_109 = arith.constant 0 : index
    %c0_110 = arith.constant 0 : index
    %322 = vector.load %arg7[%c0_109, %c0_110] : memref<128x384xbf16, #tpu.memory_space<vmem>>, vector<128x384xbf16>
    %cst_111 = arith.constant dense<0.000000e+00> : vector<128x384xf32>
    %323 = tpu.matmul %321, %322, %cst_111 {dimension_numbers = #tpu.dot_dimension_numbers<[1], [0], [0], [1], [0, 0, 1, 1], [], []>} : vector<128x128xbf16>, vector<128x384xbf16>, vector<128x384xf32> -> vector<128x384xf32>
    %c0_112 = arith.constant 0 : index
    %c0_113 = arith.constant 0 : index
    %324 = vector.load %arg9[%c0_112, %c0_113] : memref<1x384xf32, #tpu.memory_space<vmem>>, vector<1x384xf32>
    %325 = vector.broadcast %324 : vector<1x384xf32> to vector<128x384xf32>
    %326 = arith.addf %323, %325 : vector<128x384xf32>
    %327 = vector.extract_strided_slice %326 {offsets = [0, 0], sizes = [128, 128], strides = [1, 1]} : vector<128x384xf32> to vector<128x128xf32>
    %328 = arith.truncf %327 : vector<128x128xf32> to vector<128x128xbf16>
    %c0_114 = arith.constant 0 : index
    %c0_115 = arith.constant 0 : index
    %329 = vector.load %arg14[%c0_114, %c0_115] : memref<128x384xbf16, #tpu.memory_space<vmem>>, vector<128x128xbf16>
    tpu.vector_store %arg14[%c0_114, %c0_115], %328 {strides = array<i32>} : memref<128x384xbf16, #tpu.memory_space<vmem>>, vector<128x128xbf16>,
    %330 = vector.extract_strided_slice %326 {offsets = [0, 128], sizes = [128, 128], strides = [1, 1]} : vector<128x384xf32> to vector<128x128xf32>
    %331 = vector.broadcast %1 : vector<128x1xf32> to vector<128x128xf32>
    %332 = arith.addf %330, %331 : vector<128x128xf32>
    %333 = arith.truncf %332 : vector<128x128xf32> to vector<128x128xbf16>
    %c0_116 = arith.constant 0 : index
    %c128_117 = arith.constant 128 : index
    %334 = vector.load %arg14[%c0_116, %c128_117] : memref<128x384xbf16, #tpu.memory_space<vmem>>, vector<128x128xbf16>
    tpu.vector_store %arg14[%c0_116, %c128_117], %333 {strides = array<i32>} : memref<128x384xbf16, #tpu.memory_space<vmem>>, vector<128x128xbf16>,
    %335 = vector.extract_strided_slice %326 {offsets = [0, 256], sizes = [128, 128], strides = [1, 1]} : vector<128x384xf32> to vector<128x128xf32>
    %336 = arith.truncf %335 : vector<128x128xf32> to vector<128x128xbf16>
    %c0_118 = arith.constant 0 : index
    %c256_119 = arith.constant 256 : index
    %337 = vector.load %arg14[%c0_118, %c256_119] : memref<128x384xbf16, #tpu.memory_space<vmem>>, vector<128x128xbf16>
    tpu.vector_store %arg14[%c0_118, %c256_119], %336 {strides = array<i32>} : memref<128x384xbf16, #tpu.memory_space<vmem>>, vector<128x128xbf16>,
    %c0_120 = arith.constant 0 : index
    %c0_121 = arith.constant 0 : index
    %338 = vector.load %arg8[%c0_120, %c0_121] : memref<128x384xbf16, #tpu.memory_space<vmem>>, vector<128x384xbf16>
    %c0_122 = arith.constant 0 : index
    %c0_123 = arith.constant 0 : index
    %339 = vector.load %arg10[%c0_122, %c0_123] : memref<1x128xf32, #tpu.memory_space<vmem>>, vector<1x128xf32>
    %340 = vector.shape_cast %339 : vector<1x128xf32> to vector<1x128xf32>
    %341 = vector.broadcast %340 : vector<1x128xf32> to vector<16x128xf32>
    %cst_124 = arith.constant 0.000000e+00 : f32
    %342 = vector.broadcast %cst_124 : f32 to vector<16x128xf32>
    %c0_125 = arith.constant 0 : index
    %c0_126 = arith.constant 0 : index
    %343 = vector.load %arg14[%c0_125, %c0_126] : memref<128x384xbf16, #tpu.memory_space<vmem>>, vector<16x384xbf16>
    %344 = arith.extf %343 : vector<16x384xbf16> to vector<16x384xf32>
    %345 = arith.truncf %342 : vector<16x128xf32> to vector<16x128xbf16>
    %cst_127 = arith.constant dense<0.000000e+00> : vector<16x384xf32>
    %346 = tpu.matmul %345, %338, %cst_127 {dimension_numbers = #tpu.dot_dimension_numbers<[1], [0], [0], [1], [0, 0, 1, 1], [], []>} : vector<16x128xbf16>, vector<128x384xbf16>, vector<16x384xf32> -> vector<16x384xf32>
    %347 = vector.extract_strided_slice %344 {offsets = [0, 0], sizes = [16, 128], strides = [1, 1]} : vector<16x384xf32> to vector<16x128xf32>
    %348 = vector.extract_strided_slice %346 {offsets = [0, 0], sizes = [16, 128], strides = [1, 1]} : vector<16x384xf32> to vector<16x128xf32>
    %349 = arith.addf %347, %348 : vector<16x128xf32>
    %cst_128 = arith.constant 5.000000e-01 : f32
    %350 = vector.broadcast %cst_128 : f32 to vector<16x128xf32>
    %351 = arith.mulf %350, %349 : vector<16x128xf32>
    %352 = math.tanh %351 : vector<16x128xf32>
    %cst_129 = arith.constant 5.000000e-01 : f32
    %353 = vector.broadcast %cst_129 : f32 to vector<16x128xf32>
    %354 = arith.mulf %353, %352 : vector<16x128xf32>
    %cst_130 = arith.constant 5.000000e-01 : f32
    %355 = vector.broadcast %cst_130 : f32 to vector<16x128xf32>
    %356 = arith.addf %354, %355 : vector<16x128xf32>
    %357 = vector.extract_strided_slice %344 {offsets = [0, 128], sizes = [16, 128], strides = [1, 1]} : vector<16x384xf32> to vector<16x128xf32>
    %358 = vector.extract_strided_slice %346 {offsets = [0, 128], sizes = [16, 128], strides = [1, 1]} : vector<16x384xf32> to vector<16x128xf32>
    %359 = arith.addf %357, %358 : vector<16x128xf32>
    %cst_131 = arith.constant 5.000000e-01 : f32
    %360 = vector.broadcast %cst_131 : f32 to vector<16x128xf32>
    %361 = arith.mulf %360, %359 : vector<16x128xf32>
    %362 = math.tanh %361 : vector<16x128xf32>
    %cst_132 = arith.constant 5.000000e-01 : f32
    %363 = vector.broadcast %cst_132 : f32 to vector<16x128xf32>
    %364 = arith.mulf %363, %362 : vector<16x128xf32>
    %cst_133 = arith.constant 5.000000e-01 : f32
    %365 = vector.broadcast %cst_133 : f32 to vector<16x128xf32>
    %366 = arith.addf %364, %365 : vector<16x128xf32>
    %367 = vector.extract_strided_slice %344 {offsets = [0, 256], sizes = [16, 128], strides = [1, 1]} : vector<16x384xf32> to vector<16x128xf32>
    %368 = vector.extract_strided_slice %346 {offsets = [0, 256], sizes = [16, 128], strides = [1, 1]} : vector<16x384xf32> to vector<16x128xf32>
    %369 = arith.addf %368, %341 : vector<16x128xf32>
    %370 = arith.mulf %356, %369 : vector<16x128xf32>
    %371 = arith.addf %367, %370 : vector<16x128xf32>
    %372 = math.tanh %371 : vector<16x128xf32>
    %cst_134 = arith.constant 1.000000e+00 : f32
    %373 = vector.broadcast %cst_134 : f32 to vector<16x128xf32>
    %374 = arith.subf %373, %366 : vector<16x128xf32>
    %375 = arith.mulf %374, %372 : vector<16x128xf32>
    %376 = arith.mulf %366, %342 : vector<16x128xf32>
    %377 = arith.addf %375, %376 : vector<16x128xf32>
    %c16_135 = arith.constant 16 : index
    %c0_136 = arith.constant 0 : index
    %378 = vector.load %arg14[%c16_135, %c0_136] : memref<128x384xbf16, #tpu.memory_space<vmem>>, vector<16x384xbf16>
    %379 = arith.extf %378 : vector<16x384xbf16> to vector<16x384xf32>
    %380 = arith.truncf %377 : vector<16x128xf32> to vector<16x128xbf16>
    %cst_137 = arith.constant dense<0.000000e+00> : vector<16x384xf32>
    %381 = tpu.matmul %380, %338, %cst_137 {dimension_numbers = #tpu.dot_dimension_numbers<[1], [0], [0], [1], [0, 0, 1, 1], [], []>} : vector<16x128xbf16>, vector<128x384xbf16>, vector<16x384xf32> -> vector<16x384xf32>
    %382 = vector.extract_strided_slice %379 {offsets = [0, 0], sizes = [16, 128], strides = [1, 1]} : vector<16x384xf32> to vector<16x128xf32>
    %383 = vector.extract_strided_slice %381 {offsets = [0, 0], sizes = [16, 128], strides = [1, 1]} : vector<16x384xf32> to vector<16x128xf32>
    %384 = arith.addf %382, %383 : vector<16x128xf32>
    %cst_138 = arith.constant 5.000000e-01 : f32
    %385 = vector.broadcast %cst_138 : f32 to vector<16x128xf32>
    %386 = arith.mulf %385, %384 : vector<16x128xf32>
    %387 = math.tanh %386 : vector<16x128xf32>
    %cst_139 = arith.constant 5.000000e-01 : f32
    %388 = vector.broadcast %cst_139 : f32 to vector<16x128xf32>
    %389 = arith.mulf %388, %387 : vector<16x128xf32>
    %cst_140 = arith.constant 5.000000e-01 : f32
    %390 = vector.broadcast %cst_140 : f32 to vector<16x128xf32>
    %391 = arith.addf %389, %390 : vector<16x128xf32>
    %392 = vector.extract_strided_slice %379 {offsets = [0, 128], sizes = [16, 128], strides = [1, 1]} : vector<16x384xf32> to vector<16x128xf32>
    %393 = vector.extract_strided_slice %381 {offsets = [0, 128], sizes = [16, 128], strides = [1, 1]} : vector<16x384xf32> to vector<16x128xf32>
    %394 = arith.addf %392, %393 : vector<16x128xf32>
    %cst_141 = arith.constant 5.000000e-01 : f32
    %395 = vector.broadcast %cst_141 : f32 to vector<16x128xf32>
    %396 = arith.mulf %395, %394 : vector<16x128xf32>
    %397 = math.tanh %396 : vector<16x128xf32>
    %cst_142 = arith.constant 5.000000e-01 : f32
    %398 = vector.broadcast %cst_142 : f32 to vector<16x128xf32>
    %399 = arith.mulf %398, %397 : vector<16x128xf32>
    %cst_143 = arith.constant 5.000000e-01 : f32
    %400 = vector.broadcast %cst_143 : f32 to vector<16x128xf32>
    %401 = arith.addf %399, %400 : vector<16x128xf32>
    %402 = vector.extract_strided_slice %379 {offsets = [0, 256], sizes = [16, 128], strides = [1, 1]} : vector<16x384xf32> to vector<16x128xf32>
    %403 = vector.extract_strided_slice %381 {offsets = [0, 256], sizes = [16, 128], strides = [1, 1]} : vector<16x384xf32> to vector<16x128xf32>
    %404 = arith.addf %403, %341 : vector<16x128xf32>
    %405 = arith.mulf %391, %404 : vector<16x128xf32>
    %406 = arith.addf %402, %405 : vector<16x128xf32>
    %407 = math.tanh %406 : vector<16x128xf32>
    %cst_144 = arith.constant 1.000000e+00 : f32
    %408 = vector.broadcast %cst_144 : f32 to vector<16x128xf32>
    %409 = arith.subf %408, %401 : vector<16x128xf32>
    %410 = arith.mulf %409, %407 : vector<16x128xf32>
    %411 = arith.mulf %401, %377 : vector<16x128xf32>
    %412 = arith.addf %410, %411 : vector<16x128xf32>
    %c32_145 = arith.constant 32 : index
    %c0_146 = arith.constant 0 : index
    %413 = vector.load %arg14[%c32_145, %c0_146] : memref<128x384xbf16, #tpu.memory_space<vmem>>, vector<16x384xbf16>
    %414 = arith.extf %413 : vector<16x384xbf16> to vector<16x384xf32>
    %415 = arith.truncf %412 : vector<16x128xf32> to vector<16x128xbf16>
    %cst_147 = arith.constant dense<0.000000e+00> : vector<16x384xf32>
    %416 = tpu.matmul %415, %338, %cst_147 {dimension_numbers = #tpu.dot_dimension_numbers<[1], [0], [0], [1], [0, 0, 1, 1], [], []>} : vector<16x128xbf16>, vector<128x384xbf16>, vector<16x384xf32> -> vector<16x384xf32>
    %417 = vector.extract_strided_slice %414 {offsets = [0, 0], sizes = [16, 128], strides = [1, 1]} : vector<16x384xf32> to vector<16x128xf32>
    %418 = vector.extract_strided_slice %416 {offsets = [0, 0], sizes = [16, 128], strides = [1, 1]} : vector<16x384xf32> to vector<16x128xf32>
    %419 = arith.addf %417, %418 : vector<16x128xf32>
    %cst_148 = arith.constant 5.000000e-01 : f32
    %420 = vector.broadcast %cst_148 : f32 to vector<16x128xf32>
    %421 = arith.mulf %420, %419 : vector<16x128xf32>
    %422 = math.tanh %421 : vector<16x128xf32>
    %cst_149 = arith.constant 5.000000e-01 : f32
    %423 = vector.broadcast %cst_149 : f32 to vector<16x128xf32>
    %424 = arith.mulf %423, %422 : vector<16x128xf32>
    %cst_150 = arith.constant 5.000000e-01 : f32
    %425 = vector.broadcast %cst_150 : f32 to vector<16x128xf32>
    %426 = arith.addf %424, %425 : vector<16x128xf32>
    %427 = vector.extract_strided_slice %414 {offsets = [0, 128], sizes = [16, 128], strides = [1, 1]} : vector<16x384xf32> to vector<16x128xf32>
    %428 = vector.extract_strided_slice %416 {offsets = [0, 128], sizes = [16, 128], strides = [1, 1]} : vector<16x384xf32> to vector<16x128xf32>
    %429 = arith.addf %427, %428 : vector<16x128xf32>
    %cst_151 = arith.constant 5.000000e-01 : f32
    %430 = vector.broadcast %cst_151 : f32 to vector<16x128xf32>
    %431 = arith.mulf %430, %429 : vector<16x128xf32>
    %432 = math.tanh %431 : vector<16x128xf32>
    %cst_152 = arith.constant 5.000000e-01 : f32
    %433 = vector.broadcast %cst_152 : f32 to vector<16x128xf32>
    %434 = arith.mulf %433, %432 : vector<16x128xf32>
    %cst_153 = arith.constant 5.000000e-01 : f32
    %435 = vector.broadcast %cst_153 : f32 to vector<16x128xf32>
    %436 = arith.addf %434, %435 : vector<16x128xf32>
    %437 = vector.extract_strided_slice %414 {offsets = [0, 256], sizes = [16, 128], strides = [1, 1]} : vector<16x384xf32> to vector<16x128xf32>
    %438 = vector.extract_strided_slice %416 {offsets = [0, 256], sizes = [16, 128], strides = [1, 1]} : vector<16x384xf32> to vector<16x128xf32>
    %439 = arith.addf %438, %341 : vector<16x128xf32>
    %440 = arith.mulf %426, %439 : vector<16x128xf32>
    %441 = arith.addf %437, %440 : vector<16x128xf32>
    %442 = math.tanh %441 : vector<16x128xf32>
    %cst_154 = arith.constant 1.000000e+00 : f32
    %443 = vector.broadcast %cst_154 : f32 to vector<16x128xf32>
    %444 = arith.subf %443, %436 : vector<16x128xf32>
    %445 = arith.mulf %444, %442 : vector<16x128xf32>
    %446 = arith.mulf %436, %412 : vector<16x128xf32>
    %447 = arith.addf %445, %446 : vector<16x128xf32>
    %c48_155 = arith.constant 48 : index
    %c0_156 = arith.constant 0 : index
    %448 = vector.load %arg14[%c48_155, %c0_156] : memref<128x384xbf16, #tpu.memory_space<vmem>>, vector<16x384xbf16>
    %449 = arith.extf %448 : vector<16x384xbf16> to vector<16x384xf32>
    %450 = arith.truncf %447 : vector<16x128xf32> to vector<16x128xbf16>
    %cst_157 = arith.constant dense<0.000000e+00> : vector<16x384xf32>
    %451 = tpu.matmul %450, %338, %cst_157 {dimension_numbers = #tpu.dot_dimension_numbers<[1], [0], [0], [1], [0, 0, 1, 1], [], []>} : vector<16x128xbf16>, vector<128x384xbf16>, vector<16x384xf32> -> vector<16x384xf32>
    %452 = vector.extract_strided_slice %449 {offsets = [0, 0], sizes = [16, 128], strides = [1, 1]} : vector<16x384xf32> to vector<16x128xf32>
    %453 = vector.extract_strided_slice %451 {offsets = [0, 0], sizes = [16, 128], strides = [1, 1]} : vector<16x384xf32> to vector<16x128xf32>
    %454 = arith.addf %452, %453 : vector<16x128xf32>
    %cst_158 = arith.constant 5.000000e-01 : f32
    %455 = vector.broadcast %cst_158 : f32 to vector<16x128xf32>
    %456 = arith.mulf %455, %454 : vector<16x128xf32>
    %457 = math.tanh %456 : vector<16x128xf32>
    %cst_159 = arith.constant 5.000000e-01 : f32
    %458 = vector.broadcast %cst_159 : f32 to vector<16x128xf32>
    %459 = arith.mulf %458, %457 : vector<16x128xf32>
    %cst_160 = arith.constant 5.000000e-01 : f32
    %460 = vector.broadcast %cst_160 : f32 to vector<16x128xf32>
    %461 = arith.addf %459, %460 : vector<16x128xf32>
    %462 = vector.extract_strided_slice %449 {offsets = [0, 128], sizes = [16, 128], strides = [1, 1]} : vector<16x384xf32> to vector<16x128xf32>
    %463 = vector.extract_strided_slice %451 {offsets = [0, 128], sizes = [16, 128], strides = [1, 1]} : vector<16x384xf32> to vector<16x128xf32>
    %464 = arith.addf %462, %463 : vector<16x128xf32>
    %cst_161 = arith.constant 5.000000e-01 : f32
    %465 = vector.broadcast %cst_161 : f32 to vector<16x128xf32>
    %466 = arith.mulf %465, %464 : vector<16x128xf32>
    %467 = math.tanh %466 : vector<16x128xf32>
    %cst_162 = arith.constant 5.000000e-01 : f32
    %468 = vector.broadcast %cst_162 : f32 to vector<16x128xf32>
    %469 = arith.mulf %468, %467 : vector<16x128xf32>
    %cst_163 = arith.constant 5.000000e-01 : f32
    %470 = vector.broadcast %cst_163 : f32 to vector<16x128xf32>
    %471 = arith.addf %469, %470 : vector<16x128xf32>
    %472 = vector.extract_strided_slice %449 {offsets = [0, 256], sizes = [16, 128], strides = [1, 1]} : vector<16x384xf32> to vector<16x128xf32>
    %473 = vector.extract_strided_slice %451 {offsets = [0, 256], sizes = [16, 128], strides = [1, 1]} : vector<16x384xf32> to vector<16x128xf32>
    %474 = arith.addf %473, %341 : vector<16x128xf32>
    %475 = arith.mulf %461, %474 : vector<16x128xf32>
    %476 = arith.addf %472, %475 : vector<16x128xf32>
    %477 = math.tanh %476 : vector<16x128xf32>
    %cst_164 = arith.constant 1.000000e+00 : f32
    %478 = vector.broadcast %cst_164 : f32 to vector<16x128xf32>
    %479 = arith.subf %478, %471 : vector<16x128xf32>
    %480 = arith.mulf %479, %477 : vector<16x128xf32>
    %481 = arith.mulf %471, %447 : vector<16x128xf32>
    %482 = arith.addf %480, %481 : vector<16x128xf32>
    %c64_165 = arith.constant 64 : index
    %c0_166 = arith.constant 0 : index
    %483 = vector.load %arg14[%c64_165, %c0_166] : memref<128x384xbf16, #tpu.memory_space<vmem>>, vector<16x384xbf16>
    %484 = arith.extf %483 : vector<16x384xbf16> to vector<16x384xf32>
    %485 = arith.truncf %482 : vector<16x128xf32> to vector<16x128xbf16>
    %cst_167 = arith.constant dense<0.000000e+00> : vector<16x384xf32>
    %486 = tpu.matmul %485, %338, %cst_167 {dimension_numbers = #tpu.dot_dimension_numbers<[1], [0], [0], [1], [0, 0, 1, 1], [], []>} : vector<16x128xbf16>, vector<128x384xbf16>, vector<16x384xf32> -> vector<16x384xf32>
    %487 = vector.extract_strided_slice %484 {offsets = [0, 0], sizes = [16, 128], strides = [1, 1]} : vector<16x384xf32> to vector<16x128xf32>
    %488 = vector.extract_strided_slice %486 {offsets = [0, 0], sizes = [16, 128], strides = [1, 1]} : vector<16x384xf32> to vector<16x128xf32>
    %489 = arith.addf %487, %488 : vector<16x128xf32>
    %cst_168 = arith.constant 5.000000e-01 : f32
    %490 = vector.broadcast %cst_168 : f32 to vector<16x128xf32>
    %491 = arith.mulf %490, %489 : vector<16x128xf32>
    %492 = math.tanh %491 : vector<16x128xf32>
    %cst_169 = arith.constant 5.000000e-01 : f32
    %493 = vector.broadcast %cst_169 : f32 to vector<16x128xf32>
    %494 = arith.mulf %493, %492 : vector<16x128xf32>
    %cst_170 = arith.constant 5.000000e-01 : f32
    %495 = vector.broadcast %cst_170 : f32 to vector<16x128xf32>
    %496 = arith.addf %494, %495 : vector<16x128xf32>
    %497 = vector.extract_strided_slice %484 {offsets = [0, 128], sizes = [16, 128], strides = [1, 1]} : vector<16x384xf32> to vector<16x128xf32>
    %498 = vector.extract_strided_slice %486 {offsets = [0, 128], sizes = [16, 128], strides = [1, 1]} : vector<16x384xf32> to vector<16x128xf32>
    %499 = arith.addf %497, %498 : vector<16x128xf32>
    %cst_171 = arith.constant 5.000000e-01 : f32
    %500 = vector.broadcast %cst_171 : f32 to vector<16x128xf32>
    %501 = arith.mulf %500, %499 : vector<16x128xf32>
    %502 = math.tanh %501 : vector<16x128xf32>
    %cst_172 = arith.constant 5.000000e-01 : f32
    %503 = vector.broadcast %cst_172 : f32 to vector<16x128xf32>
    %504 = arith.mulf %503, %502 : vector<16x128xf32>
    %cst_173 = arith.constant 5.000000e-01 : f32
    %505 = vector.broadcast %cst_173 : f32 to vector<16x128xf32>
    %506 = arith.addf %504, %505 : vector<16x128xf32>
    %507 = vector.extract_strided_slice %484 {offsets = [0, 256], sizes = [16, 128], strides = [1, 1]} : vector<16x384xf32> to vector<16x128xf32>
    %508 = vector.extract_strided_slice %486 {offsets = [0, 256], sizes = [16, 128], strides = [1, 1]} : vector<16x384xf32> to vector<16x128xf32>
    %509 = arith.addf %508, %341 : vector<16x128xf32>
    %510 = arith.mulf %496, %509 : vector<16x128xf32>
    %511 = arith.addf %507, %510 : vector<16x128xf32>
    %512 = math.tanh %511 : vector<16x128xf32>
    %cst_174 = arith.constant 1.000000e+00 : f32
    %513 = vector.broadcast %cst_174 : f32 to vector<16x128xf32>
    %514 = arith.subf %513, %506 : vector<16x128xf32>
    %515 = arith.mulf %514, %512 : vector<16x128xf32>
    %516 = arith.mulf %506, %482 : vector<16x128xf32>
    %517 = arith.addf %515, %516 : vector<16x128xf32>
    %c80_175 = arith.constant 80 : index
    %c0_176 = arith.constant 0 : index
    %518 = vector.load %arg14[%c80_175, %c0_176] : memref<128x384xbf16, #tpu.memory_space<vmem>>, vector<16x384xbf16>
    %519 = arith.extf %518 : vector<16x384xbf16> to vector<16x384xf32>
    %520 = arith.truncf %517 : vector<16x128xf32> to vector<16x128xbf16>
    %cst_177 = arith.constant dense<0.000000e+00> : vector<16x384xf32>
    %521 = tpu.matmul %520, %338, %cst_177 {dimension_numbers = #tpu.dot_dimension_numbers<[1], [0], [0], [1], [0, 0, 1, 1], [], []>} : vector<16x128xbf16>, vector<128x384xbf16>, vector<16x384xf32> -> vector<16x384xf32>
    %522 = vector.extract_strided_slice %519 {offsets = [0, 0], sizes = [16, 128], strides = [1, 1]} : vector<16x384xf32> to vector<16x128xf32>
    %523 = vector.extract_strided_slice %521 {offsets = [0, 0], sizes = [16, 128], strides = [1, 1]} : vector<16x384xf32> to vector<16x128xf32>
    %524 = arith.addf %522, %523 : vector<16x128xf32>
    %cst_178 = arith.constant 5.000000e-01 : f32
    %525 = vector.broadcast %cst_178 : f32 to vector<16x128xf32>
    %526 = arith.mulf %525, %524 : vector<16x128xf32>
    %527 = math.tanh %526 : vector<16x128xf32>
    %cst_179 = arith.constant 5.000000e-01 : f32
    %528 = vector.broadcast %cst_179 : f32 to vector<16x128xf32>
    %529 = arith.mulf %528, %527 : vector<16x128xf32>
    %cst_180 = arith.constant 5.000000e-01 : f32
    %530 = vector.broadcast %cst_180 : f32 to vector<16x128xf32>
    %531 = arith.addf %529, %530 : vector<16x128xf32>
    %532 = vector.extract_strided_slice %519 {offsets = [0, 128], sizes = [16, 128], strides = [1, 1]} : vector<16x384xf32> to vector<16x128xf32>
    %533 = vector.extract_strided_slice %521 {offsets = [0, 128], sizes = [16, 128], strides = [1, 1]} : vector<16x384xf32> to vector<16x128xf32>
    %534 = arith.addf %532, %533 : vector<16x128xf32>
    %cst_181 = arith.constant 5.000000e-01 : f32
    %535 = vector.broadcast %cst_181 : f32 to vector<16x128xf32>
    %536 = arith.mulf %535, %534 : vector<16x128xf32>
    %537 = math.tanh %536 : vector<16x128xf32>
    %cst_182 = arith.constant 5.000000e-01 : f32
    %538 = vector.broadcast %cst_182 : f32 to vector<16x128xf32>
    %539 = arith.mulf %538, %537 : vector<16x128xf32>
    %cst_183 = arith.constant 5.000000e-01 : f32
    %540 = vector.broadcast %cst_183 : f32 to vector<16x128xf32>
    %541 = arith.addf %539, %540 : vector<16x128xf32>
    %542 = vector.extract_strided_slice %519 {offsets = [0, 256], sizes = [16, 128], strides = [1, 1]} : vector<16x384xf32> to vector<16x128xf32>
    %543 = vector.extract_strided_slice %521 {offsets = [0, 256], sizes = [16, 128], strides = [1, 1]} : vector<16x384xf32> to vector<16x128xf32>
    %544 = arith.addf %543, %341 : vector<16x128xf32>
    %545 = arith.mulf %531, %544 : vector<16x128xf32>
    %546 = arith.addf %542, %545 : vector<16x128xf32>
    %547 = math.tanh %546 : vector<16x128xf32>
    %cst_184 = arith.constant 1.000000e+00 : f32
    %548 = vector.broadcast %cst_184 : f32 to vector<16x128xf32>
    %549 = arith.subf %548, %541 : vector<16x128xf32>
    %550 = arith.mulf %549, %547 : vector<16x128xf32>
    %551 = arith.mulf %541, %517 : vector<16x128xf32>
    %552 = arith.addf %550, %551 : vector<16x128xf32>
    %c96_185 = arith.constant 96 : index
    %c0_186 = arith.constant 0 : index
    %553 = vector.load %arg14[%c96_185, %c0_186] : memref<128x384xbf16, #tpu.memory_space<vmem>>, vector<16x384xbf16>
    %554 = arith.extf %553 : vector<16x384xbf16> to vector<16x384xf32>
    %555 = arith.truncf %552 : vector<16x128xf32> to vector<16x128xbf16>
    %cst_187 = arith.constant dense<0.000000e+00> : vector<16x384xf32>
    %556 = tpu.matmul %555, %338, %cst_187 {dimension_numbers = #tpu.dot_dimension_numbers<[1], [0], [0], [1], [0, 0, 1, 1], [], []>} : vector<16x128xbf16>, vector<128x384xbf16>, vector<16x384xf32> -> vector<16x384xf32>
    %557 = vector.extract_strided_slice %554 {offsets = [0, 0], sizes = [16, 128], strides = [1, 1]} : vector<16x384xf32> to vector<16x128xf32>
    %558 = vector.extract_strided_slice %556 {offsets = [0, 0], sizes = [16, 128], strides = [1, 1]} : vector<16x384xf32> to vector<16x128xf32>
    %559 = arith.addf %557, %558 : vector<16x128xf32>
    %cst_188 = arith.constant 5.000000e-01 : f32
    %560 = vector.broadcast %cst_188 : f32 to vector<16x128xf32>
    %561 = arith.mulf %560, %559 : vector<16x128xf32>
    %562 = math.tanh %561 : vector<16x128xf32>
    %cst_189 = arith.constant 5.000000e-01 : f32
    %563 = vector.broadcast %cst_189 : f32 to vector<16x128xf32>
    %564 = arith.mulf %563, %562 : vector<16x128xf32>
    %cst_190 = arith.constant 5.000000e-01 : f32
    %565 = vector.broadcast %cst_190 : f32 to vector<16x128xf32>
    %566 = arith.addf %564, %565 : vector<16x128xf32>
    %567 = vector.extract_strided_slice %554 {offsets = [0, 128], sizes = [16, 128], strides = [1, 1]} : vector<16x384xf32> to vector<16x128xf32>
    %568 = vector.extract_strided_slice %556 {offsets = [0, 128], sizes = [16, 128], strides = [1, 1]} : vector<16x384xf32> to vector<16x128xf32>
    %569 = arith.addf %567, %568 : vector<16x128xf32>
    %cst_191 = arith.constant 5.000000e-01 : f32
    %570 = vector.broadcast %cst_191 : f32 to vector<16x128xf32>
    %571 = arith.mulf %570, %569 : vector<16x128xf32>
    %572 = math.tanh %571 : vector<16x128xf32>
    %cst_192 = arith.constant 5.000000e-01 : f32
    %573 = vector.broadcast %cst_192 : f32 to vector<16x128xf32>
    %574 = arith.mulf %573, %572 : vector<16x128xf32>
    %cst_193 = arith.constant 5.000000e-01 : f32
    %575 = vector.broadcast %cst_193 : f32 to vector<16x128xf32>
    %576 = arith.addf %574, %575 : vector<16x128xf32>
    %577 = vector.extract_strided_slice %554 {offsets = [0, 256], sizes = [16, 128], strides = [1, 1]} : vector<16x384xf32> to vector<16x128xf32>
    %578 = vector.extract_strided_slice %556 {offsets = [0, 256], sizes = [16, 128], strides = [1, 1]} : vector<16x384xf32> to vector<16x128xf32>
    %579 = arith.addf %578, %341 : vector<16x128xf32>
    %580 = arith.mulf %566, %579 : vector<16x128xf32>
    %581 = arith.addf %577, %580 : vector<16x128xf32>
    %582 = math.tanh %581 : vector<16x128xf32>
    %cst_194 = arith.constant 1.000000e+00 : f32
    %583 = vector.broadcast %cst_194 : f32 to vector<16x128xf32>
    %584 = arith.subf %583, %576 : vector<16x128xf32>
    %585 = arith.mulf %584, %582 : vector<16x128xf32>
    %586 = arith.mulf %576, %552 : vector<16x128xf32>
    %587 = arith.addf %585, %586 : vector<16x128xf32>
    %c112_195 = arith.constant 112 : index
    %c0_196 = arith.constant 0 : index
    %588 = vector.load %arg14[%c112_195, %c0_196] : memref<128x384xbf16, #tpu.memory_space<vmem>>, vector<16x384xbf16>
    %589 = arith.extf %588 : vector<16x384xbf16> to vector<16x384xf32>
    %590 = arith.truncf %587 : vector<16x128xf32> to vector<16x128xbf16>
    %cst_197 = arith.constant dense<0.000000e+00> : vector<16x384xf32>
    %591 = tpu.matmul %590, %338, %cst_197 {dimension_numbers = #tpu.dot_dimension_numbers<[1], [0], [0], [1], [0, 0, 1, 1], [], []>} : vector<16x128xbf16>, vector<128x384xbf16>, vector<16x384xf32> -> vector<16x384xf32>
    %592 = vector.extract_strided_slice %589 {offsets = [0, 0], sizes = [16, 128], strides = [1, 1]} : vector<16x384xf32> to vector<16x128xf32>
    %593 = vector.extract_strided_slice %591 {offsets = [0, 0], sizes = [16, 128], strides = [1, 1]} : vector<16x384xf32> to vector<16x128xf32>
    %594 = arith.addf %592, %593 : vector<16x128xf32>
    %cst_198 = arith.constant 5.000000e-01 : f32
    %595 = vector.broadcast %cst_198 : f32 to vector<16x128xf32>
    %596 = arith.mulf %595, %594 : vector<16x128xf32>
    %597 = math.tanh %596 : vector<16x128xf32>
    %cst_199 = arith.constant 5.000000e-01 : f32
    %598 = vector.broadcast %cst_199 : f32 to vector<16x128xf32>
    %599 = arith.mulf %598, %597 : vector<16x128xf32>
    %cst_200 = arith.constant 5.000000e-01 : f32
    %600 = vector.broadcast %cst_200 : f32 to vector<16x128xf32>
    %601 = arith.addf %599, %600 : vector<16x128xf32>
    %602 = vector.extract_strided_slice %589 {offsets = [0, 128], sizes = [16, 128], strides = [1, 1]} : vector<16x384xf32> to vector<16x128xf32>
    %603 = vector.extract_strided_slice %591 {offsets = [0, 128], sizes = [16, 128], strides = [1, 1]} : vector<16x384xf32> to vector<16x128xf32>
    %604 = arith.addf %602, %603 : vector<16x128xf32>
    %cst_201 = arith.constant 5.000000e-01 : f32
    %605 = vector.broadcast %cst_201 : f32 to vector<16x128xf32>
    %606 = arith.mulf %605, %604 : vector<16x128xf32>
    %607 = math.tanh %606 : vector<16x128xf32>
    %cst_202 = arith.constant 5.000000e-01 : f32
    %608 = vector.broadcast %cst_202 : f32 to vector<16x128xf32>
    %609 = arith.mulf %608, %607 : vector<16x128xf32>
    %cst_203 = arith.constant 5.000000e-01 : f32
    %610 = vector.broadcast %cst_203 : f32 to vector<16x128xf32>
    %611 = arith.addf %609, %610 : vector<16x128xf32>
    %612 = vector.extract_strided_slice %589 {offsets = [0, 256], sizes = [16, 128], strides = [1, 1]} : vector<16x384xf32> to vector<16x128xf32>
    %613 = vector.extract_strided_slice %591 {offsets = [0, 256], sizes = [16, 128], strides = [1, 1]} : vector<16x384xf32> to vector<16x128xf32>
    %614 = arith.addf %613, %341 : vector<16x128xf32>
    %615 = arith.mulf %601, %614 : vector<16x128xf32>
    %616 = arith.addf %612, %615 : vector<16x128xf32>
    %617 = math.tanh %616 : vector<16x128xf32>
    %cst_204 = arith.constant 1.000000e+00 : f32
    %618 = vector.broadcast %cst_204 : f32 to vector<16x128xf32>
    %619 = arith.subf %618, %611 : vector<16x128xf32>
    %620 = arith.mulf %619, %617 : vector<16x128xf32>
    %621 = arith.mulf %611, %587 : vector<16x128xf32>
    %622 = arith.addf %620, %621 : vector<16x128xf32>
    %623 = arith.truncf %622 : vector<16x128xf32> to vector<16x128xbf16>
    %c0_205 = arith.constant 0 : index
    %c0_206 = arith.constant 0 : index
    %624 = vector.load %arg11[%c0_205, %c0_206] : memref<128x128xbf16, #tpu.memory_space<vmem>>, vector<128x128xbf16>
    %cst_207 = arith.constant dense<0.000000e+00> : vector<16x128xf32>
    %625 = tpu.matmul %623, %624, %cst_207 {dimension_numbers = #tpu.dot_dimension_numbers<[1], [0], [0], [1], [0, 0, 1, 1], [], []>} : vector<16x128xbf16>, vector<128x128xbf16>, vector<16x128xf32> -> vector<16x128xf32>
    %c0_208 = arith.constant 0 : index
    %c0_209 = arith.constant 0 : index
    %626 = vector.load %arg12[%c0_208, %c0_209] : memref<1x128xf32, #tpu.memory_space<vmem>>, vector<1x128xf32>
    %627 = vector.broadcast %626 : vector<1x128xf32> to vector<16x128xf32>
    %628 = arith.addf %625, %627 : vector<16x128xf32>
    %c0_210 = arith.constant 0 : index
    %c0_211 = arith.constant 0 : index
    %c0_212 = arith.constant 0 : index
    %629 = vector.load %arg13[%c0_210, %c0_211, %c0_212] : memref<1x16x128xf32, #tpu.memory_space<vmem>>, vector<1x16x128xf32>
    %630 = vector.shape_cast %629 : vector<1x16x128xf32> to vector<16x128xf32>
    %631 = vector.shape_cast %628 : vector<16x128xf32> to vector<1x16x128xf32>
    tpu.vector_store %arg13[%c0_210, %c0_211, %c0_212], %631 {strides = array<i32>} : memref<1x16x128xf32, #tpu.memory_space<vmem>>, vector<1x16x128xf32>,
    return
  }
  func.func @transform_0(%arg0: i32) -> (i32, i32, i32) {
    %c0_i32 = arith.constant 0 : i32
    %c0_i32_0 = arith.constant 0 : i32
    %c0_i32_1 = arith.constant 0 : i32
    return %arg0, %c0_i32, %c0_i32_0 : i32, i32, i32
  }
  func.func @transform_1(%arg0: i32) -> (i32, i32, i32) {
    %c0_i32 = arith.constant 0 : i32
    %c0_i32_0 = arith.constant 0 : i32
    %c0_i32_1 = arith.constant 0 : i32
    return %arg0, %c0_i32, %c0_i32_0 : i32, i32, i32
  }
  func.func @transform_2(%arg0: i32) -> (i32, i32) {
    %c0_i32 = arith.constant 0 : i32
    %c0_i32_0 = arith.constant 0 : i32
    %c0_i32_1 = arith.constant 0 : i32
    return %c0_i32, %c0_i32_0 : i32, i32
  }
  func.func @transform_3(%arg0: i32) -> (i32, i32) {
    %c0_i32 = arith.constant 0 : i32
    %c0_i32_0 = arith.constant 0 : i32
    %c0_i32_1 = arith.constant 0 : i32
    return %c0_i32, %c0_i32_0 : i32, i32
  }
  func.func @transform_4(%arg0: i32) -> (i32, i32) {
    %c0_i32 = arith.constant 0 : i32
    %c0_i32_0 = arith.constant 0 : i32
    %c0_i32_1 = arith.constant 0 : i32
    return %c0_i32, %c0_i32_0 : i32, i32
  }
  func.func @transform_5(%arg0: i32) -> (i32, i32) {
    %c0_i32 = arith.constant 0 : i32
    %c0_i32_0 = arith.constant 0 : i32
    %c0_i32_1 = arith.constant 0 : i32
    return %c0_i32, %c0_i32_0 : i32, i32
  }
  func.func @transform_6(%arg0: i32) -> (i32, i32) {
    %c0_i32 = arith.constant 0 : i32
    %c0_i32_0 = arith.constant 0 : i32
    %c0_i32_1 = arith.constant 0 : i32
    return %c0_i32, %c0_i32_0 : i32, i32
  }
  func.func @transform_7(%arg0: i32) -> (i32, i32) {
    %c0_i32 = arith.constant 0 : i32
    %c0_i32_0 = arith.constant 0 : i32
    %c0_i32_1 = arith.constant 0 : i32
    return %c0_i32, %c0_i32_0 : i32, i32
  }
  func.func @transform_8(%arg0: i32) -> (i32, i32) {
    %c0_i32 = arith.constant 0 : i32
    %c0_i32_0 = arith.constant 0 : i32
    %c0_i32_1 = arith.constant 0 : i32
    return %c0_i32, %c0_i32_0 : i32, i32
  }
  func.func @transform_9(%arg0: i32) -> (i32, i32) {
    %c0_i32 = arith.constant 0 : i32
    %c0_i32_0 = arith.constant 0 : i32
    %c0_i32_1 = arith.constant 0 : i32
    return %c0_i32, %c0_i32_0 : i32, i32
  }
  func.func @transform_10(%arg0: i32) -> (i32, i32) {
    %c0_i32 = arith.constant 0 : i32
    %c0_i32_0 = arith.constant 0 : i32
    %c0_i32_1 = arith.constant 0 : i32
    return %c0_i32, %c0_i32_0 : i32, i32
  }
  func.func @transform_11(%arg0: i32) -> (i32, i32) {
    %c0_i32 = arith.constant 0 : i32
    %c0_i32_0 = arith.constant 0 : i32
    %c0_i32_1 = arith.constant 0 : i32
    return %c0_i32, %c0_i32_0 : i32, i32
  }
  func.func @transform_12(%arg0: i32) -> (i32, i32, i32) {
    %c0_i32 = arith.constant 0 : i32
    %c0_i32_0 = arith.constant 0 : i32
    %c0_i32_1 = arith.constant 0 : i32
    return %arg0, %c0_i32, %c0_i32_0 : i32, i32, i32
  }
}

</mosaic_0001>

<bundles_post_ra>
// kernel: _lambda_.1
= control target key start
LH: loop header
LB: loop body
LE: loop exit
PB: predicated region body
PF: predicated region fallthrough
CT: control target
= control target key end

     0   :  { %v6765_v1 = vmov 0   ;;  %v6767_v30 = vmov 0.0   ;;  %vm4749_vm0 = vmmov 0   ;;  %s6749_s2 = inlined_call_operand.vmem [shape: bf16[128,384], index: 2, kind: input, shape index: {}]   ;;  %s6750_s0 = inlined_call_operand.vmem [shape: bf16[1,128,128], index: 0, kind: input, shape index: {}]   ;;  %s6751_s3 = inlined_call_operand.vmem [shape: bf16[128,384], index: 3, kind: input, shape index: {}]   ;;  %s6752_s1 = inlined_call_operand.vmem [shape: f32[1,128,1], index: 1, kind: input, shape index: {}]   ;;  %s6753_s4 = inlined_call_operand.vmem [shape: f32[1,384], index: 4, kind: input, shape index: {}]   ;;  %s6754_s5 = inlined_call_operand.vmem [shape: f32[1,128], index: 5, kind: input, shape index: {}]   ;;  %s6755_s6 = inlined_call_operand.vmem [shape: bf16[128,384], index: 6, kind: input, shape index: {}]   ;;  %s6756_s7 = inlined_call_operand.vmem [shape: bf16[128,384], index: 7, kind: input, shape index: {}]   ;;  %s6757_s8 = inlined_call_operand.vmem [shape: f32[1,384], index: 8, kind: input, shape index: {}]   ;;  %s6758_s9 = inlined_call_operand.vmem [shape: f32[1,128], index: 9, kind: input, shape index: {}]   ;;  %s6759_s10 = inlined_call_operand.vmem [shape: bf16[128,128], index: 10, kind: input, shape index: {}]   ;;  %s6760_s11 = inlined_call_operand.vmem [shape: f32[1,128], index: 11, kind: input, shape index: {}]   ;;  %s6761_s12 = inlined_call_operand.vmem [shape: f32[1,16,128], index: 12, kind: output, shape index: {}]  }
   0x1   :  { %v4361_v0 = vld [vmem:[%s6749_s2 + $0x4] ss:$12 sps:$4 sm:$0xff]   ;;  %331 = vmatprep.mubr.bf16.mxu0 %v6765_v1  ;;  %4359 = vset.pattern.permute.xlu0 %v6765_v1  ;;  %v4363_v2 = vld [vmem:[%s6749_s2 + $0x8] ss:$12 sps:$4 sm:$0xff]   ;;  %v4364_v3 = vld [vmem:[%s6749_s2] ss:$12 sps:$4 sm:$0xff]  }
   0x2   :  { %4360 = vset.pattern.permute.xlu1 %v6765_v1  ;;  %299 = vmatprep.subr.bf16.mxu0 %v4361_v0  ;;  %v4365_v4 = vld [vmem:[%s6749_s2 + $0x1c] ss:$12 sps:$4 sm:$0xff]   ;;  %v4367_v5 = vld [vmem:[%s6749_s2 + $0x20] ss:$12 sps:$4 sm:$0xff]   ;;  %v4368_v6 = vld [vmem:[%s6749_s2 + $0x18] ss:$12 sps:$4 sm:$0xff]  }
   0x3   :  { %3952 = vmatprep.subr.bf16.mxu1 %v4363_v2  ;;  %300 = vmatpush1.bf16.msra.mxu0 %v4364_v3  ;;  %v4369_v7 = vld [vmem:[%s6749_s2 + $0x34] ss:$12 sps:$4 sm:$0xff]   ;;  %v4371_v8 = vld [vmem:[%s6749_s2 + $0x38] ss:$12 sps:$4 sm:$0xff]   ;;  %v4372_v9 = vld [vmem:[%s6749_s2 + $0x30] ss:$12 sps:$4 sm:$0xff]  }
   0x4   :  { %3953 = vmatpush3.bf16.msra.mxu1 %v4363_v2  ;;  %301 = vmatprep.subr.bf16.mxu0 %v4365_v4  ;;  %v4373_v10 = vld [vmem:[%s6749_s2 + $0x4c] ss:$12 sps:$4 sm:$0xff]   ;;  %v4375_v11 = vld [vmem:[%s6749_s2 + $0x50] ss:$12 sps:$4 sm:$0xff]   ;;  %v4376_v12 = vld [vmem:[%s6749_s2 + $0x48] ss:$12 sps:$4 sm:$0xff]  }
   0x5   :  { %3954 = vmatprep.subr.bf16.mxu1 %v4367_v5  ;;  %v4377_v13 = vld [vmem:[%s6749_s2 + $0x64] ss:$12 sps:$4 sm:$0xff]   ;;  %v4379_v14 = vld [vmem:[%s6749_s2 + $0x68] ss:$12 sps:$4 sm:$0xff]   ;;  %v4380_v15 = vld [vmem:[%s6749_s2 + $0x60] ss:$12 sps:$4 sm:$0xff]  }
   0x6   :  { %v4381_v16 = vld [vmem:[%s6749_s2 + $0x7c] ss:$12 sps:$4 sm:$0xff]   ;;  %v4383_v17 = vld [vmem:[%s6749_s2 + $0x80] ss:$12 sps:$4 sm:$0xff]   ;;  %v4384_v19 = vld [vmem:[%s6749_s2 + $0x78] ss:$12 sps:$4 sm:$0xff]  }
   0x7   :  { %302 = vmatpush1.bf16.msra.mxu0 %v4368_v6  ;;  %v4393_v18 = vld [vmem:[%s6750_s0] sm:$0xff]   ;;  %v4388_v22 = vld [vmem:[%s6749_s2 + $0x90] ss:$12 sps:$4 sm:$0xff]   ;;  %v4389_v23 = vld [vmem:[%s6749_s2 + $0xac] ss:$12 sps:$4 sm:$0xff]  }
   0x8   :  { %3955 = vmatpush3.bf16.msra.mxu1 %v4367_v5  ;;  %303 = vmatprep.subr.bf16.mxu0 %v4369_v7  ;;  %v4385_v20 = vld [vmem:[%s6749_s2 + $0x94] ss:$12 sps:$4 sm:$0xff]   ;;  %v4387_v21 = vld [vmem:[%s6749_s2 + $0x98] ss:$12 sps:$4 sm:$0xff]   ;;  %v4391_v24 = vld [vmem:[%s6749_s2 + $0xb0] ss:$12 sps:$4 sm:$0xff]  }
   0x9   :  { %3956 = vmatprep.subr.bf16.mxu1 %v4371_v8  ;;  %3968 = vmatprep.mubr.bf16.mxu1 %v4393_v18  ;;  %v4392_v25 = vld [vmem:[%s6749_s2 + $0xa8] ss:$12 sps:$4 sm:$0xff]   ;;  %v4896_v26 = vld [vmem:[%s6751_s3 + $0x4] ss:$12 sps:$4 sm:$0xff]   ;;  %v4904_v28 = vld [vmem:[%s6751_s3] ss:$12 sps:$4 sm:$0xff]  }
   0xa   :  { %v4394_v27 = vld [vmem:[%s6750_s0 + $0x8] sm:$0xff]   ;;  %v4402_v32 = vld [vmem:[%s6750_s0 + $0x10] sm:$0xff]   ;;  %v4924_v33 = vld [vmem:[%s6751_s3 + $0x18] ss:$12 sps:$4 sm:$0xff]  }
   0xb   :  { %304 = vmatpush1.bf16.msra.mxu0 %v4372_v9  ;;  %v4909_v29 = vld [vmem:[%s6751_s3 + $0x8] ss:$12 sps:$4 sm:$0xff]   ;;  %v4931_v34 = vld [vmem:[%s6751_s3 + $0x20] ss:$12 sps:$4 sm:$0xff]   ;;  %v4403_v36 = vld [vmem:[%s6750_s0 + $0x18] sm:$0xff]  }
   0xc   :  { %3957 = vmatpush3.bf16.msra.mxu1 %v4371_v8  ;;  %305 = vmatprep.subr.bf16.mxu0 %v4373_v10  ;;  %v4916_v31 = vld [vmem:[%s6751_s3 + $0x1c] ss:$12 sps:$4 sm:$0xff]   ;;  %v4938_v35 = vld [vmem:[%s6751_s3 + $0x34] ss:$12 sps:$4 sm:$0xff]   ;;  %v4954_v38 = vld [vmem:[%s6751_s3 + $0x4c] ss:$12 sps:$4 sm:$0xff]  }
   0xd   :  { %3958 = vmatprep.subr.bf16.mxu1 %v4375_v11  ;;  %v4947_v37 = vld [vmem:[%s6751_s3 + $0x30] ss:$12 sps:$4 sm:$0xff]   ;;  %v4960_v39 = vld [vmem:[%s6750_s0 + $0x20] sm:$0xff]   ;;  %v4972_v41 = vld [vmem:[%s6751_s3 + $0x48] ss:$12 sps:$4 sm:$0xff]  }
   0xe   :  { %v4966_v40 = vld [vmem:[%s6751_s3 + $0x38] ss:$12 sps:$4 sm:$0xff]   ;;  %v4989_v44 = vld [vmem:[%s6751_s3 + $0x50] ss:$12 sps:$4 sm:$0xff]   ;;  %v4997_v46 = vld [vmem:[%s6750_s0 + $0x28] sm:$0xff]  }
   0xf   :  { %306 = vmatpush1.bf16.msra.mxu0 %v4376_v12  ;;  %v4980_v42 = vld [vmem:[%s6751_s3 + $0x64] ss:$12 sps:$4 sm:$0xff]   ;;  %v43_v47 = vld [vmem:[%s6752_s1 + $0x8] sm:$0xff]  ;;  %v45_v52 = vld [vmem:[%s6752_s1 + $0x18] sm:$0xff] }
  0x10   :  { %3959 = vmatpush3.bf16.msra.mxu1 %v4375_v11  ;;  %307 = vmatprep.subr.bf16.mxu0 %v4377_v13  ;;  %v42_v43 = vld [vmem:[%s6752_s1] sm:$0xff]  ;;  %v44_v45 = vld [vmem:[%s6752_s1 + $0x10] sm:$0xff]  ;;  %v5013_v49 = vld [vmem:[%s6751_s3 + $0x7c] ss:$12 sps:$4 sm:$0xff]   ;;  %v108_v11 = vlaneseq }
  0x11   :  { %3960 = vmatprep.subr.bf16.mxu1 %v4379_v14  ;;  %527 = vperm.xlu0 %4359, %v42_v43   ;;  %v5007_v48 = vld [vmem:[%s6751_s3 + $0x60] ss:$12 sps:$4 sm:$0xff]   ;;  %v5018_v50 = vld [vmem:[%s6750_s0 + $0x30] sm:$0xff]   ;;  %v5034_v53 = vld [vmem:[%s6751_s3 + $0x78] ss:$12 sps:$4 sm:$0xff]  }
  0x12   :  { %537 = vperm.xlu1 %4360, %v44_v45   ;;  %v5025_v51 = vld [vmem:[%s6751_s3 + $0x68] ss:$12 sps:$4 sm:$0xff]   ;;  %v46_v54 = vld [vmem:[%s6752_s1 + $0x20] sm:$0xff]  ;;  %v5051_v56 = vld [vmem:[%s6750_s0 + $0x38] sm:$0xff]   ;;  %v5179_v12 = vshrl.u32 %v108_v11, 7 }
  0x13   :  { %308 = vmatpush1.bf16.msra.mxu0 %v4380_v15  ;;  %v5045_v55 = vld [vmem:[%s6751_s3 + $0x94] ss:$12 sps:$4 sm:$0xff]   ;;  %v47_v57 = vld [vmem:[%s6752_s1 + $0x28] sm:$0xff]  ;;  %v5061_v58 = vld [vmem:[%s6751_s3 + $0x90] ss:$12 sps:$4 sm:$0xff]  }
  0x14   :  { %3961 = vmatpush3.bf16.msra.mxu1 %v4379_v14  ;;  %309 = vmatprep.subr.bf16.mxu0 %v4381_v16  ;;  %v5068_v59 = vld [vmem:[%s6751_s3 + $0xac] ss:$12 sps:$4 sm:$0xff]   ;;  %v48_v61 = vld [vmem:[%s6752_s1 + $0x30] sm:$0xff]  ;;  %v50_v2 = vld [vmem:[%s6752_s1 + $0x40] sm:$0xff]  ;;  %6801 = vst [vmem:[#allocation4_spill] sm:$0xff] %v5179_v12  ;;  %v6762_v14 = vsub.s32 2, %v5179_v12 }
  0x15   :  { %3962 = vmatprep.subr.bf16.mxu1 %v4383_v17  ;;  %532 = vperm.xlu0 %4359, %v43_v47   ;;  %v5073_v60 = vld [vmem:[%s6751_s3 + $0x80] ss:$12 sps:$4 sm:$0xff]   ;;  %v5083_v62 = vld [vmem:[%s6751_s3 + $0xa8] ss:$12 sps:$4 sm:$0xff]   ;;  %v49_v63 = vld [vmem:[%s6752_s1 + $0x38] sm:$0xff]  ;;  %v6763_v15 = vsub.s32 1, %v5179_v12 }
  0x16   :  { %542 = vperm.xlu1 %4360, %v45_v52   ;;  %v5095_v0 = vld [vmem:[%s6751_s3 + $0x98] ss:$12 sps:$4 sm:$0xff]   ;;  %v5107_v3 = vld [vmem:[%s6751_s3 + $0xb0] ss:$12 sps:$4 sm:$0xff]   ;;  %v51_v4 = vld [vmem:[%s6752_s1 + $0x48] sm:$0xff] }
  0x17   :  { %310 = vmatpush1.bf16.msra.mxu0 %v4384_v19  ;;  %v52_v5 = vld [vmem:[%s6752_s1 + $0x50] sm:$0xff]  ;;  %v53_v6 = vld [vmem:[%s6752_s1 + $0x58] sm:$0xff]  ;;  %v54_v7 = vld [vmem:[%s6752_s1 + $0x60] sm:$0xff] }
  0x18   :  { %3963 = vmatpush3.bf16.msra.mxu1 %v4383_v17  ;;  %311 = vmatprep.subr.bf16.mxu0 %v4385_v20  ;;  %v55_v8 = vld [vmem:[%s6752_s1 + $0x68] sm:$0xff]  ;;  %v56_v9 = vld [vmem:[%s6752_s1 + $0x70] sm:$0xff]  ;;  %v57_v10 = vld [vmem:[%s6752_s1 + $0x78] sm:$0xff]  ;;  %v6764_v17 = vsub.s32 0, %v5179_v12 }
  0x19   :  { %3964 = vmatprep.subr.bf16.mxu1 %v4387_v21  ;;  %547 = vperm.xlu0 %4359, %v46_v54   ;;  %v106_v16 = vld [vmem:[%s6753_s4] sm:$0x7] }
  0x1a   :  { %552 = vperm.xlu1 %4360, %v47_v57   ;;  %v5195_v19 = vrot.slane %v106_v16, %v6763_v15  ;;  %v5199_v20 = vrot.slane %v106_v16, %v6764_v17 }
  0x1b   :  { %312 = vmatpush1.bf16.msra.mxu0 %v4388_v22 }
  0x1c   :  { %3965 = vmatpush3.bf16.msra.mxu1 %v4387_v21  ;;  %313 = vmatprep.subr.bf16.mxu0 %v4389_v23 }
  0x1d   :  { %3966 = vmatprep.subr.bf16.mxu1 %v4391_v24  ;;  %557 = vperm.xlu0 %4359, %v48_v61  }
  0x1e   :  { %562 = vperm.xlu1 %4360, %v49_v63  }
  0x1f   :  { %314 = vmatpush1.bf16.msra.mxu0 %v4392_v25 }
  0x20   :  { %3967 = vmatpush3.bf16.msra.mxu1 %v4391_v24  ;;  %3984 = vmatprep.subr.bf16.mxu0 %v6767_v30 }
  0x21   :  { %829 = vmatprep.subr.bf16.mxu1 %v4896_v26  ;;  %567 = vperm.xlu0 %4359, %v50_v2  }
  0x22   :  { %332 = vmatmul.mubr.bf16.vlgmr.msra.gmra.mrb[0].mxu0 %v4393_v18  ;;  %572 = vperm.xlu1 %4360, %v51_v4   ;;  %v5191_v18 = vrot.slane %v106_v16, %v6762_v14 }
  0x23   :  { %3969 = vmatmul.mubr.bf16.vlgmr.msra.gmra.mrb[0].mxu1 %v4394_v27  ;;  %3985 = vmatpush3.bf16.msra.mxu0 %v4909_v29 }
  0x24   :  { %830 = vmatpush1.bf16.msra.mxu1 %v4904_v28  ;;  %341 = vmatprep.mubr.bf16.mxu0 %v6765_v1 }
  0x25   :  { %831 = vmatprep.subr.bf16.mxu1 %v4916_v31  ;;  %3972 = vmatprep.mubr.bf16.mxu1 %v4402_v32 }
  0x26   :  { %3986 = vmatprep.subr.bf16.mxu0 %v6767_v30  ;;  %577 = vperm.xlu0 %4359, %v52_v5  }
  0x27   :  { %3987 = vmatpush3.bf16.msra.mxu0 %v4931_v34  ;;  %582 = vperm.xlu1 %4360, %v53_v6  }
  0x28   :  { %832 = vmatpush1.bf16.msra.mxu1 %v4924_v33  ;;  %3988 = vmatprep.subr.bf16.mxu0 %v6767_v30 }
  0x29   :  { %833 = vmatprep.subr.bf16.mxu1 %v4938_v35 }
  0x2a   :  { %342 = vmatmul.mubr.bf16.gmra.mrb[4].mxu0 %v4394_v27  ;;  %587 = vperm.xlu0 %4359, %v54_v7  }
  0x2b   :  { %3973 = vmatmul.mubr.bf16.gmra.mrb[4].mxu1 %v4403_v36  ;;  %351 = vmatprep.mubr.bf16.mxu0 %v6765_v1 }
  0x2c   :  { %834 = vmatpush1.bf16.msra.mxu1 %v4947_v37  ;;  %3976 = vmatprep.mubr.bf16.mxu1 %v4960_v39 }
  0x2d   :  { %835 = vmatprep.subr.bf16.mxu1 %v4954_v38  ;;  %3989 = vmatpush3.bf16.msra.mxu0 %v4966_v40 }
  0x2e   :  { %3990 = vmatprep.subr.bf16.mxu0 %v6767_v30  ;;  %592 = vperm.xlu1 %4360, %v55_v8  }
  0x2f   :  { %597 = vperm.xlu0 %4359, %v56_v9  }
  0x30   :  { %836 = vmatpush1.bf16.msra.mxu1 %v4972_v41 }
  0x31   :  { %837 = vmatprep.subr.bf16.mxu1 %v4980_v42  ;;  %3991 = vmatpush3.bf16.msra.mxu0 %v4989_v44 }
  0x32   :  { %352 = vmatmul.mubr.bf16.gmra.mrb[8].mxu0 %v4402_v32  ;;  %3992 = vmatprep.subr.bf16.mxu0 %v6767_v30 }
  0x33   :  { %3977 = vmatmul.mubr.bf16.gmra.mrb[8].mxu1 %v4997_v46  ;;  %361 = vmatprep.mubr.bf16.mxu0 %v6765_v1 }
  0x34   :  { %838 = vmatpush1.bf16.msra.mxu1 %v5007_v48  ;;  %3980 = vmatprep.mubr.bf16.mxu1 %v5018_v50 }
  0x35   :  { %839 = vmatprep.subr.bf16.mxu1 %v5013_v49  ;;  %3993 = vmatpush3.bf16.msra.mxu0 %v5025_v51 }
  0x36   :  { %3994 = vmatprep.subr.bf16.mxu0 %v6767_v30  ;;  %602 = vperm.xlu1 %4360, %v57_v10  }
  0x38   :  { %840 = vmatpush1.bf16.msra.mxu1 %v5034_v53 }
  0x39   :  { %841 = vmatprep.subr.bf16.mxu1 %v5045_v55  ;;  %3995 = vmatpush3.bf16.msra.mxu0 %v5073_v60 }
  0x3a   :  { %362 = vmatmul.mubr.bf16.gmra.mrb[12].mxu0 %v4403_v36  ;;  %3996 = vmatprep.subr.bf16.mxu0 %v6767_v30 }
  0x3b   :  { %3981 = vmatmul.mubr.bf16.gmra.mrb[12].mxu1 %v5051_v56  ;;  %371 = vmatprep.mubr.bf16.mxu0 %v6765_v1 }
  0x3c   :  { %842 = vmatpush1.bf16.msra.mxu1 %v5061_v58  ;;  %861 = vmatprep.mubr.bf16.mxu1 %v6765_v1 }
  0x3d   :  { %843 = vmatprep.subr.bf16.mxu1 %v5068_v59  ;;  %3997 = vmatpush3.bf16.msra.mxu0 %v5095_v0 }
  0x3e   :  { %3998 = vmatprep.subr.bf16.mxu0 %v6767_v30 }
  0x40   :  { %844 = vmatpush1.bf16.msra.mxu1 %v5083_v62 }
  0x41   :  { %960 = vmatprep.subr.bf16.mxu1 %v4896_v26  ;;  %3999 = vmatpush3.bf16.msra.mxu0 %v5107_v3 }
  0x42   :  { %372 = vmatmul.mubr.bf16.gmra.mrb[16].mxu0 %v4960_v39  ;;  %4004 = vmatprep.subr.bf16.mxu0 %v6767_v30 }
  0x43   :  { %862 = vmatmul.mubr.bf16.vlgmr.msra.gmra.mrb[16].mxu1 %v6765_v1  ;;  %381 = vmatprep.mubr.bf16.mxu0 %v6765_v1 }
  0x44   :  { %961 = vmatpush1.bf16.msra.mxu1 %v4904_v28  ;;  %992 = vmatprep.mubr.bf16.mxu1 %v6765_v1 }
  0x45   :  { %962 = vmatprep.subr.bf16.mxu1 %v4916_v31 }
  0x48   :  { %963 = vmatpush1.bf16.msra.mxu1 %v4924_v33 }
  0x49   :  { %964 = vmatprep.subr.bf16.mxu1 %v4938_v35 }
  0x4a   :  { %382 = vmatmul.mubr.bf16.gmra.mrb[20].mxu0 %v4997_v46 }
  0x4b   :  { %391 = vmatprep.mubr.bf16.mxu0 %v6765_v1 }
  0x4c   :  { %965 = vmatpush1.bf16.msra.mxu1 %v4947_v37 }
  0x4d   :  { %966 = vmatprep.subr.bf16.mxu1 %v4954_v38 }
  0x50   :  { %967 = vmatpush1.bf16.msra.mxu1 %v4972_v41 }
  0x51   :  { %968 = vmatprep.subr.bf16.mxu1 %v4980_v42 }
  0x52   :  { %392 = vmatmul.mubr.bf16.gmra.mrb[24].mxu0 %v5018_v50 }
  0x53   :  { %401 = vmatprep.mubr.bf16.mxu0 %v6765_v1 }
  0x54   :  { %969 = vmatpush1.bf16.msra.mxu1 %v5007_v48 }
  0x55   :  { %970 = vmatprep.subr.bf16.mxu1 %v5013_v49 }
  0x58   :  { %971 = vmatpush1.bf16.msra.mxu1 %v5034_v53 }
  0x59   :  { %972 = vmatprep.subr.bf16.mxu1 %v5045_v55 }
  0x5a   :  { %402 = vmatmul.mubr.bf16.gmra.mrb[28].mxu0 %v5051_v56 }
  0x5b   :  { %4000 = vmatprep.mubr.msk.bf16.mxu0 %vm4749_vm0, %v6767_v30 }
  0x5c   :  { %973 = vmatpush1.bf16.msra.mxu1 %v5061_v58 }
  0x5d   :  { %974 = vmatprep.subr.bf16.mxu1 %v5068_v59 }
  0x60   :  { %975 = vmatpush1.bf16.msra.mxu1 %v5083_v62 }
  0x61   :  { %1091 = vmatprep.subr.bf16.mxu1 %v4896_v26 }
  0x62   :  { %4001 = vmatmul.mubr.bf16.vlgmr.msra.gmra.mrb[32].mxu0 %v6765_v1 }
  0x63   :  { %4005 = vmatpush3.bf16.msra.mxu0 %v4909_v29  ;;  %4020 = vmatprep.mubr.msk.bf16.mxu0 %vm4749_vm0, %v6767_v30 }
  0x64   :  { %4006 = vmatprep.subr.bf16.mxu0 %v6767_v30 }
  0x67   :  { %4007 = vmatpush3.bf16.msra.mxu0 %v4931_v34 }
  0x68   :  { %4008 = vmatprep.subr.bf16.mxu0 %v6767_v30 }
  0x6b   :  { %4009 = vmatpush3.bf16.msra.mxu0 %v4966_v40 }
  0x6c   :  { %4010 = vmatprep.subr.bf16.mxu0 %v6767_v30 }
  0x6f   :  { %4011 = vmatpush3.bf16.msra.mxu0 %v4989_v44 }
  0x70   :  { %4012 = vmatprep.subr.bf16.mxu0 %v6767_v30 }
  0x73   :  { %4013 = vmatpush3.bf16.msra.mxu0 %v5025_v51 }
  0x74   :  { %4014 = vmatprep.subr.bf16.mxu0 %v6767_v30 }
  0x77   :  { %4015 = vmatpush3.bf16.msra.mxu0 %v5073_v60 }
  0x78   :  { %4016 = vmatprep.subr.bf16.mxu0 %v6767_v30 }
  0x7b   :  { %4017 = vmatpush3.bf16.msra.mxu0 %v5095_v0 }
  0x7c   :  { %4018 = vmatprep.subr.bf16.mxu0 %v6767_v30 }
  0x7f   :  { %4019 = vmatpush3.bf16.msra.mxu0 %v5107_v3 }
  0x80   :  { %4024 = vmatprep.subr.bf16.mxu0 %v6767_v30 }
  0x90   :  { %v5181_v13 = vpop.permute.xlu0 %527 }
  0x91   :  { %6802 = vst [vmem:[#allocation5_spill] sm:$0xff] %v5181_v13  ;;  %v5203_v22 = vpop.permute.xlu1 %537 }
  0x92   :  { %6804 = vst [vmem:[#allocation7_spill] sm:$0xff] %v5203_v22 }
  0x94   :  { %v5201_v21 = vpop.permute.xlu0 %532 }
  0x95   :  { %6803 = vst [vmem:[#allocation6_spill] sm:$0xff] %v5201_v21  ;;  %v5221_v6 = vpop.permute.xlu1 %542 }
  0x96   :  { %6805 = vst [vmem:[#allocation8_spill] sm:$0xff] %v5221_v6 }
  0xf5   :  { %v333_v23 = vpop.f32.mrb[0].mxu0 }
  0xf6   :  { %v3970_v24 = vpop.f32.mrb[0].mxu1  ;;  %v335_v25 = vpop.f32.mrb[1].mxu0  ;;  %v334_v46 = vadd.f32 %v333_v23, %v5199_v20 }
  0xf7   :  { %v455_v27 = vadd.f32 %v3970_v24, %v5191_v18  ;;  %v446_v32 = vpop.f32.mrb[1].mxu1  ;;  %v336_v36 = vadd.f32 %v335_v25, %v5195_v19  ;;  %v337_v39 = vpop.f32.mrb[2].mxu0 }
  0xf8   :  { %v447_v43 = vadd.f32 %v446_v32, %v5191_v18  ;;  %v3971_v45 = vpop.f32.mrb[2].mxu1  ;;  %v338_v47 = vadd.f32 %v337_v39, %v5199_v20  ;;  %v339_v50 = vpop.f32.mrb[3].mxu0 }
  0xf9   :  { %v458_v52 = vadd.f32 %v3971_v45, %v5191_v18  ;;  %v449_v54 = vpop.f32.mrb[3].mxu1  ;;  %v340_v56 = vadd.f32 %v339_v50, %v5195_v19  ;;  %v605_v2 = vadd.f32 %v5181_v13, %v336_v36 }
  0xfa   :  { %v450_v57 = vadd.f32 %v449_v54, %v5191_v18  ;;  %v5213_v61 = vpack.c.bf16 %v338_v47, %v334_v46 }
  0xfb   :  { %v5215_v63 = vpack.c.bf16 %v458_v52, %v455_v27  ;;  %v606_v4 = vadd.f32 %v5201_v21, %v340_v56 }
  0xfc   :  { %v5219_v5 = vpack.c.bf16 %v450_v57, %v447_v43 }
  0xfd   :  { %v5223_v7 = vpack.c.bf16 %v606_v4, %v605_v2  ;;  %v343_v8 = vpop.f32.mrb[4].mxu0  ;;  %v5241_v2 = vpop.permute.xlu0 %547 }
  0xfe   :  { %v3974_v9 = vpop.f32.mrb[4].mxu1  ;;  %v344_v10 = vadd.f32 %v343_v8, %v5199_v20  ;;  %v345_v11 = vpop.f32.mrb[5].mxu0  ;;  %6806 = vst [vmem:[#allocation9_spill] sm:$0xff] %v5241_v2 }
  0xff   :  { %v471_v16 = vadd.f32 %v3974_v9, %v5191_v18  ;;  %v462_v23 = vpop.f32.mrb[5].mxu1  ;;  %v346_v24 = vadd.f32 %v345_v11, %v5195_v19  ;;  %v347_v25 = vpop.f32.mrb[6].mxu0 }
 0x100   :  { %v463_v27 = vadd.f32 %v462_v23, %v5191_v18  ;;  %v3975_v32 = vpop.f32.mrb[6].mxu1  ;;  %v348_v36 = vadd.f32 %v347_v25, %v5199_v20  ;;  %v349_v39 = vpop.f32.mrb[7].mxu0 }
 0x101   :  { %v474_v43 = vadd.f32 %v3975_v32, %v5191_v18  ;;  %v465_v45 = vpop.f32.mrb[7].mxu1  ;;  %v350_v46 = vadd.f32 %v349_v39, %v5195_v19  ;;  %v607_v54 = vadd.f32 %v5203_v22, %v346_v24  ;;  %v5243_v4 = vpop.permute.xlu1 %552 }
 0x102   :  { %v466_v47 = vadd.f32 %v465_v45, %v5191_v18  ;;  %v5233_v50 = vpack.c.bf16 %v348_v36, %v344_v10  ;;  %6807 = vst [vmem:[#allocation10_spill] sm:$0xff] %v5243_v4  ;;  %v5263_v14 = vpop.permute.xlu0 %557 }
 0x103   :  { %v5235_v52 = vpack.c.bf16 %v474_v43, %v471_v16  ;;  %v608_v56 = vadd.f32 %v5221_v6, %v350_v46  ;;  %6808 = vst [vmem:[#allocation11_spill] sm:$0xff] %v5263_v14 }
 0x104   :  { %v5239_v57 = vpack.c.bf16 %v466_v47, %v463_v27 }
 0x105   :  { %v5245_v8 = vpack.c.bf16 %v608_v56, %v607_v54  ;;  %v353_v9 = vpop.f32.mrb[8].mxu0 }
 0x106   :  { %v3978_v11 = vpop.f32.mrb[8].mxu1  ;;  %v354_v23 = vadd.f32 %v353_v9, %v5199_v20  ;;  %v355_v10 = vpop.f32.mrb[9].mxu0 }
 0x107   :  { %v487_v16 = vadd.f32 %v3978_v11, %v5191_v18  ;;  %v478_v25 = vpop.f32.mrb[9].mxu1  ;;  %v356_v24 = vadd.f32 %v355_v10, %v5195_v19  ;;  %v357_v32 = vpop.f32.mrb[10].mxu0 }
 0x108   :  { %v479_v27 = vadd.f32 %v478_v25, %v5191_v18  ;;  %v3979_v36 = vpop.f32.mrb[10].mxu1  ;;  %v358_v39 = vadd.f32 %v357_v32, %v5199_v20  ;;  %v359_v43 = vpop.f32.mrb[11].mxu0 }
 0x109   :  { %v490_v45 = vadd.f32 %v3979_v36, %v5191_v18  ;;  %v481_v46 = vpop.f32.mrb[11].mxu1  ;;  %v360_v47 = vadd.f32 %v359_v43, %v5195_v19  ;;  %v609_v11 = vadd.f32 %v5241_v2, %v356_v24  ;;  %v5265_v32 = vpop.permute.xlu1 %562 }
 0x10a   :  { %v482_v54 = vadd.f32 %v481_v46, %v5191_v18  ;;  %v5255_v56 = vpack.c.bf16 %v358_v39, %v354_v23  ;;  %6809 = vst [vmem:[#allocation12_spill] sm:$0xff] %v5265_v32  ;;  %v5286_v2 = vpop.permute.xlu0 %567 }
 0x10b   :  { %v5257_v9 = vpack.c.bf16 %v490_v45, %v487_v16  ;;  %v610_v10 = vadd.f32 %v5243_v4, %v360_v47  ;;  %6812 = vst [vmem:[#allocation15_spill] sm:$0xff] %v5286_v2 }
 0x10c   :  { %v5261_v25 = vpack.c.bf16 %v482_v54, %v479_v27 }
 0x10d   :  { %v5267_v36 = vpack.c.bf16 %v610_v10, %v609_v11  ;;  %v363_v15 = vpop.f32.mrb[12].mxu0 }
 0x10e   :  { %v3982_v43 = vpop.f32.mrb[12].mxu1  ;;  %v364_v46 = vadd.f32 %v363_v15, %v5199_v20  ;;  %v365_v23 = vpop.f32.mrb[13].mxu0 }
 0x10f   :  { %v503_v16 = vadd.f32 %v3982_v43, %v5191_v18  ;;  %v494_v39 = vpop.f32.mrb[13].mxu1  ;;  %v366_v24 = vadd.f32 %v365_v23, %v5195_v19  ;;  %v367_v45 = vpop.f32.mrb[14].mxu0 }
 0x110   :  { %v495_v27 = vadd.f32 %v494_v39, %v5191_v18  ;;  %v3983_v47 = vpop.f32.mrb[14].mxu1  ;;  %v368_v54 = vadd.f32 %v367_v45, %v5199_v20  ;;  %v369_v17 = vpop.f32.mrb[15].mxu0  ;;  %v695_v45 = vunpack.c.l.bf16 %v5213_v61 }
 0x111   :  { %v506_v11 = vadd.f32 %v3983_v47, %v5191_v18  ;;  %v497_v10 = vpop.f32.mrb[15].mxu1  ;;  %v370_v1 = vadd.f32 %v369_v17, %v5195_v19  ;;  %v611_v23 = vadd.f32 %v5263_v14, %v366_v24  ;;  %v5288_v47 = vpop.permute.xlu1 %572  ;;  %v699_v14 = vunpack.c.h.bf16 %v5223_v7 }
 0x112   :  { %v498_v15 = vadd.f32 %v497_v10, %v5191_v18  ;;  %v5277_v30 = vpack.c.bf16 %v368_v54, %v364_v46  ;;  %6813 = vst [vmem:[#allocation16_spill] sm:$0xff] %v5288_v47  ;;  %v696_v46 = vunpack.c.l.bf16 %v5223_v7 }
 0x113   :  { %v5279_v43 = vpack.c.bf16 %v506_v11, %v503_v16  ;;  %v612_v4 = vadd.f32 %v5265_v32, %v370_v1  ;;  %v698_v1 = vunpack.c.h.bf16 %v5213_v61 }
 0x114   :  { %v5283_v39 = vpack.c.bf16 %v498_v15, %v495_v27 }
 0x115   :  { %6810 = vst [vmem:[#allocation13_spill] sm:$0xff] %v5279_v43  ;;  %v5290_v6 = vpack.c.bf16 %v612_v4, %v611_v23  ;;  %v373_v17 = vpop.f32.mrb[16].mxu0 }
 0x116   :  { %6811 = vst [vmem:[#allocation14_spill] sm:$0xff] %v5283_v39  ;;  %v863_v18 = vpop.f32.mrb[16].mxu1  ;;  %v374_v16 = vadd.f32 %v373_v17, %v5199_v20  ;;  %v375_v24 = vpop.f32.mrb[17].mxu0 }
 0x117   :  { %v913_v54 = vadd.f32 %v863_v18, %v695_v45  ;;  %v865_v11 = vpop.f32.mrb[17].mxu1  ;;  %v376_v27 = vadd.f32 %v375_v24, %v5195_v19  ;;  %v377_v15 = vpop.f32.mrb[18].mxu0 }
 0x118   :  { %v923_v10 = vadd.f32 %v865_v11, %v696_v46  ;;  %v867_v32 = vpop.f32.mrb[18].mxu1  ;;  %v378_v4 = vadd.f32 %v377_v15, %v5199_v20  ;;  %v379_v22 = vpop.f32.mrb[19].mxu0 }
 0x119   :  { %v914_v23 = vadd.f32 %v867_v32, %v698_v1  ;;  %v869_v21 = vpop.f32.mrb[19].mxu1  ;;  %v380_v13 = vadd.f32 %v379_v22, %v5195_v19  ;;  %v613_v18 = vadd.f32 %v5286_v2, %v376_v27  ;;  %v5307_v1 = vpop.permute.xlu0 %577 }
 0x11a   :  { %v924_v17 = vadd.f32 %v869_v21, %v699_v14  ;;  %v5299_v45 = vpack.c.bf16 %v378_v4, %v374_v16  ;;  %6814 = vst [vmem:[#allocation17_spill] sm:$0xff] %v5307_v1  ;;  %v5310_v21 = vpop.permute.xlu1 %582  ;;  %v915_v16 = vmul.f32 0.5, %v913_v54 }
 0x11b   :  { %v614_v61 = vadd.f32 %v5288_v47, %v380_v13  ;;  %6815 = vst [vmem:[#allocation18_spill] sm:$0xff] %v5310_v21  ;;  %v916_v4 = vmul.f32 0.5, %v914_v23 }
 0x11c   :  { %4505 = vtanh.f32 %v915_v16 }
 0x11d   :  { %v5303_v24 = vpack.c.bf16 %v614_v61, %v613_v18  ;;  %v383_v46 = vpop.f32.mrb[20].mxu0  ;;  %4507 = vtanh.f32 %v916_v4 }
 0x11e   :  { %v384_v11 = vadd.f32 %v383_v46, %v5199_v20  ;;  %v385_v7 = vpop.f32.mrb[21].mxu0 }
 0x11f   :  { %v386_v15 = vadd.f32 %v385_v7, %v5195_v19  ;;  %v387_v32 = vpop.f32.mrb[22].mxu0 }
 0x120   :  { %v388_v22 = vadd.f32 %v387_v32, %v5199_v20  ;;  %v389_v14 = vpop.f32.mrb[23].mxu0 }
 0x121   :  { %v390_v27 = vadd.f32 %v389_v14, %v5195_v19  ;;  %v615_v18 = vadd.f32 %v5307_v1, %v386_v15  ;;  %v5325_v15 = vpop.permute.xlu0 %587 }
 0x122   :  { %v5313_v13 = vpack.c.bf16 %v388_v22, %v384_v11  ;;  %v5322_v22 = vpop.permute.xlu1 %592  ;;  %6817 = vst [vmem:[#allocation20_spill] sm:$0xff] %v5325_v15 }
 0x123   :  { %v616_v61 = vadd.f32 %v5310_v21, %v390_v27  ;;  %6816 = vst [vmem:[#allocation19_spill] sm:$0xff] %v5322_v22 }
 0x125   :  { %v5317_v46 = vpack.c.bf16 %v616_v61, %v615_v18  ;;  %v393_v7 = vpop.f32.mrb[24].mxu0  ;;  %v925_v61 = vmul.f32 0.5, %v923_v10 }
 0x126   :  { %v394_v47 = vadd.f32 %v393_v7, %v5199_v20  ;;  %v395_v32 = vpop.f32.mrb[25].mxu0  ;;  %v4506_v1 = vpop.eup %4505 }
 0x127   :  { %v396_v2 = vadd.f32 %v395_v32, %v5195_v19  ;;  %v397_v54 = vpop.f32.mrb[26].mxu0  ;;  %v926_v32 = vmul.f32 0.5, %v924_v17  ;;  %4509 = vtanh.f32 %v925_v61  ;;  %v5336_v43 = vpop.permute.xlu1 %602 }
 0x128   :  { %v398_v14 = vadd.f32 %v397_v54, %v5199_v20  ;;  %v399_v11 = vpop.f32.mrb[27].mxu0  ;;  %6820 = vst [vmem:[#allocation23_spill] sm:$0xff] %v5336_v43 }
 0x129   :  { %v400_v23 = vadd.f32 %v399_v11, %v5195_v19  ;;  %v617_v27 = vadd.f32 %v5325_v15, %v396_v2  ;;  %v4508_v2 = vpop.eup %4507  ;;  %4511 = vtanh.f32 %v926_v32 }
 0x12a   :  { %v5327_v16 = vpack.c.bf16 %v398_v14, %v394_v47  ;;  %v920_v61 = vmul.f32 0.5, %v4508_v2 }
 0x12b   :  { %v618_v18 = vadd.f32 %v5322_v22, %v400_v23  ;;  %v919_v23 = vmul.f32 0.5, %v4506_v1  ;;  %v700_v22 = vunpack.c.h.bf16 %v5219_v5 }
 0x12c   :  { %6818 = vst [vmem:[#allocation21_spill] sm:$0xff] %v5327_v16 }
 0x12d   :  { %v5331_v4 = vpack.c.bf16 %v618_v18, %v617_v27  ;;  %v403_v7 = vpop.f32.mrb[28].mxu0  ;;  %v5339_v27 = vpop.permute.xlu0 %597 }
 0x12e   :  { %v404_v54 = vadd.f32 %v403_v7, %v5199_v20  ;;  %v405_v21 = vpop.f32.mrb[29].mxu0  ;;  %6821 = vst [vmem:[#allocation24_spill] sm:$0xff] %v5339_v27 }
 0x12f   :  { %6819 = vst [vmem:[#allocation22_spill] sm:$0xff] %v5331_v4  ;;  %v406_v12 = vadd.f32 %v405_v21, %v5195_v19  ;;  %v407_v11 = vpop.f32.mrb[30].mxu0 }
 0x130   :  { %v408_v47 = vadd.f32 %v407_v11, %v5199_v20  ;;  %v409_v14 = vpop.f32.mrb[31].mxu0  ;;  %v5348_v20 = vld [vmem:[%s6754_s5] ss:$0 sm:$0xff] }
 0x131   :  { %v410_v10 = vadd.f32 %v409_v14, %v5195_v19  ;;  %v619_v18 = vadd.f32 %v5339_v27, %v406_v12  ;;  %v921_v19 = vadd.f32 0.5, %v919_v23  ;;  %v922_v12 = vadd.f32 0.5, %v920_v61  ;;  %v4510_v27 = vpop.eup %4509 }
 0x132   :  { %v5341_v17 = vpack.c.bf16 %v408_v47, %v404_v54  ;;  %v697_v54 = vunpack.c.l.bf16 %v5219_v5  ;;  %v929_v23 = vmul.f32 0.5, %v4510_v27 }
 0x133   :  { %v620_v21 = vadd.f32 %v5336_v43, %v410_v10 }
 0x134   :  { %6822 = vst [vmem:[#allocation25_spill] sm:$0xff] %v5341_v17 }
 0x135   :  { %v5350_v7 = vpack.c.bf16 %v620_v21, %v619_v18  ;;  %v906_v11 = vpop.f32.mrb[32].mxu0  ;;  %v4512_v18 = vpop.eup %4511 }
 0x136   :  { %v933_v1 = vadd.f32 %v5348_v20, %v906_v11  ;;  %v4002_v32 = vpop.f32.mrb[33].mxu0  ;;  %v930_v11 = vmul.f32 0.5, %v4512_v18 }
 0x137   :  { %6823 = vst [vmem:[#allocation26_spill] sm:$0xff] %v5350_v7  ;;  %v909_v14 = vpop.f32.mrb[34].mxu0  ;;  %v931_v32 = vadd.f32 0.5, %v929_v23  ;;  %v958_v23 = vunpack.c.h.bf16 %v5245_v8 }
 0x138   :  { %v935_v47 = vmul.f32 %v933_v1, %v921_v19  ;;  %v934_v10 = vadd.f32 %v5348_v20, %v909_v14  ;;  %v4003_v43 = vpop.f32.mrb[35].mxu0  ;;  %v932_v7 = vadd.f32 0.5, %v930_v11 }
 0x139   :  { %v941_v17 = vsub.f32 1.0, %v931_v32  ;;  %v945_v19 = vmul.f32 0.0, %v931_v32 }
 0x13a   :  { %v937_v15 = vadd.f32 %v935_v47, %v697_v54  ;;  %v936_v2 = vmul.f32 %v934_v10, %v922_v12  ;;  %v942_v61 = vsub.f32 1.0, %v932_v7  ;;  %v946_v43 = vmul.f32 0.0, %v932_v7 }
 0x13b   :  { %v955_v7 = vunpack.c.l.bf16 %v5245_v8  ;;  %v957_v10 = vunpack.c.h.bf16 %v5233_v50  ;;  %v956_v8 = vunpack.c.l.bf16 %v5215_v63 }
 0x13c   :  { %4513 = vtanh.f32 %v937_v15  ;;  %v938_v21 = vadd.f32 %v936_v2, %v700_v22  ;;  %v6825_v15 = vmov 0  }
 0x13e   :  { %4515 = vtanh.f32 %v938_v21 }
 0x146   :  { %v4514_v39 = vpop.eup %4513 }
 0x147   :  { %v943_v1 = vmul.f32 %v4514_v39, %v941_v17  ;;  %v6824_v39 = vmov 0.0  }
 0x148   :  { %v4516_v14 = vpop.eup %4515 }
 0x149   :  { %v944_v4 = vmul.f32 %v4516_v14, %v942_v61  ;;  %v5356_v16 = vadd.f32 %v945_v19, %v943_v1 }
 0x14b   :  { %v5358_v5 = vadd.f32 %v946_v43, %v944_v4  ;;  %v954_v4 = vunpack.c.l.bf16 %v5233_v50 }
 0x14d   :  { %v5362_v22 = vpack.c.bf16 %v5358_v5, %v5356_v16 }
 0x14f   :  { %993 = vmatmul.mubr.bf16.vlgmr.msra.gmra.mrb[20].mxu1 %v5362_v22  ;;  %4021 = vmatmul.mubr.bf16.vlgmr.msra.gmra.mrb[36].mxu0 %v5362_v22 }
 0x150   :  { %1092 = vmatpush1.bf16.msra.mxu1 %v4904_v28  ;;  %4025 = vmatpush3.bf16.msra.mxu0 %v4909_v29 }
 0x151   :  { %1093 = vmatprep.subr.bf16.mxu1 %v4916_v31  ;;  %4026 = vmatprep.subr.bf16.mxu0 %v6824_v39 }
 0x152   :  { %1123 = vmatprep.mubr.bf16.mxu1 %v6825_v15  ;;  %4040 = vmatprep.mubr.msk.bf16.mxu0 %vm4749_vm0, %v6824_v39 }
 0x154   :  { %1094 = vmatpush1.bf16.msra.mxu1 %v4924_v33  ;;  %4027 = vmatpush3.bf16.msra.mxu0 %v4931_v34 }
 0x155   :  { %1095 = vmatprep.subr.bf16.mxu1 %v4938_v35  ;;  %4028 = vmatprep.subr.bf16.mxu0 %v6824_v39 }
 0x158   :  { %1096 = vmatpush1.bf16.msra.mxu1 %v4947_v37  ;;  %4029 = vmatpush3.bf16.msra.mxu0 %v4966_v40 }
 0x159   :  { %1097 = vmatprep.subr.bf16.mxu1 %v4954_v38  ;;  %4030 = vmatprep.subr.bf16.mxu0 %v6824_v39 }
 0x15c   :  { %1098 = vmatpush1.bf16.msra.mxu1 %v4972_v41  ;;  %4031 = vmatpush3.bf16.msra.mxu0 %v4989_v44 }
 0x15d   :  { %1099 = vmatprep.subr.bf16.mxu1 %v4980_v42  ;;  %4032 = vmatprep.subr.bf16.mxu0 %v6824_v39 }
 0x160   :  { %1100 = vmatpush1.bf16.msra.mxu1 %v5007_v48  ;;  %4033 = vmatpush3.bf16.msra.mxu0 %v5025_v51 }
 0x161   :  { %1101 = vmatprep.subr.bf16.mxu1 %v5013_v49  ;;  %4034 = vmatprep.subr.bf16.mxu0 %v6824_v39 }
 0x164   :  { %1102 = vmatpush1.bf16.msra.mxu1 %v5034_v53  ;;  %4035 = vmatpush3.bf16.msra.mxu0 %v5073_v60 }
 0x165   :  { %1103 = vmatprep.subr.bf16.mxu1 %v5045_v55  ;;  %4036 = vmatprep.subr.bf16.mxu0 %v6824_v39 }
 0x168   :  { %1104 = vmatpush1.bf16.msra.mxu1 %v5061_v58  ;;  %4037 = vmatpush3.bf16.msra.mxu0 %v5095_v0 }
 0x169   :  { %1105 = vmatprep.subr.bf16.mxu1 %v5068_v59  ;;  %4038 = vmatprep.subr.bf16.mxu0 %v6824_v39 }
 0x16c   :  { %1106 = vmatpush1.bf16.msra.mxu1 %v5083_v62  ;;  %4039 = vmatpush3.bf16.msra.mxu0 %v5107_v3 }
 0x16d   :  { %1222 = vmatprep.subr.bf16.mxu1 %v4896_v26  ;;  %4044 = vmatprep.subr.bf16.mxu0 %v6824_v39 }
 0x222   :  { %v994_v27 = vpop.f32.mrb[20].mxu1  ;;  %v1037_v17 = vpop.f32.mrb[36].mxu0 }
 0x223   :  { %v1044_v54 = vadd.f32 %v994_v27, %v954_v4  ;;  %v996_v47 = vpop.f32.mrb[21].mxu1  ;;  %v4022_v12 = vpop.f32.mrb[37].mxu0 }
 0x224   :  { %v1054_v2 = vadd.f32 %v996_v47, %v955_v7  ;;  %v998_v18 = vpop.f32.mrb[22].mxu1  ;;  %v1040_v21 = vpop.f32.mrb[38].mxu0  ;;  %v1064_v47 = vadd.f32 %v5348_v20, %v1037_v17 }
 0x225   :  { %v1046_v11 = vmul.f32 0.5, %v1044_v54  ;;  %v1045_v26 = vadd.f32 %v998_v18, %v957_v10  ;;  %v1000_v32 = vpop.f32.mrb[23].mxu1  ;;  %v4023_v19 = vpop.f32.mrb[39].mxu0  ;;  %v1065_v18 = vadd.f32 %v5348_v20, %v1040_v21 }
 0x226   :  { %v1055_v61 = vadd.f32 %v1000_v32, %v958_v23  ;;  %v1056_v14 = vmul.f32 0.5, %v1054_v2 }
 0x227   :  { %4517 = vtanh.f32 %v1046_v11  ;;  %v1047_v1 = vmul.f32 0.5, %v1045_v26  ;;  %v959_v11 = vunpack.c.h.bf16 %v5215_v63 }
 0x228   :  { %v1057_v43 = vmul.f32 0.5, %v1055_v61 }
 0x229   :  { %4519 = vtanh.f32 %v1047_v1 }
 0x22a   :  { %4521 = vtanh.f32 %v1056_v14 }
 0x22b   :  { %4523 = vtanh.f32 %v1057_v43 }
 0x231   :  { %v4518_v4 = vpop.eup %4517 }
 0x232   :  { %v1050_v27 = vmul.f32 0.5, %v4518_v4 }
 0x233   :  { %v4520_v50 = vpop.eup %4519 }
 0x234   :  { %v1052_v7 = vadd.f32 0.5, %v1050_v27  ;;  %v1051_v12 = vmul.f32 0.5, %v4520_v50  ;;  %v4522_v23 = vpop.eup %4521 }
 0x235   :  { %v4524_v32 = vpop.eup %4523  ;;  %v1060_v61 = vmul.f32 0.5, %v4522_v23 }
 0x236   :  { %v1066_v54 = vmul.f32 %v1064_v47, %v1052_v7  ;;  %v1053_v10 = vadd.f32 0.5, %v1051_v12  ;;  %v1061_v1 = vmul.f32 0.5, %v4524_v32 }
 0x237   :  { %v1062_v14 = vadd.f32 0.5, %v1060_v61 }
 0x238   :  { %v1068_v2 = vadd.f32 %v1066_v54, %v956_v8  ;;  %v1067_v26 = vmul.f32 %v1065_v18, %v1053_v10  ;;  %v1063_v17 = vadd.f32 0.5, %v1061_v1 }
 0x239   :  { %v1072_v43 = vsub.f32 1.0, %v1062_v14  ;;  %v1076_v50 = vmul.f32 %v1062_v14, %v5356_v16 }
 0x23a   :  { %4525 = vtanh.f32 %v1068_v2  ;;  %v1069_v19 = vadd.f32 %v1067_v26, %v959_v11  ;;  %v1073_v7 = vsub.f32 1.0, %v1063_v17  ;;  %v1077_v12 = vmul.f32 %v1063_v17, %v5358_v5 }
 0x23c   :  { %4527 = vtanh.f32 %v1069_v19  ;;  %v1090_v19 = vunpack.c.h.bf16 %v5239_v57 }
 0x244   :  { %v4526_v4 = vpop.eup %4525 }
 0x245   :  { %v1074_v27 = vmul.f32 %v4526_v4, %v1072_v43 }
 0x246   :  { %v4528_v21 = vpop.eup %4527 }
 0x247   :  { %v5410_v47 = vadd.f32 %v1076_v50, %v1074_v27  ;;  %v1075_v63 = vmul.f32 %v4528_v21, %v1073_v7 }
 0x249   :  { %v5413_v8 = vadd.f32 %v1077_v12, %v1075_v63 }
 0x24b   :  { %v5417_v54 = vpack.c.bf16 %v5413_v8, %v5410_v47 }
 0x24d   :  { %1124 = vmatmul.mubr.bf16.vlgmr.msra.gmra.mrb[24].mxu1 %v5417_v54  ;;  %4041 = vmatmul.mubr.bf16.vlgmr.msra.gmra.mrb[40].mxu0 %v5417_v54 }
 0x24e   :  { %1223 = vmatpush1.bf16.msra.mxu1 %v4904_v28  ;;  %4045 = vmatpush3.bf16.msra.mxu0 %v4909_v29  ;;  %v5457_v28 = vld [vmem:[%s6751_s3 + $0x4] ss:$12 sps:$4 sm:$0xff]   ;;  %v1085_v29 = vunpack.c.l.bf16 %v5255_v56 }
 0x24f   :  { %1224 = vmatprep.subr.bf16.mxu1 %v4916_v31  ;;  %4046 = vmatprep.subr.bf16.mxu0 %v6824_v39 }
 0x250   :  { %1254 = vmatprep.mubr.bf16.mxu1 %v6825_v15  ;;  %4060 = vmatprep.mubr.msk.bf16.mxu0 %vm4749_vm0, %v6824_v39 }
 0x252   :  { %1225 = vmatpush1.bf16.msra.mxu1 %v4924_v33  ;;  %4047 = vmatpush3.bf16.msra.mxu0 %v4931_v34  ;;  %v1086_v34 = vunpack.c.l.bf16 %v5267_v36 }
 0x253   :  { %1226 = vmatprep.subr.bf16.mxu1 %v4938_v35  ;;  %4048 = vmatprep.subr.bf16.mxu0 %v6824_v39 }
 0x256   :  { %1227 = vmatpush1.bf16.msra.mxu1 %v4947_v37  ;;  %4049 = vmatpush3.bf16.msra.mxu0 %v4966_v40  ;;  %v1088_v40 = vunpack.c.h.bf16 %v5255_v56 }
 0x257   :  { %1228 = vmatprep.subr.bf16.mxu1 %v4954_v38  ;;  %4050 = vmatprep.subr.bf16.mxu0 %v6824_v39 }
 0x25a   :  { %1229 = vmatpush1.bf16.msra.mxu1 %v4972_v41  ;;  %4051 = vmatpush3.bf16.msra.mxu0 %v4989_v44 }
 0x25b   :  { %1230 = vmatprep.subr.bf16.mxu1 %v4980_v42  ;;  %4052 = vmatprep.subr.bf16.mxu0 %v6824_v39 }
 0x25e   :  { %1231 = vmatpush1.bf16.msra.mxu1 %v5007_v48  ;;  %4053 = vmatpush3.bf16.msra.mxu0 %v5025_v51  ;;  %v1089_v48 = vunpack.c.h.bf16 %v5267_v36  ;;  %v1087_v36 = vunpack.c.l.bf16 %v5239_v57 }
 0x25f   :  { %1232 = vmatprep.subr.bf16.mxu1 %v5013_v49  ;;  %4054 = vmatprep.subr.bf16.mxu0 %v6824_v39 }
 0x262   :  { %1233 = vmatpush1.bf16.msra.mxu1 %v5034_v53  ;;  %4055 = vmatpush3.bf16.msra.mxu0 %v5073_v60 }
 0x263   :  { %1234 = vmatprep.subr.bf16.mxu1 %v5045_v55  ;;  %4056 = vmatprep.subr.bf16.mxu0 %v6824_v39 }
 0x266   :  { %1235 = vmatpush1.bf16.msra.mxu1 %v5061_v58  ;;  %4057 = vmatpush3.bf16.msra.mxu0 %v5095_v0 }
 0x267   :  { %1236 = vmatprep.subr.bf16.mxu1 %v5068_v59  ;;  %4058 = vmatprep.subr.bf16.mxu0 %v6824_v39 }
 0x26a   :  { %1237 = vmatpush1.bf16.msra.mxu1 %v5083_v62  ;;  %4059 = vmatpush3.bf16.msra.mxu0 %v5107_v3 }
 0x26b   :  { %1353 = vmatprep.subr.bf16.mxu1 %v5457_v28  ;;  %4064 = vmatprep.subr.bf16.mxu0 %v6824_v39 }
 0x320   :  { %v1125_v31 = vpop.f32.mrb[24].mxu1  ;;  %v1168_v33 = vpop.f32.mrb[40].mxu0 }
 0x321   :  { %v1175_v35 = vadd.f32 %v1125_v31, %v1085_v29  ;;  %v1127_v37 = vpop.f32.mrb[25].mxu1  ;;  %v4042_v38 = vpop.f32.mrb[41].mxu0  ;;  %v1195_v18 = vadd.f32 %v5348_v20, %v1168_v33 }
 0x322   :  { %v1185_v41 = vadd.f32 %v1127_v37, %v1086_v34  ;;  %v1129_v42 = vpop.f32.mrb[26].mxu1  ;;  %v1171_v44 = vpop.f32.mrb[42].mxu0  ;;  %v5496_v38 = vld [vmem:[%s6751_s3 + $0x1c] ss:$12 sps:$4 sm:$0xff]  }
 0x323   :  { %v1177_v49 = vmul.f32 0.5, %v1175_v35  ;;  %v1176_v51 = vadd.f32 %v1129_v42, %v1088_v40  ;;  %v1131_v53 = vpop.f32.mrb[27].mxu1  ;;  %v4043_v55 = vpop.f32.mrb[43].mxu0  ;;  %v1196_v26 = vadd.f32 %v5348_v20, %v1171_v44  ;;  %v5506_v40 = vld [vmem:[%s6751_s3 + $0x18] ss:$12 sps:$4 sm:$0xff]  }
 0x324   :  { %v1186_v58 = vadd.f32 %v1131_v53, %v1089_v48  ;;  %v1187_v60 = vmul.f32 0.5, %v1185_v41  ;;  %v5512_v41 = vld [vmem:[%s6751_s3 + $0x20] ss:$12 sps:$4 sm:$0xff]   ;;  %v5525_v44 = vld [vmem:[%s6751_s3 + $0x30] ss:$12 sps:$4 sm:$0xff]  }
 0x325   :  { %4529 = vtanh.f32 %v1177_v49  ;;  %v1178_v59 = vmul.f32 0.5, %v1176_v51  ;;  %v5518_v42 = vld [vmem:[%s6751_s3 + $0x34] ss:$12 sps:$4 sm:$0xff]   ;;  %v5531_v48 = vld [vmem:[%s6751_s3 + $0x38] ss:$12 sps:$4 sm:$0xff]  }
 0x326   :  { %v1188_v62 = vmul.f32 0.5, %v1186_v58  ;;  %v5537_v49 = vld [vmem:[%s6751_s3 + $0x4c] ss:$12 sps:$4 sm:$0xff]   ;;  %v5544_v51 = vld [vmem:[%s6751_s3 + $0x48] ss:$12 sps:$4 sm:$0xff]  }
 0x327   :  { %4531 = vtanh.f32 %v1178_v59  ;;  %v5550_v53 = vld [vmem:[%s6751_s3 + $0x50] ss:$12 sps:$4 sm:$0xff]   ;;  %v5563_v58 = vld [vmem:[%s6751_s3 + $0x60] ss:$12 sps:$4 sm:$0xff]   ;;  %v5569_v59 = vld [vmem:[%s6751_s3 + $0x68] ss:$12 sps:$4 sm:$0xff]  }
 0x328   :  { %4533 = vtanh.f32 %v1187_v60  ;;  %v5556_v55 = vld [vmem:[%s6751_s3 + $0x64] ss:$12 sps:$4 sm:$0xff]   ;;  %v5575_v60 = vld [vmem:[%s6751_s3 + $0x7c] ss:$12 sps:$4 sm:$0xff]  }
 0x329   :  { %4535 = vtanh.f32 %v1188_v62  ;;  %v5582_v62 = vld [vmem:[%s6751_s3 + $0x78] ss:$12 sps:$4 sm:$0xff]  }
 0x32f   :  { %v4530_v16 = vpop.eup %4529 }
 0x330   :  { %v1181_v5 = vmul.f32 0.5, %v4530_v16  ;;  %v5588_v16 = vld [vmem:[%s6751_s3 + $0x80] ss:$12 sps:$4 sm:$0xff]  }
 0x331   :  { %v4532_v56 = vpop.eup %4531 }
 0x332   :  { %v1183_v10 = vadd.f32 0.5, %v1181_v5  ;;  %v1182_v23 = vmul.f32 0.5, %v4532_v56  ;;  %v4534_v32 = vpop.eup %4533  ;;  %v5594_v5 = vld [vmem:[%s6751_s3 + $0x94] ss:$12 sps:$4 sm:$0xff]   ;;  %v5601_v56 = vld [vmem:[%s6751_s3 + $0x90] ss:$12 sps:$4 sm:$0xff]  }
 0x333   :  { %v4536_v14 = vpop.eup %4535  ;;  %v1191_v43 = vmul.f32 0.5, %v4534_v32 }
 0x334   :  { %v1197_v11 = vmul.f32 %v1195_v18, %v1183_v10  ;;  %v1184_v2 = vadd.f32 0.5, %v1182_v23  ;;  %v1192_v4 = vmul.f32 0.5, %v4536_v14  ;;  %v5608_v10 = vld [vmem:[%s6751_s3 + $0xac] ss:$12 sps:$4 sm:$0xff]   ;;  %v5615_v18 = vld [vmem:[%s6751_s3 + $0xa8] ss:$12 sps:$4 sm:$0xff]  }
 0x335   :  { %v1193_v27 = vadd.f32 0.5, %v1191_v43 }
 0x336   :  { %v1199_v61 = vadd.f32 %v1197_v11, %v1087_v36  ;;  %v1198_v1 = vmul.f32 %v1196_v26, %v1184_v2  ;;  %v1194_v50 = vadd.f32 0.5, %v1192_v4  ;;  %v1217_v11 = vunpack.c.l.bf16 %v5290_v6 }
 0x337   :  { %v1203_v7 = vsub.f32 1.0, %v1193_v27  ;;  %v1207_v12 = vmul.f32 %v1193_v27, %v5410_v47  ;;  %v5484_v47 = vld [vmem:[%s6751_s3] ss:$12 sps:$4 sm:$0xff]  }
 0x338   :  { %4537 = vtanh.f32 %v1199_v61  ;;  %v1200_v17 = vadd.f32 %v1198_v1, %v1090_v19  ;;  %v1204_v29 = vsub.f32 1.0, %v1194_v50  ;;  %v1208_v34 = vmul.f32 %v1194_v50, %v5413_v8  ;;  %v5490_v8 = vld [vmem:[%s6751_s3 + $0x8] ss:$12 sps:$4 sm:$0xff]  }
 0x339   :  { %v1219_v19 = vunpack.c.h.bf16 %v5277_v30 }
 0x33a   :  { %4539 = vtanh.f32 %v1200_v17 }
 0x342   :  { %v4538_v21 = vpop.eup %4537 }
 0x343   :  { %v1205_v63 = vmul.f32 %v4538_v21, %v1203_v7 }
 0x344   :  { %v4540_v31 = vpop.eup %4539 }
 0x345   :  { %v5470_v33 = vadd.f32 %v1207_v12, %v1205_v63  ;;  %v1206_v57 = vmul.f32 %v4540_v31, %v1204_v29 }
 0x347   :  { %v5473_v35 = vadd.f32 %v1208_v34, %v1206_v57 }
 0x349   :  { %v5477_v37 = vpack.c.bf16 %v5473_v35, %v5470_v33 }
 0x34b   :  { %1255 = vmatmul.mubr.bf16.vlgmr.msra.gmra.mrb[28].mxu1 %v5477_v37  ;;  %4061 = vmatmul.mubr.bf16.vlgmr.msra.gmra.mrb[44].mxu0 %v5477_v37 }
 0x34c   :  { %1354 = vmatpush1.bf16.msra.mxu1 %v5484_v47  ;;  %4065 = vmatpush3.bf16.msra.mxu0 %v5490_v8 }
 0x34d   :  { %1355 = vmatprep.subr.bf16.mxu1 %v5496_v38  ;;  %4066 = vmatprep.subr.bf16.mxu0 %v6824_v39 }
 0x34e   :  { %1385 = vmatprep.mubr.bf16.mxu1 %v6825_v15  ;;  %4080 = vmatprep.mubr.msk.bf16.mxu0 %vm4749_vm0, %v6824_v39 }
 0x350   :  { %1356 = vmatpush1.bf16.msra.mxu1 %v5506_v40  ;;  %4067 = vmatpush3.bf16.msra.mxu0 %v5512_v41 }
 0x351   :  { %1357 = vmatprep.subr.bf16.mxu1 %v5518_v42  ;;  %4068 = vmatprep.subr.bf16.mxu0 %v6824_v39 }
 0x354   :  { %1358 = vmatpush1.bf16.msra.mxu1 %v5525_v44  ;;  %4069 = vmatpush3.bf16.msra.mxu0 %v5531_v48 }
 0x355   :  { %1359 = vmatprep.subr.bf16.mxu1 %v5537_v49  ;;  %4070 = vmatprep.subr.bf16.mxu0 %v6824_v39 }
 0x358   :  { %1360 = vmatpush1.bf16.msra.mxu1 %v5544_v51  ;;  %4071 = vmatpush3.bf16.msra.mxu0 %v5550_v53 }
 0x359   :  { %1361 = vmatprep.subr.bf16.mxu1 %v5556_v55  ;;  %4072 = vmatprep.subr.bf16.mxu0 %v6824_v39 }
 0x35c   :  { %1362 = vmatpush1.bf16.msra.mxu1 %v5563_v58  ;;  %4073 = vmatpush3.bf16.msra.mxu0 %v5569_v59 }
 0x35d   :  { %1363 = vmatprep.subr.bf16.mxu1 %v5575_v60  ;;  %4074 = vmatprep.subr.bf16.mxu0 %v6824_v39 }
 0x360   :  { %1364 = vmatpush1.bf16.msra.mxu1 %v5582_v62  ;;  %4075 = vmatpush3.bf16.msra.mxu0 %v5588_v16 }
 0x361   :  { %1365 = vmatprep.subr.bf16.mxu1 %v5594_v5  ;;  %4076 = vmatprep.subr.bf16.mxu0 %v6824_v39 }
 0x364   :  { %1366 = vmatpush1.bf16.msra.mxu1 %v5601_v56  ;;  %4077 = vmatpush3.bf16.msra.mxu0 %v5095_v0  ;;  %v1216_v0 = vunpack.c.l.bf16 %v5277_v30 }
 0x365   :  { %1367 = vmatprep.subr.bf16.mxu1 %v5608_v10  ;;  %4078 = vmatprep.subr.bf16.mxu0 %v6824_v39 }
 0x368   :  { %1368 = vmatpush1.bf16.msra.mxu1 %v5615_v18  ;;  %4079 = vmatpush3.bf16.msra.mxu0 %v5107_v3  ;;  %v1220_v3 = vunpack.c.h.bf16 %v5290_v6  ;;  %v1218_v6 = vunpack.c.l.bf16 %v5235_v52 }
 0x369   :  { %1484 = vmatprep.subr.bf16.mxu1 %v5457_v28  ;;  %4084 = vmatprep.subr.bf16.mxu0 %v6824_v39 }
 0x41e   :  { %v1256_v23 = vpop.f32.mrb[28].mxu1  ;;  %v1299_v36 = vpop.f32.mrb[44].mxu0 }
 0x41f   :  { %v1306_v2 = vadd.f32 %v1256_v23, %v1216_v0  ;;  %v1258_v26 = vpop.f32.mrb[29].mxu1  ;;  %v4062_v32 = vpop.f32.mrb[45].mxu0  ;;  %v1326_v57 = vadd.f32 %v5348_v20, %v1299_v36 }
 0x420   :  { %v1316_v61 = vadd.f32 %v1258_v26, %v1217_v11  ;;  %v1260_v1 = vpop.f32.mrb[30].mxu1  ;;  %v1302_v14 = vpop.f32.mrb[46].mxu0  ;;  %v1221_v26 = vunpack.c.h.bf16 %v5235_v52 }
 0x421   :  { %v1308_v17 = vmul.f32 0.5, %v1306_v2  ;;  %v1307_v43 = vadd.f32 %v1260_v1, %v1219_v19  ;;  %v1262_v4 = vpop.f32.mrb[31].mxu1  ;;  %v4063_v27 = vpop.f32.mrb[47].mxu0  ;;  %v1327_v11 = vadd.f32 %v5348_v20, %v1302_v14 }
 0x422   :  { %v1317_v50 = vadd.f32 %v1262_v4, %v1220_v3  ;;  %v1318_v21 = vmul.f32 0.5, %v1316_v61 }
 0x423   :  { %4541 = vtanh.f32 %v1308_v17  ;;  %v1309_v7 = vmul.f32 0.5, %v1307_v43 }
 0x424   :  { %v1319_v63 = vmul.f32 0.5, %v1317_v50 }
 0x425   :  { %4543 = vtanh.f32 %v1309_v7 }
 0x426   :  { %4545 = vtanh.f32 %v1318_v21 }
 0x427   :  { %4547 = vtanh.f32 %v1319_v63 }
 0x42d   :  { %v4542_v12 = vpop.eup %4541 }
 0x42e   :  { %v1312_v29 = vmul.f32 0.5, %v4542_v12 }
 0x42f   :  { %v4544_v30 = vpop.eup %4543 }
 0x430   :  { %v1314_v31 = vadd.f32 0.5, %v1312_v29  ;;  %v1313_v34 = vmul.f32 0.5, %v4544_v30  ;;  %v4546_v2 = vpop.eup %4545 }
 0x431   :  { %v4548_v61 = vpop.eup %4547  ;;  %v1322_v3 = vmul.f32 0.5, %v4546_v2  ;;  %v1350_v2 = vunpack.c.h.bf16 %v5299_v45 }
 0x432   :  { %v1328_v0 = vmul.f32 %v1326_v57, %v1314_v31  ;;  %v1315_v23 = vadd.f32 0.5, %v1313_v34  ;;  %v1323_v17 = vmul.f32 0.5, %v4548_v61  ;;  %v1347_v31 = vunpack.c.l.bf16 %v5299_v45 }
 0x433   :  { %v1324_v43 = vadd.f32 0.5, %v1322_v3  ;;  %v1351_v61 = vunpack.c.h.bf16 %v5303_v24 }
 0x434   :  { %v1330_v32 = vadd.f32 %v1328_v0, %v1218_v6  ;;  %v1329_v19 = vmul.f32 %v1327_v11, %v1315_v23  ;;  %v1325_v36 = vadd.f32 0.5, %v1323_v17  ;;  %v1348_v6 = vunpack.c.l.bf16 %v5303_v24 }
 0x435   :  { %v1334_v4 = vsub.f32 1.0, %v1324_v43  ;;  %v1338_v7 = vmul.f32 %v1324_v43, %v5470_v33  ;;  %v5672_v33 = vld [vmem:[%s6751_s3 + $0x98] ss:$12 sps:$4 sm:$0xff]   ;;  %v1349_v24 = vunpack.c.l.bf16 %v5261_v25 }
 0x436   :  { %4549 = vtanh.f32 %v1330_v32  ;;  %v1331_v1 = vadd.f32 %v1329_v19, %v1221_v26  ;;  %v1335_v21 = vsub.f32 1.0, %v1325_v36  ;;  %v1339_v12 = vmul.f32 %v1325_v36, %v5473_v35  ;;  %v5681_v35 = vld [vmem:[%s6751_s3 + $0xb0] ss:$12 sps:$4 sm:$0xff]  }
 0x438   :  { %4551 = vtanh.f32 %v1331_v1 }
 0x440   :  { %v4550_v27 = vpop.eup %4549 }
 0x441   :  { %v1336_v50 = vmul.f32 %v4550_v27, %v1334_v4 }
 0x442   :  { %v4552_v14 = vpop.eup %4551 }
 0x443   :  { %v5630_v63 = vadd.f32 %v1338_v7, %v1336_v50  ;;  %v1337_v52 = vmul.f32 %v4552_v14, %v1335_v21 }
 0x445   :  { %v5633_v29 = vadd.f32 %v1339_v12, %v1337_v52 }
 0x447   :  { %v5637_v30 = vpack.c.bf16 %v5633_v29, %v5630_v63 }
 0x449   :  { %1386 = vmatmul.mubr.bf16.vlgmr.msra.gmra.mrb[32].mxu1 %v5637_v30  ;;  %4081 = vmatmul.mubr.bf16.vlgmr.msra.gmra.mrb[48].mxu0 %v5637_v30 }
 0x44a   :  { %1485 = vmatpush1.bf16.msra.mxu1 %v5484_v47  ;;  %4085 = vmatpush3.bf16.msra.mxu0 %v5490_v8 }
 0x44b   :  { %1486 = vmatprep.subr.bf16.mxu1 %v5496_v38  ;;  %4086 = vmatprep.subr.bf16.mxu0 %v6824_v39 }
 0x44c   :  { %1516 = vmatprep.mubr.bf16.mxu1 %v6825_v15  ;;  %4100 = vmatprep.mubr.msk.bf16.mxu0 %vm4749_vm0, %v6824_v39 }
 0x44e   :  { %1487 = vmatpush1.bf16.msra.mxu1 %v5506_v40  ;;  %4087 = vmatpush3.bf16.msra.mxu0 %v5512_v41 }
 0x44f   :  { %1488 = vmatprep.subr.bf16.mxu1 %v5518_v42  ;;  %4088 = vmatprep.subr.bf16.mxu0 %v6824_v39 }
 0x452   :  { %1489 = vmatpush1.bf16.msra.mxu1 %v5525_v44  ;;  %4089 = vmatpush3.bf16.msra.mxu0 %v5531_v48 }
 0x453   :  { %1490 = vmatprep.subr.bf16.mxu1 %v5537_v49  ;;  %4090 = vmatprep.subr.bf16.mxu0 %v6824_v39 }
 0x456   :  { %1491 = vmatpush1.bf16.msra.mxu1 %v5544_v51  ;;  %4091 = vmatpush3.bf16.msra.mxu0 %v5550_v53 }
 0x457   :  { %1492 = vmatprep.subr.bf16.mxu1 %v5556_v55  ;;  %4092 = vmatprep.subr.bf16.mxu0 %v6824_v39 }
 0x45a   :  { %1493 = vmatpush1.bf16.msra.mxu1 %v5563_v58  ;;  %4093 = vmatpush3.bf16.msra.mxu0 %v5569_v59 }
 0x45b   :  { %1494 = vmatprep.subr.bf16.mxu1 %v5575_v60  ;;  %4094 = vmatprep.subr.bf16.mxu0 %v6824_v39 }
 0x45e   :  { %1495 = vmatpush1.bf16.msra.mxu1 %v5582_v62  ;;  %4095 = vmatpush3.bf16.msra.mxu0 %v5588_v16 }
 0x45f   :  { %1496 = vmatprep.subr.bf16.mxu1 %v5594_v5  ;;  %4096 = vmatprep.subr.bf16.mxu0 %v6824_v39 }
 0x462   :  { %1497 = vmatpush1.bf16.msra.mxu1 %v5601_v56  ;;  %4097 = vmatpush3.bf16.msra.mxu0 %v5672_v33 }
 0x463   :  { %1498 = vmatprep.subr.bf16.mxu1 %v5608_v10  ;;  %4098 = vmatprep.subr.bf16.mxu0 %v6824_v39 }
 0x466   :  { %1499 = vmatpush1.bf16.msra.mxu1 %v5615_v18  ;;  %4099 = vmatpush3.bf16.msra.mxu0 %v5681_v35 }
 0x467   :  { %1615 = vmatprep.subr.bf16.mxu1 %v5457_v28  ;;  %4104 = vmatprep.subr.bf16.mxu0 %v6824_v39 }
 0x51c   :  { %v1387_v57 = vpop.f32.mrb[32].mxu1  ;;  %v1430_v34 = vpop.f32.mrb[48].mxu0 }
 0x51d   :  { %v1437_v0 = vadd.f32 %v1387_v57, %v1347_v31  ;;  %v1389_v23 = vpop.f32.mrb[33].mxu1  ;;  %v4082_v11 = vpop.f32.mrb[49].mxu0  ;;  %v1457_v52 = vadd.f32 %v5348_v20, %v1430_v34 }
 0x51e   :  { %v1447_v26 = vadd.f32 %v1389_v23, %v1348_v6  ;;  %v1391_v32 = vpop.f32.mrb[34].mxu1  ;;  %v1433_v19 = vpop.f32.mrb[50].mxu0  ;;  %v1352_v23 = vunpack.c.h.bf16 %v5261_v25 }
 0x51f   :  { %v1439_v1 = vmul.f32 0.5, %v1437_v0  ;;  %v1438_v3 = vadd.f32 %v1391_v32, %v1350_v2  ;;  %v1393_v17 = vpop.f32.mrb[35].mxu1  ;;  %v4083_v43 = vpop.f32.mrb[51].mxu0  ;;  %v1458_v6 = vadd.f32 %v5348_v20, %v1433_v19 }
 0x520   :  { %v1448_v36 = vadd.f32 %v1393_v17, %v1351_v61  ;;  %v1449_v27 = vmul.f32 0.5, %v1447_v26 }
 0x521   :  { %4553 = vtanh.f32 %v1439_v1  ;;  %v1440_v4 = vmul.f32 0.5, %v1438_v3 }
 0x522   :  { %v1450_v50 = vmul.f32 0.5, %v1448_v36 }
 0x523   :  { %4555 = vtanh.f32 %v1440_v4 }
 0x524   :  { %4557 = vtanh.f32 %v1449_v27 }
 0x525   :  { %4559 = vtanh.f32 %v1450_v50 }
 0x52b   :  { %v4554_v7 = vpop.eup %4553 }
 0x52c   :  { %v1443_v21 = vmul.f32 0.5, %v4554_v7 }
 0x52d   :  { %v4556_v45 = vpop.eup %4555 }
 0x52e   :  { %v1445_v14 = vadd.f32 0.5, %v1443_v21  ;;  %v1444_v12 = vmul.f32 0.5, %v4556_v45  ;;  %v4558_v0 = vpop.eup %4557 }
 0x52f   :  { %v4560_v26 = vpop.eup %4559  ;;  %v1453_v61 = vmul.f32 0.5, %v4558_v0 }
 0x530   :  { %v1459_v31 = vmul.f32 %v1457_v52, %v1445_v14  ;;  %v1446_v57 = vadd.f32 0.5, %v1444_v12  ;;  %v1454_v1 = vmul.f32 0.5, %v4560_v26  ;;  %v1479_v52 = vunpack.c.l.bf16 %v5317_v46 }
 0x531   :  { %v1455_v3 = vadd.f32 0.5, %v1453_v61 }
 0x532   :  { %v1461_v11 = vadd.f32 %v1459_v31, %v1349_v24  ;;  %v1460_v2 = vmul.f32 %v1458_v6, %v1446_v57  ;;  %v1456_v34 = vadd.f32 0.5, %v1454_v1  ;;  %v1481_v57 = vunpack.c.h.bf16 %v5313_v13 }
 0x533   :  { %v1465_v17 = vsub.f32 1.0, %v1455_v3  ;;  %v1469_v4 = vmul.f32 %v1455_v3, %v5630_v63  ;;  %v1478_v63 = vunpack.c.l.bf16 %v5313_v13 }
 0x534   :  { %4561 = vtanh.f32 %v1461_v11  ;;  %v1462_v32 = vadd.f32 %v1460_v2, %v1352_v23  ;;  %v1466_v27 = vsub.f32 1.0, %v1456_v34  ;;  %v1470_v7 = vmul.f32 %v1456_v34, %v5633_v29 }
 0x535   :  { %v1482_v11 = vunpack.c.h.bf16 %v5317_v46  ;;  %v1480_v46 = vunpack.c.l.bf16 %v5257_v9 }
 0x536   :  { %4563 = vtanh.f32 %v1462_v32 }
 0x53e   :  { %v4562_v43 = vpop.eup %4561 }
 0x53f   :  { %v1467_v36 = vmul.f32 %v4562_v43, %v1465_v17 }
 0x540   :  { %v4564_v19 = vpop.eup %4563 }
 0x541   :  { %v5695_v50 = vadd.f32 %v1469_v4, %v1467_v36  ;;  %v1468_v25 = vmul.f32 %v4564_v19, %v1466_v27 }
 0x543   :  { %v5698_v21 = vadd.f32 %v1470_v7, %v1468_v25 }
 0x545   :  { %v5702_v45 = vpack.c.bf16 %v5698_v21, %v5695_v50 }
 0x547   :  { %1517 = vmatmul.mubr.bf16.vlgmr.msra.gmra.mrb[36].mxu1 %v5702_v45  ;;  %4101 = vmatmul.mubr.bf16.vlgmr.msra.gmra.mrb[52].mxu0 %v5702_v45 }
 0x548   :  { %1616 = vmatpush1.bf16.msra.mxu1 %v5484_v47  ;;  %4105 = vmatpush3.bf16.msra.mxu0 %v5490_v8 }
 0x549   :  { %1617 = vmatprep.subr.bf16.mxu1 %v5496_v38  ;;  %4106 = vmatprep.subr.bf16.mxu0 %v6824_v39 }
 0x54a   :  { %1647 = vmatprep.mubr.bf16.mxu1 %v6825_v15  ;;  %4120 = vmatprep.mubr.msk.bf16.mxu0 %vm4749_vm0, %v6824_v39 }
 0x54c   :  { %1618 = vmatpush1.bf16.msra.mxu1 %v5506_v40  ;;  %4107 = vmatpush3.bf16.msra.mxu0 %v5512_v41 }
 0x54d   :  { %1619 = vmatprep.subr.bf16.mxu1 %v5518_v42  ;;  %4108 = vmatprep.subr.bf16.mxu0 %v6824_v39 }
 0x550   :  { %1620 = vmatpush1.bf16.msra.mxu1 %v5525_v44  ;;  %4109 = vmatpush3.bf16.msra.mxu0 %v5531_v48 }
 0x551   :  { %1621 = vmatprep.subr.bf16.mxu1 %v5537_v49  ;;  %4110 = vmatprep.subr.bf16.mxu0 %v6824_v39 }
 0x554   :  { %1622 = vmatpush1.bf16.msra.mxu1 %v5544_v51  ;;  %4111 = vmatpush3.bf16.msra.mxu0 %v5550_v53 }
 0x555   :  { %1623 = vmatprep.subr.bf16.mxu1 %v5556_v55  ;;  %4112 = vmatprep.subr.bf16.mxu0 %v6824_v39 }
 0x558   :  { %1624 = vmatpush1.bf16.msra.mxu1 %v5563_v58  ;;  %4113 = vmatpush3.bf16.msra.mxu0 %v5569_v59 }
 0x559   :  { %1625 = vmatprep.subr.bf16.mxu1 %v5575_v60  ;;  %4114 = vmatprep.subr.bf16.mxu0 %v6824_v39 }
 0x55c   :  { %1626 = vmatpush1.bf16.msra.mxu1 %v5582_v62  ;;  %4115 = vmatpush3.bf16.msra.mxu0 %v5588_v16 }
 0x55d   :  { %1627 = vmatprep.subr.bf16.mxu1 %v5594_v5  ;;  %4116 = vmatprep.subr.bf16.mxu0 %v6824_v39 }
 0x560   :  { %1628 = vmatpush1.bf16.msra.mxu1 %v5601_v56  ;;  %4117 = vmatpush3.bf16.msra.mxu0 %v5672_v33 }
 0x561   :  { %1629 = vmatprep.subr.bf16.mxu1 %v5608_v10  ;;  %4118 = vmatprep.subr.bf16.mxu0 %v6824_v39 }
 0x564   :  { %1630 = vmatpush1.bf16.msra.mxu1 %v5615_v18  ;;  %4119 = vmatpush3.bf16.msra.mxu0 %v5681_v35 }
 0x565   :  { %1746 = vmatprep.subr.bf16.mxu1 %v5457_v28  ;;  %4124 = vmatprep.subr.bf16.mxu0 %v6824_v39 }
 0x61a   :  { %v1518_v29 = vpop.f32.mrb[36].mxu1  ;;  %v1561_v14 = vpop.f32.mrb[52].mxu0 }
 0x61b   :  { %v1568_v12 = vadd.f32 %v1518_v29, %v1478_v63  ;;  %v1520_v24 = vpop.f32.mrb[37].mxu1  ;;  %v4102_v31 = vpop.f32.mrb[53].mxu0  ;;  %v1588_v4 = vadd.f32 %v5348_v20, %v1561_v14  ;;  %v1483_v29 = vunpack.c.h.bf16 %v5257_v9 }
 0x61c   :  { %v1578_v6 = vadd.f32 %v1520_v24, %v1479_v52  ;;  %v1522_v0 = vpop.f32.mrb[38].mxu1  ;;  %v1564_v23 = vpop.f32.mrb[54].mxu0 }
 0x61d   :  { %v1570_v2 = vmul.f32 0.5, %v1568_v12  ;;  %v1569_v28 = vadd.f32 %v1522_v0, %v1481_v57  ;;  %v1524_v26 = vpop.f32.mrb[39].mxu1  ;;  %v4103_v32 = vpop.f32.mrb[55].mxu0  ;;  %v1589_v7 = vadd.f32 %v5348_v20, %v1564_v23 }
 0x61e   :  { %v1579_v61 = vadd.f32 %v1524_v26, %v1482_v11  ;;  %v1580_v3 = vmul.f32 0.5, %v1578_v6 }
 0x61f   :  { %4565 = vtanh.f32 %v1570_v2  ;;  %v1571_v1 = vmul.f32 0.5, %v1569_v28 }
 0x620   :  { %v1581_v34 = vmul.f32 0.5, %v1579_v61 }
 0x621   :  { %4567 = vtanh.f32 %v1571_v1 }
 0x622   :  { %4569 = vtanh.f32 %v1580_v3 }
 0x623   :  { %4571 = vtanh.f32 %v1581_v34 }
 0x629   :  { %v4566_v17 = vpop.eup %4565 }
 0x62a   :  { %v1574_v43 = vmul.f32 0.5, %v4566_v17 }
 0x62b   :  { %v4568_v13 = vpop.eup %4567 }
 0x62c   :  { %v1576_v36 = vadd.f32 0.5, %v1574_v43  ;;  %v1575_v27 = vmul.f32 0.5, %v4568_v13  ;;  %v4570_v63 = vpop.eup %4569  ;;  %v5810_v13 = vld [vmem:[%s6754_s5] ss:$0 sm:$0xff] }
 0x62d   :  { %v4572_v24 = vpop.eup %4571  ;;  %v1584_v57 = vmul.f32 0.5, %v4570_v63 }
 0x62e   :  { %v1590_v19 = vmul.f32 %v1588_v4, %v1576_v36  ;;  %v1577_v25 = vadd.f32 0.5, %v1575_v27  ;;  %v1585_v6 = vmul.f32 0.5, %v4572_v24  ;;  %v6828_v27 = vld [vmem:[#allocation14_spill] sm:$0xff] }
 0x62f   :  { %v1586_v0 = vadd.f32 0.5, %v1584_v57 }
 0x630   :  { %v1592_v52 = vadd.f32 %v1590_v19, %v1480_v46  ;;  %v1591_v12 = vmul.f32 %v1589_v7, %v1577_v25  ;;  %v1587_v14 = vadd.f32 0.5, %v1585_v6  ;;  %v1611_v46 = vunpack.c.l.bf16 %v6828_v27 }
 0x631   :  { %v1596_v11 = vsub.f32 1.0, %v1586_v0  ;;  %v1600_v26 = vmul.f32 %v1586_v0, %v5695_v50 }
 0x632   :  { %4573 = vtanh.f32 %v1592_v52  ;;  %v1593_v31 = vadd.f32 %v1591_v12, %v1483_v29  ;;  %v1597_v32 = vsub.f32 1.0, %v1587_v14  ;;  %v1601_v61 = vmul.f32 %v1587_v14, %v5698_v21 }
 0x633   :  { %v1614_v29 = vunpack.c.h.bf16 %v6828_v27  ;;  %v5999_v27 = vld [vmem:[%s6756_s7 + $0x50] ss:$12 sps:$4 sm:$0xff]  }
 0x634   :  { %4575 = vtanh.f32 %v1593_v31 }
 0x63c   :  { %v4574_v2 = vpop.eup %4573 }
 0x63d   :  { %v1598_v28 = vmul.f32 %v4574_v2, %v1596_v11 }
 0x63e   :  { %v4576_v20 = vpop.eup %4575 }
 0x63f   :  { %v5750_v23 = vadd.f32 %v1600_v26, %v1598_v28  ;;  %v1599_v9 = vmul.f32 %v4576_v20, %v1597_v32 }
 0x641   :  { %v5753_v1 = vadd.f32 %v1601_v61, %v1599_v9 }
 0x643   :  { %v5757_v3 = vpack.c.bf16 %v5753_v1, %v5750_v23 }
 0x645   :  { %1648 = vmatmul.mubr.bf16.vlgmr.msra.gmra.mrb[40].mxu1 %v5757_v3  ;;  %4121 = vmatmul.mubr.bf16.vlgmr.msra.gmra.mrb[56].mxu0 %v5757_v3 }
 0x646   :  { %1747 = vmatpush1.bf16.msra.mxu1 %v5484_v47  ;;  %4125 = vmatpush3.bf16.msra.mxu0 %v5490_v8  ;;  %v4435_v47 = vld [vmem:[%s6755_s6 + $0x4] ss:$12 sps:$4 sm:$0xff]   ;;  %v5800_v8 = vld [vmem:[%s6755_s6 + $0x8] ss:$12 sps:$4 sm:$0xff]  }
 0x647   :  { %1748 = vmatprep.subr.bf16.mxu1 %v5496_v38  ;;  %4126 = vmatprep.subr.bf16.mxu0 %v6824_v39  ;;  %v6826_v38 = vld [vmem:[#allocation21_spill] sm:$0xff] }
 0x648   :  { %1778 = vmatprep.mubr.bf16.mxu1 %v6825_v15  ;;  %4140 = vmatprep.mubr.msk.bf16.mxu0 %vm4749_vm0, %v6824_v39 }
 0x64a   :  { %1749 = vmatpush1.bf16.msra.mxu1 %v5506_v40  ;;  %4127 = vmatpush3.bf16.msra.mxu0 %v5512_v41  ;;  %v1609_v40 = vunpack.c.l.bf16 %v6826_v38 }
 0x64b   :  { %1750 = vmatprep.subr.bf16.mxu1 %v5518_v42  ;;  %4128 = vmatprep.subr.bf16.mxu0 %v6824_v39 }
 0x64e   :  { %1751 = vmatpush1.bf16.msra.mxu1 %v5525_v44  ;;  %4129 = vmatpush3.bf16.msra.mxu0 %v5531_v48  ;;  %v6827_v44 = vld [vmem:[#allocation22_spill] sm:$0xff] }
 0x64f   :  { %1752 = vmatprep.subr.bf16.mxu1 %v5537_v49  ;;  %4130 = vmatprep.subr.bf16.mxu0 %v6824_v39  ;;  %v1610_v48 = vunpack.c.l.bf16 %v6827_v44 }
 0x652   :  { %1753 = vmatpush1.bf16.msra.mxu1 %v5544_v51  ;;  %4131 = vmatpush3.bf16.msra.mxu0 %v5550_v53 }
 0x653   :  { %1754 = vmatprep.subr.bf16.mxu1 %v5556_v55  ;;  %4132 = vmatprep.subr.bf16.mxu0 %v6824_v39  ;;  %v1612_v55 = vunpack.c.h.bf16 %v6826_v38 }
 0x656   :  { %1755 = vmatpush1.bf16.msra.mxu1 %v5563_v58  ;;  %4133 = vmatpush3.bf16.msra.mxu0 %v5569_v59 }
 0x657   :  { %1756 = vmatprep.subr.bf16.mxu1 %v5575_v60  ;;  %4134 = vmatprep.subr.bf16.mxu0 %v6824_v39 }
 0x65a   :  { %1757 = vmatpush1.bf16.msra.mxu1 %v5582_v62  ;;  %4135 = vmatpush3.bf16.msra.mxu0 %v5588_v16  ;;  %v1613_v62 = vunpack.c.h.bf16 %v6827_v44  ;;  %v4443_v44 = vld [vmem:[%s6755_s6 + $0x34] ss:$12 sps:$4 sm:$0xff]  }
 0x65b   :  { %1758 = vmatprep.subr.bf16.mxu1 %v5594_v5  ;;  %4136 = vmatprep.subr.bf16.mxu0 %v6824_v39 }
 0x65e   :  { %1759 = vmatpush1.bf16.msra.mxu1 %v5601_v56  ;;  %4137 = vmatpush3.bf16.msra.mxu0 %v5672_v33 }
 0x65f   :  { %1760 = vmatprep.subr.bf16.mxu1 %v5608_v10  ;;  %4138 = vmatprep.subr.bf16.mxu0 %v6824_v39 }
 0x662   :  { %1761 = vmatpush1.bf16.msra.mxu1 %v5615_v18  ;;  %4139 = vmatpush3.bf16.msra.mxu0 %v5681_v35 }
 0x663   :  { %2053 = vmatprep.subr.bf16.mxu1 %v4435_v47  ;;  %4144 = vmatprep.subr.bf16.mxu0 %v5800_v8 }
 0x718   :  { %v1649_v41 = vpop.f32.mrb[40].mxu1  ;;  %v1692_v42 = vpop.f32.mrb[56].mxu0 }
 0x719   :  { %v1699_v49 = vadd.f32 %v1649_v41, %v1609_v40  ;;  %v1651_v51 = vpop.f32.mrb[41].mxu1  ;;  %v4122_v53 = vpop.f32.mrb[57].mxu0  ;;  %v1719_v36 = vadd.f32 %v5810_v13, %v1692_v42  ;;  %v4433_v40 = vld [vmem:[%s6755_s6] ss:$12 sps:$4 sm:$0xff]  }
 0x71a   :  { %v1709_v58 = vadd.f32 %v1651_v51, %v1610_v48  ;;  %v1653_v59 = vpop.f32.mrb[42].mxu1  ;;  %v1695_v60 = vpop.f32.mrb[58].mxu0  ;;  %v4440_v42 = vld [vmem:[%s6755_s6 + $0x20] ss:$12 sps:$4 sm:$0xff]   ;;  %v4444_v48 = vld [vmem:[%s6755_s6 + $0x38] ss:$12 sps:$4 sm:$0xff]  }
 0x71b   :  { %v1701_v16 = vmul.f32 0.5, %v1699_v49  ;;  %v1700_v5 = vadd.f32 %v1653_v59, %v1612_v55  ;;  %v1655_v56 = vpop.f32.mrb[43].mxu1  ;;  %v4123_v10 = vpop.f32.mrb[59].mxu0  ;;  %v1720_v7 = vadd.f32 %v5810_v13, %v1695_v60  ;;  %v4447_v49 = vld [vmem:[%s6755_s6 + $0x4c] ss:$12 sps:$4 sm:$0xff]  }
 0x71c   :  { %v1710_v18 = vadd.f32 %v1655_v56, %v1613_v62  ;;  %v1711_v35 = vmul.f32 0.5, %v1709_v58  ;;  %v4448_v51 = vld [vmem:[%s6755_s6 + $0x50] ss:$12 sps:$4 sm:$0xff]   ;;  %v4445_v53 = vld [vmem:[%s6755_s6 + $0x48] ss:$12 sps:$4 sm:$0xff]  }
 0x71d   :  { %4577 = vtanh.f32 %v1701_v16  ;;  %v1702_v33 = vmul.f32 0.5, %v1700_v5  ;;  %v4451_v55 = vld [vmem:[%s6755_s6 + $0x64] ss:$12 sps:$4 sm:$0xff]   ;;  %v4452_v58 = vld [vmem:[%s6755_s6 + $0x68] ss:$12 sps:$4 sm:$0xff]  }
 0x71e   :  { %v1712_v50 = vmul.f32 0.5, %v1710_v18  ;;  %v4449_v59 = vld [vmem:[%s6755_s6 + $0x60] ss:$12 sps:$4 sm:$0xff]   ;;  %v4455_v60 = vld [vmem:[%s6755_s6 + $0x7c] ss:$12 sps:$4 sm:$0xff]  }
 0x71f   :  { %4579 = vtanh.f32 %v1702_v33  ;;  %v4456_v62 = vld [vmem:[%s6755_s6 + $0x80] ss:$12 sps:$4 sm:$0xff]   ;;  %v4453_v16 = vld [vmem:[%s6755_s6 + $0x78] ss:$12 sps:$4 sm:$0xff]   ;;  %v4457_v10 = vld [vmem:[%s6755_s6 + $0x90] ss:$12 sps:$4 sm:$0xff]  }
 0x720   :  { %4581 = vtanh.f32 %v1711_v35  ;;  %v4459_v5 = vld [vmem:[%s6755_s6 + $0x94] ss:$12 sps:$4 sm:$0xff]   ;;  %v4460_v56 = vld [vmem:[%s6755_s6 + $0x98] ss:$12 sps:$4 sm:$0xff]   ;;  %v4464_v33 = vld [vmem:[%s6755_s6 + $0xb0] ss:$12 sps:$4 sm:$0xff]  }
 0x721   :  { %4583 = vtanh.f32 %v1712_v50  ;;  %v4463_v18 = vld [vmem:[%s6755_s6 + $0xac] ss:$12 sps:$4 sm:$0xff]   ;;  %v4461_v35 = vld [vmem:[%s6755_s6 + $0xa8] ss:$12 sps:$4 sm:$0xff]   ;;  %v5955_v50 = vld [vmem:[%s6756_s7 + $0x30] ss:$12 sps:$4 sm:$0xff]  }
 0x727   :  { %v4578_v21 = vpop.eup %4577 }
 0x728   :  { %v1705_v34 = vmul.f32 0.5, %v4578_v21  ;;  %v5961_v21 = vld [vmem:[%s6756_s7 + $0x20] ss:$12 sps:$4 sm:$0xff]  }
 0x729   :  { %v4580_v17 = vpop.eup %4579 }
 0x72a   :  { %v1707_v43 = vadd.f32 0.5, %v1705_v34  ;;  %v1706_v4 = vmul.f32 0.5, %v4580_v17  ;;  %v4582_v63 = vpop.eup %4581  ;;  %v5968_v34 = vld [vmem:[%s6756_s7 + $0x38] ss:$12 sps:$4 sm:$0xff]  }
 0x72b   :  { %v4584_v24 = vpop.eup %4583  ;;  %v1715_v57 = vmul.f32 0.5, %v4582_v63  ;;  %v5973_v17 = vld [vmem:[%s6756_s7 + $0x4c] ss:$12 sps:$4 sm:$0xff]   ;;  %v6031_v63 = vld [vmem:[%s6756_s7 + $0x90] ss:$12 sps:$4 sm:$0xff]  }
 0x72c   :  { %v1721_v19 = vmul.f32 %v1719_v36, %v1707_v43  ;;  %v1708_v25 = vadd.f32 0.5, %v1706_v4  ;;  %v1716_v6 = vmul.f32 0.5, %v4584_v24  ;;  %v5979_v43 = vld [vmem:[%s6756_s7 + $0x48] ss:$12 sps:$4 sm:$0xff]   ;;  %v5987_v36 = vld [vmem:[%s6756_s7 + $0x64] ss:$12 sps:$4 sm:$0xff]  }
 0x72d   :  { %v1717_v0 = vadd.f32 0.5, %v1715_v57  ;;  %v5993_v4 = vld [vmem:[%s6756_s7 + $0x60] ss:$12 sps:$4 sm:$0xff]   ;;  %v6060_v24 = vld [vmem:[%s6756_s7 + $0x98] ss:$12 sps:$4 sm:$0xff]  }
 0x72e   :  { %v1723_v52 = vadd.f32 %v1721_v19, %v1611_v46  ;;  %v1722_v12 = vmul.f32 %v1720_v7, %v1708_v25  ;;  %v1718_v14 = vadd.f32 0.5, %v1716_v6  ;;  %v6006_v46 = vld [vmem:[%s6756_s7 + $0x7c] ss:$12 sps:$4 sm:$0xff]   ;;  %v6012_v19 = vld [vmem:[%s6756_s7 + $0x78] ss:$12 sps:$4 sm:$0xff]  }
 0x72f   :  { %v1727_v11 = vsub.f32 1.0, %v1717_v0  ;;  %v1731_v26 = vmul.f32 %v1717_v0, %v5750_v23  ;;  %v4439_v23 = vld [vmem:[%s6755_s6 + $0x1c] ss:$12 sps:$4 sm:$0xff]   ;;  %v6025_v7 = vld [vmem:[%s6756_s7 + $0x94] ss:$12 sps:$4 sm:$0xff]  }
 0x730   :  { %4585 = vtanh.f32 %v1723_v52  ;;  %v1724_v31 = vadd.f32 %v1722_v12, %v1614_v29  ;;  %v1728_v32 = vsub.f32 1.0, %v1718_v14  ;;  %v1732_v47 = vmul.f32 %v1718_v14, %v5753_v1  ;;  %v4437_v1 = vld [vmem:[%s6755_s6 + $0x18] ss:$12 sps:$4 sm:$0xff]   ;;  %v6018_v25 = vld [vmem:[%s6756_s7 + $0x68] ss:$12 sps:$4 sm:$0xff]  }
 0x731   :  { %v6039_v29 = vld [vmem:[%s6756_s7 + $0xac] ss:$12 sps:$4 sm:$0xff]   ;;  %v6045_v52 = vld [vmem:[%s6756_s7 + $0xa8] ss:$12 sps:$4 sm:$0xff]  }
 0x732   :  { %4587 = vtanh.f32 %v1724_v31  ;;  %v6050_v12 = vld [vmem:[%s6756_s7 + $0x80] ss:$12 sps:$4 sm:$0xff]   ;;  %v6067_v31 = vld [vmem:[%s6756_s7 + $0xb0] ss:$12 sps:$4 sm:$0xff]  }
 0x733   :  { %v6829_v57 = vld [vmem:[#allocation25_spill] sm:$0xff] }
 0x734   :  { %v1740_v6 = vunpack.c.l.bf16 %v6829_v57 }
 0x73a   :  { %v4586_v2 = vpop.eup %4585 }
 0x73b   :  { %v1729_v28 = vmul.f32 %v4586_v2, %v1727_v11  ;;  %v6830_v11 = vld [vmem:[#allocation26_spill] sm:$0xff] }
 0x73c   :  { %v4588_v20 = vpop.eup %4587  ;;  %v1741_v2 = vunpack.c.l.bf16 %v6830_v11 }
 0x73d   :  { %v5817_v9 = vadd.f32 %v1731_v26, %v1729_v28  ;;  %v1730_v61 = vmul.f32 %v4588_v20, %v1728_v32  ;;  %v1743_v20 = vunpack.c.h.bf16 %v6829_v57 }
 0x73f   :  { %v5820_v38 = vadd.f32 %v1732_v47, %v1730_v61 }
 0x741   :  { %v5827_v41 = vpack.c.bf16 %v5820_v38, %v5817_v9 }
 0x743   :  { %1779 = vmatmul.mubr.bf16.vlgmr.msra.gmra.mrb[44].mxu1 %v5827_v41  ;;  %4141 = vmatmul.mubr.bf16.vlgmr.msra.gmra.mrb[60].mxu0 %v5827_v41 }
 0x744   :  { %2054 = vmatpush1.bf16.msra.mxu1 %v4433_v40  ;;  %4145 = vmatpush3.bf16.msra.mxu0 %v5800_v8  ;;  %v4441_v8 = vld [vmem:[%s6755_s6 + $0x30] ss:$12 sps:$4 sm:$0xff]  }
 0x745   :  { %4160 = vmatprep.mubr.bf16.mxu0 %v5362_v22  ;;  %2055 = vmatprep.subr.bf16.mxu1 %v4439_v23 }
 0x746   :  { %4146 = vmatprep.subr.bf16.mxu0 %v4440_v42  ;;  %2085 = vmatprep.mubr.bf16.mxu1 %v6825_v15 }
 0x748   :  { %2056 = vmatpush1.bf16.msra.mxu1 %v4437_v1  ;;  %4147 = vmatpush3.bf16.msra.mxu0 %v4440_v42 }
 0x749   :  { %2057 = vmatprep.subr.bf16.mxu1 %v4443_v44  ;;  %4148 = vmatprep.subr.bf16.mxu0 %v4444_v48 }
 0x74c   :  { %2058 = vmatpush1.bf16.msra.mxu1 %v4441_v8  ;;  %4149 = vmatpush3.bf16.msra.mxu0 %v4444_v48 }
 0x74d   :  { %2059 = vmatprep.subr.bf16.mxu1 %v4447_v49  ;;  %4150 = vmatprep.subr.bf16.mxu0 %v4448_v51 }
 0x750   :  { %2060 = vmatpush1.bf16.msra.mxu1 %v4445_v53  ;;  %4151 = vmatpush3.bf16.msra.mxu0 %v4448_v51 }
 0x751   :  { %2061 = vmatprep.subr.bf16.mxu1 %v4451_v55  ;;  %4152 = vmatprep.subr.bf16.mxu0 %v4452_v58 }
 0x754   :  { %2062 = vmatpush1.bf16.msra.mxu1 %v4449_v59  ;;  %4153 = vmatpush3.bf16.msra.mxu0 %v4452_v58 }
 0x755   :  { %2063 = vmatprep.subr.bf16.mxu1 %v4455_v60  ;;  %4154 = vmatprep.subr.bf16.mxu0 %v4456_v62 }
 0x758   :  { %2064 = vmatpush1.bf16.msra.mxu1 %v4453_v16  ;;  %4155 = vmatpush3.bf16.msra.mxu0 %v4456_v62  ;;  %v6831_v16 = vld [vmem:[#allocation13_spill] sm:$0xff] }
 0x759   :  { %2065 = vmatprep.subr.bf16.mxu1 %v4459_v5  ;;  %4156 = vmatprep.subr.bf16.mxu0 %v4460_v56  ;;  %v1742_v5 = vunpack.c.l.bf16 %v6831_v16 }
 0x75c   :  { %2066 = vmatpush1.bf16.msra.mxu1 %v4457_v10  ;;  %4157 = vmatpush3.bf16.msra.mxu0 %v4460_v56 }
 0x75d   :  { %2067 = vmatprep.subr.bf16.mxu1 %v4463_v18  ;;  %4158 = vmatprep.subr.bf16.mxu0 %v4464_v33 }
 0x760   :  { %2068 = vmatpush1.bf16.msra.mxu1 %v4461_v35  ;;  %4159 = vmatpush3.bf16.msra.mxu0 %v4464_v33  ;;  %v1745_v35 = vunpack.c.h.bf16 %v6831_v16 }
 0x761   :  { %4176 = vmatprep.subr.bf16.mxu1 %v6824_v39 }
 0x763   :  { %2086 = vmatmul.mubr.bf16.vlgmr.msra.gmra.mrb[48].mxu1 %v5362_v22  ;;  %4161 = vmatmul.mubr.bf16.vlgmr.msra.gmra.mrb[64].mxu0 %v5417_v54  ;;  %v5921_v22 = vld [vmem:[%s6756_s7 + $0x4] ss:$12 sps:$4 sm:$0xff]  }
 0x764   :  { %4164 = vmatprep.mubr.bf16.mxu0 %v5477_v37  ;;  %2095 = vmatprep.mubr.bf16.mxu1 %v6825_v15 }
 0x765   :  { %2503 = vmatprep.subr.bf16.mxu0 %v5921_v22 }
 0x76b   :  { %2096 = vmatmul.mubr.bf16.gmra.mrb[52].mxu1 %v5417_v54  ;;  %4165 = vmatmul.mubr.bf16.gmra.mrb[68].mxu0 %v5637_v30  ;;  %v5926_v54 = vld [vmem:[%s6756_s7] ss:$12 sps:$4 sm:$0xff]  }
 0x76c   :  { %4168 = vmatprep.mubr.bf16.mxu0 %v5702_v45  ;;  %2105 = vmatprep.mubr.bf16.mxu1 %v6825_v15 }
 0x76d   :  { %2504 = vmatpush1.bf16.msra.mxu0 %v5926_v54 }
 0x773   :  { %2106 = vmatmul.mubr.bf16.gmra.mrb[56].mxu1 %v5477_v37  ;;  %4169 = vmatmul.mubr.bf16.gmra.mrb[72].mxu0 %v5757_v3  ;;  %v5932_v37 = vld [vmem:[%s6756_s7 + $0x1c] ss:$12 sps:$4 sm:$0xff]  }
 0x774   :  { %4172 = vmatprep.mubr.bf16.mxu0 %v5827_v41  ;;  %2115 = vmatprep.mubr.bf16.mxu1 %v6825_v15 }
 0x775   :  { %2505 = vmatprep.subr.bf16.mxu0 %v5932_v37 }
 0x77b   :  { %2116 = vmatmul.mubr.bf16.gmra.mrb[60].mxu1 %v5637_v30  ;;  %v5938_v30 = vld [vmem:[%s6756_s7 + $0x18] ss:$12 sps:$4 sm:$0xff]  }
 0x77c   :  { %2125 = vmatprep.mubr.bf16.mxu1 %v6825_v15  ;;  %2506 = vmatpush1.bf16.msra.mxu0 %v5938_v30 }
 0x783   :  { %2126 = vmatmul.mubr.bf16.gmra.mrb[64].mxu1 %v5702_v45  ;;  %v5944_v45 = vld [vmem:[%s6756_s7 + $0x8] ss:$12 sps:$4 sm:$0xff]  }
 0x784   :  { %2135 = vmatprep.mubr.bf16.mxu1 %v6825_v15  ;;  %4177 = vmatpush3.bf16.msra.mxu1 %v5944_v45 }
 0x785   :  { %4178 = vmatprep.subr.bf16.mxu1 %v6824_v39 }
 0x788   :  { %4179 = vmatpush3.bf16.msra.mxu1 %v5961_v21 }
 0x789   :  { %4180 = vmatprep.subr.bf16.mxu1 %v6824_v39 }
 0x78b   :  { %2136 = vmatmul.mubr.bf16.gmra.mrb[68].mxu1 %v5757_v3  ;;  %v5950_v3 = vld [vmem:[%s6756_s7 + $0x34] ss:$12 sps:$4 sm:$0xff]  }
 0x78c   :  { %2145 = vmatprep.mubr.bf16.mxu1 %v6825_v15  ;;  %2507 = vmatprep.subr.bf16.mxu0 %v5950_v3 }
 0x78d   :  { %2508 = vmatpush1.bf16.msra.mxu0 %v5955_v50  ;;  %4181 = vmatpush3.bf16.msra.mxu1 %v5968_v34 }
 0x78e   :  { %2509 = vmatprep.subr.bf16.mxu0 %v5973_v17  ;;  %4182 = vmatprep.subr.bf16.mxu1 %v6824_v39 }
 0x791   :  { %2510 = vmatpush1.bf16.msra.mxu0 %v5979_v43  ;;  %4183 = vmatpush3.bf16.msra.mxu1 %v5999_v27 }
 0x792   :  { %2511 = vmatprep.subr.bf16.mxu0 %v5987_v36  ;;  %4184 = vmatprep.subr.bf16.mxu1 %v6824_v39 }
 0x793   :  { %2146 = vmatmul.mubr.bf16.gmra.mrb[72].mxu1 %v5827_v41  ;;  %v1744_v41 = vunpack.c.h.bf16 %v6830_v11 }
 0x794   :  { %2155 = vmatprep.mubr.bf16.mxu1 %v6825_v15 }
 0x795   :  { %2512 = vmatpush1.bf16.msra.mxu0 %v5993_v4  ;;  %4185 = vmatpush3.bf16.msra.mxu1 %v6018_v25 }
 0x796   :  { %2513 = vmatprep.subr.bf16.mxu0 %v6006_v46  ;;  %4186 = vmatprep.subr.bf16.mxu1 %v6824_v39 }
 0x799   :  { %2514 = vmatpush1.bf16.msra.mxu0 %v6012_v19  ;;  %4187 = vmatpush3.bf16.msra.mxu1 %v6050_v12 }
 0x79a   :  { %2515 = vmatprep.subr.bf16.mxu0 %v6025_v7  ;;  %4188 = vmatprep.subr.bf16.mxu1 %v6824_v39 }
 0x79d   :  { %2516 = vmatpush1.bf16.msra.mxu0 %v6031_v63  ;;  %4189 = vmatpush3.bf16.msra.mxu1 %v6060_v24 }
 0x79e   :  { %2517 = vmatprep.subr.bf16.mxu0 %v6039_v29  ;;  %4190 = vmatprep.subr.bf16.mxu1 %v6824_v39 }
 0x7a1   :  { %2518 = vmatpush1.bf16.msra.mxu0 %v6045_v52  ;;  %4191 = vmatpush3.bf16.msra.mxu1 %v6067_v31 }
 0x7a2   :  { %2633 = vmatprep.subr.bf16.mxu0 %v5921_v22  ;;  %4196 = vmatprep.subr.bf16.mxu1 %v6824_v39 }
 0x816   :  { %v1780_v0 = vpop.f32.mrb[44].mxu1  ;;  %v1823_v14 = vpop.f32.mrb[60].mxu0 }
 0x817   :  { %v1830_v28 = vadd.f32 %v1780_v0, %v1740_v6  ;;  %v1782_v26 = vpop.f32.mrb[45].mxu1  ;;  %v4142_v32 = vpop.f32.mrb[61].mxu0  ;;  %v1850_v60 = vadd.f32 %v5810_v13, %v1823_v14  ;;  %v1908_v14 = vld [vmem:[%s6757_s8] sm:$0x7] }
 0x818   :  { %v1840_v61 = vadd.f32 %v1782_v26, %v1741_v2  ;;  %v1784_v47 = vpop.f32.mrb[46].mxu1  ;;  %v1826_v40 = vpop.f32.mrb[62].mxu0 }
 0x819   :  { %v1832_v23 = vmul.f32 0.5, %v1830_v28  ;;  %v1831_v42 = vadd.f32 %v1784_v47, %v1743_v20  ;;  %v1786_v1 = vpop.f32.mrb[47].mxu1  ;;  %v4143_v44 = vpop.f32.mrb[63].mxu0  ;;  %v1851_v18 = vadd.f32 %v5810_v13, %v1826_v40  ;;  %v6832_v20 = vld [vmem:[#allocation4_spill] sm:$0xff] }
 0x81a   :  { %v1841_v48 = vadd.f32 %v1786_v1, %v1744_v41  ;;  %v1842_v49 = vmul.f32 0.5, %v1840_v61  ;;  %v6833_v61 = vsub.s32 0, %v6832_v20  ;;  %v6834_v47 = vsub.s32 1, %v6832_v20 }
 0x81b   :  { %4589 = vtanh.f32 %v1832_v23  ;;  %v1833_v8 = vmul.f32 0.5, %v1831_v42  ;;  %v6835_v41 = vsub.s32 2, %v6832_v20  ;;  %v6837_v20 = vld [vmem:[#allocation6_spill] sm:$0xff] }
 0x81c   :  { %v1843_v51 = vmul.f32 0.5, %v1841_v48  ;;  %v6084_v13 = vrot.slane %v1908_v14, %v6833_v61  ;;  %v6088_v40 = vrot.slane %v1908_v14, %v6834_v47 }
 0x81d   :  { %4591 = vtanh.f32 %v1833_v8  ;;  %v6092_v23 = vrot.slane %v1908_v14, %v6835_v41  ;;  %v6836_v14 = vld [vmem:[#allocation5_spill] sm:$0xff] }
 0x81e   :  { %4593 = vtanh.f32 %v1842_v49 }
 0x81f   :  { %4595 = vtanh.f32 %v1843_v51 }
 0x825   :  { %v4590_v53 = vpop.eup %4589 }
 0x826   :  { %v1836_v55 = vmul.f32 0.5, %v4590_v53 }
 0x827   :  { %v4592_v58 = vpop.eup %4591 }
 0x828   :  { %v1838_v59 = vadd.f32 0.5, %v1836_v55  ;;  %v1837_v62 = vmul.f32 0.5, %v4592_v58  ;;  %v4594_v33 = vpop.eup %4593 }
 0x829   :  { %v4596_v0 = vpop.eup %4595  ;;  %v1846_v2 = vmul.f32 0.5, %v4594_v33 }
 0x82a   :  { %v1852_v56 = vmul.f32 %v1850_v60, %v1838_v59  ;;  %v1839_v10 = vadd.f32 0.5, %v1837_v62  ;;  %v1847_v28 = vmul.f32 0.5, %v4596_v0 }
 0x82b   :  { %v1848_v26 = vadd.f32 0.5, %v1846_v2 }
 0x82c   :  { %v1854_v57 = vadd.f32 %v1852_v56, %v1742_v5  ;;  %v1853_v6 = vmul.f32 %v1851_v18, %v1839_v10  ;;  %v1849_v32 = vadd.f32 0.5, %v1847_v28 }
 0x82d   :  { %v1858_v44 = vsub.f32 1.0, %v1848_v26  ;;  %v1862_v51 = vmul.f32 %v1848_v26, %v5817_v9 }
 0x82e   :  { %4597 = vtanh.f32 %v1854_v57  ;;  %v1855_v11 = vadd.f32 %v1853_v6, %v1745_v35  ;;  %v1859_v53 = vsub.f32 1.0, %v1849_v32  ;;  %v1863_v35 = vmul.f32 %v1849_v32, %v5820_v38 }
 0x830   :  { %4599 = vtanh.f32 %v1855_v11 }
 0x836   :  { %v2087_v42 = vpop.f32.mrb[48].mxu1  ;;  %v4162_v1 = vpop.f32.mrb[64].mxu0 }
 0x837   :  { %v2089_v48 = vpop.f32.mrb[49].mxu1  ;;  %v2200_v8 = vpop.f32.mrb[65].mxu0  ;;  %v2088_v55 = vadd.f32 %v2087_v42, %v6084_v13  ;;  %v2209_v62 = vadd.f32 %v4162_v1, %v6092_v23 }
 0x838   :  { %v4598_v49 = vpop.eup %4597  ;;  %v2090_v58 = vadd.f32 %v2089_v48, %v6088_v40  ;;  %v2091_v59 = vpop.f32.mrb[50].mxu1  ;;  %v2201_v9 = vadd.f32 %v2200_v8, %v6092_v23 }
 0x839   :  { %v4163_v60 = vpop.f32.mrb[66].mxu0  ;;  %v2092_v16 = vadd.f32 %v2091_v59, %v6084_v13  ;;  %v2093_v56 = vpop.f32.mrb[51].mxu1  ;;  %v1860_v18 = vmul.f32 %v4598_v49, %v1858_v44 }
 0x83a   :  { %v2212_v5 = vadd.f32 %v4163_v60, %v6092_v23  ;;  %v2203_v10 = vpop.f32.mrb[67].mxu0  ;;  %v4600_v33 = vpop.eup %4599  ;;  %v2094_v57 = vadd.f32 %v2093_v56, %v6088_v40  ;;  %v2279_v26 = vadd.f32 %v2090_v58, %v6836_v14 }
 0x83b   :  { %v2204_v6 = vadd.f32 %v2203_v10, %v6092_v23  ;;  %v6104_v0 = vpack.c.bf16 %v2092_v16, %v2088_v55  ;;  %v1861_v2 = vmul.f32 %v4600_v33, %v1859_v53  ;;  %v1864_v28 = vadd.f32 %v1862_v51, %v1860_v18  ;;  %v6838_v33 = vld [vmem:[#allocation7_spill] sm:$0xff] }
 0x83c   :  { %v6106_v11 = vpack.c.bf16 %v2212_v5, %v2209_v62  ;;  %v2280_v61 = vadd.f32 %v2094_v57, %v6837_v20 }
 0x83d   :  { %v6110_v47 = vpack.c.bf16 %v2204_v6, %v2201_v9  ;;  %v1865_v41 = vadd.f32 %v1863_v35, %v1861_v2  ;;  %v6839_v9 = vld [vmem:[#allocation8_spill] sm:$0xff] }
 0x83e   :  { %v2097_v38 = vpop.f32.mrb[52].mxu1  ;;  %v4166_v32 = vpop.f32.mrb[68].mxu0  ;;  %v6112_v42 = vpack.c.bf16 %v2280_v61, %v2279_v26 }
 0x83f   :  { %v2099_v1 = vpop.f32.mrb[53].mxu1  ;;  %v2216_v44 = vpop.f32.mrb[69].mxu0  ;;  %v1866_v48 = vpack.c.bf16 %v1865_v41, %v1864_v28  ;;  %v2098_v8 = vadd.f32 %v2097_v38, %v6084_v13  ;;  %v2225_v55 = vadd.f32 %v4166_v32, %v6092_v23 }
 0x840   :  { %v2100_v49 = vadd.f32 %v2099_v1, %v6088_v40  ;;  %v2101_v53 = vpop.f32.mrb[54].mxu1  ;;  %v4167_v51 = vpop.f32.mrb[70].mxu0  ;;  %v2217_v16 = vadd.f32 %v2216_v44, %v6092_v23 }
 0x841   :  { %v2102_v58 = vadd.f32 %v2101_v53, %v6084_v13  ;;  %v2228_v59 = vadd.f32 %v4167_v51, %v6092_v23  ;;  %v2103_v60 = vpop.f32.mrb[55].mxu1  ;;  %v2219_v62 = vpop.f32.mrb[71].mxu0  ;;  %2156 = vmatmul.mubr.bf16.gmra.mrb[76].mxu1 %v1866_v48  ;;  %4173 = vmatmul.mubr.bf16.gmra.mrb[76].mxu0 %v1866_v48 }
 0x842   :  { %v2104_v5 = vadd.f32 %v2103_v60, %v6088_v40  ;;  %v2220_v56 = vadd.f32 %v2219_v62, %v6092_v23  ;;  %2535 = vmatprep.mubr.bf16.mxu0 %v6825_v15  ;;  %4192 = vmatprep.mubr.msk.bf16.mxu1 %vm4749_vm0, %v6824_v39  ;;  %v2281_v35 = vadd.f32 %v2100_v49, %v6838_v33  ;;  %v6841_v60 = vld [vmem:[#allocation9_spill] sm:$0xff] }
 0x843   :  { %v6125_v10 = vpack.c.bf16 %v2102_v58, %v2098_v8  ;;  %v6127_v18 = vpack.c.bf16 %v2228_v59, %v2225_v55 }
 0x844   :  { %v2282_v57 = vadd.f32 %v2104_v5, %v6839_v9  ;;  %v6131_v6 = vpack.c.bf16 %v2220_v56, %v2217_v16  ;;  %v6842_v16 = vld [vmem:[#allocation10_spill] sm:$0xff] }
 0x846   :  { %v2107_v2 = vpop.f32.mrb[56].mxu1  ;;  %v4170_v28 = vpop.f32.mrb[72].mxu0  ;;  %v6133_v14 = vpack.c.bf16 %v2282_v57, %v2281_v35 }
 0x847   :  { %v2109_v26 = vpop.f32.mrb[57].mxu1  ;;  %v2232_v20 = vpop.f32.mrb[73].mxu0  ;;  %v2108_v61 = vadd.f32 %v2107_v2, %v6084_v13  ;;  %v2241_v1 = vadd.f32 %v4170_v28, %v6092_v23 }
 0x848   :  { %v2110_v41 = vadd.f32 %v2109_v26, %v6088_v40  ;;  %v2111_v38 = vpop.f32.mrb[58].mxu1  ;;  %v4171_v32 = vpop.f32.mrb[74].mxu0  ;;  %v2233_v53 = vadd.f32 %v2232_v20, %v6092_v23 }
 0x849   :  { %v2112_v44 = vadd.f32 %v2111_v38, %v6084_v13  ;;  %v2244_v48 = vadd.f32 %v4171_v32, %v6092_v23  ;;  %v2113_v8 = vpop.f32.mrb[59].mxu1  ;;  %v2235_v49 = vpop.f32.mrb[75].mxu0  ;;  %2536 = vmatmul.mubr.bf16.vlgmr.msra.gmra.mrb[80].mxu0 %v6825_v15  ;;  %4193 = vmatmul.mubr.bf16.vlgmr.msra.gmra.mrb[80].mxu1 %v6825_v15  ;;  %v6844_v38 = vld [vmem:[#allocation11_spill] sm:$0xff] }
 0x84a   :  { %v2114_v51 = vadd.f32 %v2113_v8, %v6088_v40  ;;  %v2236_v55 = vadd.f32 %v2235_v49, %v6092_v23  ;;  %2634 = vmatpush1.bf16.msra.mxu0 %v5926_v54  ;;  %4197 = vmatpush3.bf16.msra.mxu1 %v5944_v45  ;;  %v2283_v62 = vadd.f32 %v2110_v41, %v6841_v60 }
 0x84b   :  { %v6147_v58 = vpack.c.bf16 %v2112_v44, %v2108_v61  ;;  %v6149_v59 = vpack.c.bf16 %v2244_v48, %v2241_v1  ;;  %2635 = vmatprep.subr.bf16.mxu0 %v5932_v37  ;;  %4198 = vmatprep.subr.bf16.mxu1 %v6824_v39  ;;  %v6845_v1 = vld [vmem:[#allocation12_spill] sm:$0xff] }
 0x84c   :  { %v2284_v5 = vadd.f32 %v2114_v51, %v6842_v16  ;;  %v6155_v56 = vpack.c.bf16 %v2236_v55, %v2233_v53  ;;  %2665 = vmatprep.mubr.bf16.mxu0 %v6825_v15  ;;  %4212 = vmatprep.mubr.msk.bf16.mxu1 %vm4749_vm0, %v6824_v39 }
 0x84d   :  { %6840 = vst [vmem:[#allocation21_spill] sm:$0xff] %v6149_v59 }
 0x84e   :  { %6843 = vst [vmem:[#allocation22_spill] sm:$0xff] %v6155_v56  ;;  %v2117_v33 = vpop.f32.mrb[60].mxu1  ;;  %2636 = vmatpush1.bf16.msra.mxu0 %v5938_v30  ;;  %4199 = vmatpush3.bf16.msra.mxu1 %v5961_v21  ;;  %v6162_v35 = vpack.c.bf16 %v2284_v5, %v2283_v62 }
 0x84f   :  { %v2119_v9 = vpop.f32.mrb[61].mxu1  ;;  %2637 = vmatprep.subr.bf16.mxu0 %v5950_v3  ;;  %4200 = vmatprep.subr.bf16.mxu1 %v6824_v39  ;;  %v2118_v28 = vadd.f32 %v2117_v33, %v6084_v13  ;;  %v6846_v33 = vld [vmem:[#allocation15_spill] sm:$0xff] }
 0x850   :  { %v2120_v57 = vadd.f32 %v2119_v9, %v6088_v40  ;;  %v2121_v2 = vpop.f32.mrb[62].mxu1 }
 0x851   :  { %v2122_v26 = vadd.f32 %v2121_v2, %v6084_v13  ;;  %v2123_v20 = vpop.f32.mrb[63].mxu1 }
 0x852   :  { %v2124_v61 = vadd.f32 %v2123_v20, %v6088_v40  ;;  %2638 = vmatpush1.bf16.msra.mxu0 %v5955_v50  ;;  %4201 = vmatpush3.bf16.msra.mxu1 %v5968_v34  ;;  %v2285_v32 = vadd.f32 %v2120_v57, %v6844_v38  ;;  %v6847_v57 = vld [vmem:[#allocation16_spill] sm:$0xff] }
 0x853   :  { %v6172_v41 = vpack.c.bf16 %v2122_v26, %v2118_v28  ;;  %2639 = vmatprep.subr.bf16.mxu0 %v5973_v17  ;;  %4202 = vmatprep.subr.bf16.mxu1 %v6824_v39 }
 0x854   :  { %v2286_v44 = vadd.f32 %v2124_v61, %v6845_v1 }
 0x856   :  { %v2127_v48 = vpop.f32.mrb[64].mxu1  ;;  %2640 = vmatpush1.bf16.msra.mxu0 %v5979_v43  ;;  %4203 = vmatpush3.bf16.msra.mxu1 %v5999_v27  ;;  %v6180_v8 = vpack.c.bf16 %v2286_v44, %v2285_v32 }
 0x857   :  { %v2129_v49 = vpop.f32.mrb[65].mxu1  ;;  %2641 = vmatprep.subr.bf16.mxu0 %v5987_v36  ;;  %4204 = vmatprep.subr.bf16.mxu1 %v6824_v39  ;;  %v2128_v55 = vadd.f32 %v2127_v48, %v6084_v13 }
 0x858   :  { %v2130_v53 = vadd.f32 %v2129_v49, %v6088_v40  ;;  %v2131_v51 = vpop.f32.mrb[66].mxu1 }
 0x859   :  { %v2132_v60 = vadd.f32 %v2131_v51, %v6084_v13  ;;  %v2133_v62 = vpop.f32.mrb[67].mxu1 }
 0x85a   :  { %v2134_v16 = vadd.f32 %v2133_v62, %v6088_v40  ;;  %2642 = vmatpush1.bf16.msra.mxu0 %v5993_v4  ;;  %4205 = vmatpush3.bf16.msra.mxu1 %v6018_v25  ;;  %v2287_v9 = vadd.f32 %v2130_v53, %v6846_v33  ;;  %v6849_v53 = vld [vmem:[#allocation17_spill] sm:$0xff] }
 0x85b   :  { %v6190_v5 = vpack.c.bf16 %v2132_v60, %v2128_v55  ;;  %2643 = vmatprep.subr.bf16.mxu0 %v6006_v46  ;;  %4206 = vmatprep.subr.bf16.mxu1 %v6824_v39  ;;  %v6850_v55 = vld [vmem:[#allocation18_spill] sm:$0xff] }
 0x85c   :  { %v2288_v2 = vadd.f32 %v2134_v16, %v6847_v57 }
 0x85e   :  { %v2137_v28 = vpop.f32.mrb[68].mxu1  ;;  %2644 = vmatpush1.bf16.msra.mxu0 %v6012_v19  ;;  %4207 = vmatpush3.bf16.msra.mxu1 %v6050_v12  ;;  %v6198_v26 = vpack.c.bf16 %v2288_v2, %v2287_v9 }
 0x85f   :  { %v2139_v20 = vpop.f32.mrb[69].mxu1  ;;  %2645 = vmatprep.subr.bf16.mxu0 %v6025_v7  ;;  %4208 = vmatprep.subr.bf16.mxu1 %v6824_v39  ;;  %v2138_v32 = vadd.f32 %v2137_v28, %v6084_v13 }
 0x860   :  { %v2140_v61 = vadd.f32 %v2139_v20, %v6088_v40  ;;  %v2141_v38 = vpop.f32.mrb[70].mxu1 }
 0x861   :  { %v2142_v1 = vadd.f32 %v2141_v38, %v6084_v13  ;;  %v2143_v44 = vpop.f32.mrb[71].mxu1 }
 0x862   :  { %v2144_v48 = vadd.f32 %v2143_v44, %v6088_v40  ;;  %2646 = vmatpush1.bf16.msra.mxu0 %v6031_v63  ;;  %4209 = vmatpush3.bf16.msra.mxu1 %v6060_v24  ;;  %v2289_v51 = vadd.f32 %v2140_v61, %v6849_v53  ;;  %v6854_v44 = vld [vmem:[#allocation19_spill] sm:$0xff] }
 0x863   :  { %v6208_v49 = vpack.c.bf16 %v2142_v1, %v2138_v32  ;;  %2647 = vmatprep.subr.bf16.mxu0 %v6039_v29  ;;  %4210 = vmatprep.subr.bf16.mxu1 %v6824_v39  ;;  %v6853_v32 = vld [vmem:[#allocation20_spill] sm:$0xff] }
 0x864   :  { %v2290_v60 = vadd.f32 %v2144_v48, %v6850_v55 }
 0x865   :  { %6848 = vst [vmem:[#allocation14_spill] sm:$0xff] %v6208_v49 }
 0x866   :  { %v2147_v62 = vpop.f32.mrb[72].mxu1  ;;  %2648 = vmatpush1.bf16.msra.mxu0 %v6045_v52  ;;  %4211 = vmatpush3.bf16.msra.mxu1 %v6067_v31  ;;  %v6216_v16 = vpack.c.bf16 %v2290_v60, %v2289_v51 }
 0x867   :  { %v2149_v33 = vpop.f32.mrb[73].mxu1  ;;  %2763 = vmatprep.subr.bf16.mxu0 %v5921_v22  ;;  %4216 = vmatprep.subr.bf16.mxu1 %v6824_v39  ;;  %v2148_v2 = vadd.f32 %v2147_v62, %v6084_v13 }
 0x868   :  { %6851 = vst [vmem:[#allocation25_spill] sm:$0xff] %v6216_v16  ;;  %v2150_v9 = vadd.f32 %v2149_v33, %v6088_v40  ;;  %v2151_v57 = vpop.f32.mrb[74].mxu1 }
 0x869   :  { %v2152_v28 = vadd.f32 %v2151_v57, %v6084_v13  ;;  %v2153_v20 = vpop.f32.mrb[75].mxu1 }
 0x86a   :  { %v2154_v61 = vadd.f32 %v2153_v20, %v6088_v40  ;;  %v2291_v1 = vadd.f32 %v2150_v9, %v6853_v32 }
 0x86b   :  { %v6224_v38 = vpack.c.bf16 %v2152_v28, %v2148_v2 }
 0x86c   :  { %v2292_v48 = vadd.f32 %v2154_v61, %v6854_v44 }
 0x86d   :  { %6852 = vst [vmem:[#allocation26_spill] sm:$0xff] %v6224_v38  ;;  %v6858_v38 = vld [vmem:[#allocation23_spill] sm:$0xff] }
 0x86e   :  { %v6228_v53 = vpack.c.bf16 %v2292_v48, %v2291_v1 }
 0x870   :  { %6855 = vst [vmem:[#allocation13_spill] sm:$0xff] %v6228_v53  ;;  %v6857_v53 = vld [vmem:[#allocation24_spill] sm:$0xff] }
 0x914   :  { %v2157_v51 = vpop.f32.mrb[76].mxu1  ;;  %v4174_v55 = vpop.f32.mrb[76].mxu0 }
 0x915   :  { %v2159_v60 = vpop.f32.mrb[77].mxu1  ;;  %v2248_v33 = vpop.f32.mrb[77].mxu0  ;;  %v2158_v57 = vadd.f32 %v2157_v51, %v6084_v13  ;;  %v2257_v20 = vadd.f32 %v4174_v55, %v6092_v23 }
 0x916   :  { %v2160_v59 = vadd.f32 %v2159_v60, %v6088_v40  ;;  %v2161_v62 = vpop.f32.mrb[78].mxu1  ;;  %v4175_v16 = vpop.f32.mrb[78].mxu0  ;;  %v2249_v32 = vadd.f32 %v2248_v33, %v6092_v23 }
 0x917   :  { %v2162_v2 = vadd.f32 %v2161_v62, %v6084_v13  ;;  %v2260_v9 = vadd.f32 %v4175_v16, %v6092_v23  ;;  %v2163_v28 = vpop.f32.mrb[79].mxu1  ;;  %v2251_v61 = vpop.f32.mrb[79].mxu0  ;;  %v2369_v13 = vunpack.c.l.bf16 %v6104_v0  ;;  %v2370_v62 = vunpack.c.l.bf16 %v6112_v42 }
 0x918   :  { %v2164_v1 = vadd.f32 %v2163_v28, %v6088_v40  ;;  %v2252_v44 = vadd.f32 %v2251_v61, %v6092_v23  ;;  %v2293_v51 = vadd.f32 %v2160_v59, %v6857_v53  ;;  %v2373_v59 = vunpack.c.h.bf16 %v6112_v42 }
 0x919   :  { %v6238_v48 = vpack.c.bf16 %v2162_v2, %v2158_v57  ;;  %v6240_v60 = vpack.c.bf16 %v2260_v9, %v2257_v20  ;;  %v2372_v57 = vunpack.c.h.bf16 %v6104_v0  ;;  %v6255_v0 = vld [vmem:[%s6758_s9] ss:$0 sm:$0xff] }
 0x91a   :  { %v2294_v55 = vadd.f32 %v2164_v1, %v6858_v38  ;;  %v6244_v49 = vpack.c.bf16 %v2252_v44, %v2249_v32 }
 0x91b   :  { %6856 = vst [vmem:[#allocation4_spill] sm:$0xff] %v6240_v60 }
 0x91c   :  { %v2537_v16 = vpop.f32.mrb[80].mxu0  ;;  %v2580_v33 = vpop.f32.mrb[80].mxu1  ;;  %v6248_v56 = vpack.c.bf16 %v2294_v55, %v2293_v51 }
 0x91d   :  { %v2587_v40 = vadd.f32 %v2537_v16, %v2369_v13  ;;  %v2539_v23 = vpop.f32.mrb[81].mxu0  ;;  %v4194_v20 = vpop.f32.mrb[81].mxu1  ;;  %v2607_v16 = vadd.f32 %v6255_v0, %v2580_v33 }
 0x91e   :  { %6859 = vst [vmem:[#allocation5_spill] sm:$0xff] %v6248_v56  ;;  %v2597_v2 = vadd.f32 %v2539_v23, %v2370_v62  ;;  %v2541_v9 = vpop.f32.mrb[82].mxu0  ;;  %v2583_v38 = vpop.f32.mrb[82].mxu1 }
 0x91f   :  { %v2589_v53 = vmul.f32 0.5, %v2587_v40  ;;  %v2588_v28 = vadd.f32 %v2541_v9, %v2372_v57  ;;  %v2543_v61 = vpop.f32.mrb[83].mxu0  ;;  %v4195_v32 = vpop.f32.mrb[83].mxu1  ;;  %v2371_v57 = vunpack.c.l.bf16 %v6110_v47 }
 0x920   :  { %v2598_v1 = vadd.f32 %v2543_v61, %v2373_v59  ;;  %v2599_v51 = vmul.f32 0.5, %v2597_v2  ;;  %v2608_v2 = vadd.f32 %v6255_v0, %v2583_v38 }
 0x921   :  { %4601 = vtanh.f32 %v2589_v53  ;;  %v2590_v44 = vmul.f32 0.5, %v2588_v28  ;;  %v2374_v53 = vunpack.c.h.bf16 %v6110_v47 }
 0x922   :  { %v2600_v55 = vmul.f32 0.5, %v2598_v1 }
 0x923   :  { %4603 = vtanh.f32 %v2590_v44 }
 0x924   :  { %4605 = vtanh.f32 %v2599_v51 }
 0x925   :  { %4607 = vtanh.f32 %v2600_v55 }
 0x92b   :  { %v4602_v13 = vpop.eup %4601 }
 0x92c   :  { %v2593_v42 = vmul.f32 0.5, %v4602_v13 }
 0x92d   :  { %v4604_v62 = vpop.eup %4603 }
 0x92e   :  { %v2594_v40 = vmul.f32 0.5, %v4604_v62  ;;  %v2595_v23 = vadd.f32 0.5, %v2593_v42  ;;  %v4606_v59 = vpop.eup %4605 }
 0x92f   :  { %v4608_v32 = vpop.eup %4607  ;;  %v2603_v44 = vmul.f32 0.5, %v4606_v59 }
 0x930   :  { %v2609_v20 = vmul.f32 %v2607_v16, %v2595_v23  ;;  %v2596_v9 = vadd.f32 0.5, %v2594_v40  ;;  %v2604_v33 = vmul.f32 0.5, %v4608_v32 }
 0x931   :  { %v2605_v51 = vadd.f32 0.5, %v2603_v44 }
 0x932   :  { %v2611_v28 = vadd.f32 %v2609_v20, %v2371_v57  ;;  %v2610_v61 = vmul.f32 %v2608_v2, %v2596_v9  ;;  %v2606_v55 = vadd.f32 0.5, %v2604_v33  ;;  %v2627_v2 = vunpack.c.l.bf16 %v6133_v14 }
 0x933   :  { %v2615_v13 = vsub.f32 1.0, %v2605_v51  ;;  %v2619_v62 = vmul.f32 0.0, %v2605_v51  ;;  %v2630_v33 = vunpack.c.h.bf16 %v6133_v14  ;;  %v2628_v14 = vunpack.c.l.bf16 %v6106_v11 }
 0x934   :  { %4609 = vtanh.f32 %v2611_v28  ;;  %v2612_v1 = vadd.f32 %v2610_v61, %v2374_v53  ;;  %v2616_v16 = vsub.f32 1.0, %v2606_v55  ;;  %v2620_v38 = vmul.f32 0.0, %v2606_v55 }
 0x935   :  { %v2629_v61 = vunpack.c.h.bf16 %v6125_v10 }
 0x936   :  { %4611 = vtanh.f32 %v2612_v1 }
 0x93e   :  { %v4610_v42 = vpop.eup %4609 }
 0x93f   :  { %v2617_v40 = vmul.f32 %v4610_v42, %v2615_v13 }
 0x940   :  { %v4612_v23 = vpop.eup %4611 }
 0x941   :  { %v2618_v60 = vmul.f32 %v4612_v23, %v2616_v16  ;;  %v6261_v56 = vadd.f32 %v2619_v62, %v2617_v40 }
 0x943   :  { %v6263_v47 = vadd.f32 %v2620_v38, %v2618_v60  ;;  %v2626_v60 = vunpack.c.l.bf16 %v6125_v10 }
 0x945   :  { %v2632_v57 = vpack.c.bf16 %v6263_v47, %v6261_v56 }
 0x947   :  { %2666 = vmatmul.mubr.bf16.vlgmr.msra.gmra.mrb[84].mxu0 %v2632_v57  ;;  %4213 = vmatmul.mubr.bf16.vlgmr.msra.gmra.mrb[84].mxu1 %v2632_v57 }
 0x948   :  { %2764 = vmatpush1.bf16.msra.mxu0 %v5926_v54  ;;  %4217 = vmatpush3.bf16.msra.mxu1 %v5944_v45 }
 0x949   :  { %2765 = vmatprep.subr.bf16.mxu0 %v5932_v37  ;;  %4218 = vmatprep.subr.bf16.mxu1 %v6824_v39 }
 0x94a   :  { %2795 = vmatprep.mubr.bf16.mxu0 %v6825_v15  ;;  %4232 = vmatprep.mubr.msk.bf16.mxu1 %vm4749_vm0, %v6824_v39 }
 0x94c   :  { %2766 = vmatpush1.bf16.msra.mxu0 %v5938_v30  ;;  %4219 = vmatpush3.bf16.msra.mxu1 %v5961_v21 }
 0x94d   :  { %2767 = vmatprep.subr.bf16.mxu0 %v5950_v3  ;;  %4220 = vmatprep.subr.bf16.mxu1 %v6824_v39 }
 0x950   :  { %2768 = vmatpush1.bf16.msra.mxu0 %v5955_v50  ;;  %4221 = vmatpush3.bf16.msra.mxu1 %v5968_v34 }
 0x951   :  { %2769 = vmatprep.subr.bf16.mxu0 %v5973_v17  ;;  %4222 = vmatprep.subr.bf16.mxu1 %v6824_v39 }
 0x954   :  { %2770 = vmatpush1.bf16.msra.mxu0 %v5979_v43  ;;  %4223 = vmatpush3.bf16.msra.mxu1 %v5999_v27 }
 0x955   :  { %2771 = vmatprep.subr.bf16.mxu0 %v5987_v36  ;;  %4224 = vmatprep.subr.bf16.mxu1 %v6824_v39 }
 0x958   :  { %2772 = vmatpush1.bf16.msra.mxu0 %v5993_v4  ;;  %4225 = vmatpush3.bf16.msra.mxu1 %v6018_v25 }
 0x959   :  { %2773 = vmatprep.subr.bf16.mxu0 %v6006_v46  ;;  %4226 = vmatprep.subr.bf16.mxu1 %v6824_v39 }
 0x95c   :  { %2774 = vmatpush1.bf16.msra.mxu0 %v6012_v19  ;;  %4227 = vmatpush3.bf16.msra.mxu1 %v6050_v12 }
 0x95d   :  { %2775 = vmatprep.subr.bf16.mxu0 %v6025_v7  ;;  %4228 = vmatprep.subr.bf16.mxu1 %v6824_v39 }
 0x960   :  { %2776 = vmatpush1.bf16.msra.mxu0 %v6031_v63  ;;  %4229 = vmatpush3.bf16.msra.mxu1 %v6060_v24 }
 0x961   :  { %2777 = vmatprep.subr.bf16.mxu0 %v6039_v29  ;;  %4230 = vmatprep.subr.bf16.mxu1 %v6824_v39 }
 0x964   :  { %2778 = vmatpush1.bf16.msra.mxu0 %v6045_v52  ;;  %4231 = vmatpush3.bf16.msra.mxu1 %v6067_v31 }
 0x965   :  { %2893 = vmatprep.subr.bf16.mxu0 %v5921_v22  ;;  %4236 = vmatprep.subr.bf16.mxu1 %v6824_v39 }
 0xa1a   :  { %v2667_v20 = vpop.f32.mrb[84].mxu0  ;;  %v2710_v9 = vpop.f32.mrb[84].mxu1 }
 0xa1b   :  { %v2717_v59 = vadd.f32 %v2667_v20, %v2626_v60  ;;  %v2669_v53 = vpop.f32.mrb[85].mxu0  ;;  %v4214_v28 = vpop.f32.mrb[85].mxu1  ;;  %v2737_v20 = vadd.f32 %v6255_v0, %v2710_v9 }
 0xa1c   :  { %v2727_v32 = vadd.f32 %v2669_v53, %v2627_v2  ;;  %v2671_v1 = vpop.f32.mrb[86].mxu0  ;;  %v2713_v44 = vpop.f32.mrb[86].mxu1 }
 0xa1d   :  { %v2719_v51 = vmul.f32 0.5, %v2717_v59  ;;  %v2718_v55 = vadd.f32 %v2671_v1, %v2629_v61  ;;  %v2673_v13 = vpop.f32.mrb[87].mxu0  ;;  %v4215_v42 = vpop.f32.mrb[87].mxu1  ;;  %v2738_v28 = vadd.f32 %v6255_v0, %v2713_v44  ;;  %v2631_v1 = vunpack.c.h.bf16 %v6106_v11 }
 0xa1e   :  { %v2728_v62 = vadd.f32 %v2673_v13, %v2630_v33  ;;  %v2729_v40 = vmul.f32 0.5, %v2727_v32 }
 0xa1f   :  { %4613 = vtanh.f32 %v2719_v51  ;;  %v2720_v16 = vmul.f32 0.5, %v2718_v55 }
 0xa20   :  { %v2730_v23 = vmul.f32 0.5, %v2728_v62 }
 0xa21   :  { %4615 = vtanh.f32 %v2720_v16 }
 0xa22   :  { %4617 = vtanh.f32 %v2729_v40 }
 0xa23   :  { %4619 = vtanh.f32 %v2730_v23 }
 0xa29   :  { %v4614_v38 = vpop.eup %4613 }
 0xa2a   :  { %v2723_v57 = vmul.f32 0.5, %v4614_v38 }
 0xa2b   :  { %v4616_v10 = vpop.eup %4615 }
 0xa2c   :  { %v2725_v60 = vadd.f32 0.5, %v2723_v57  ;;  %v2724_v2 = vmul.f32 0.5, %v4616_v10  ;;  %v4618_v61 = vpop.eup %4617 }
 0xa2d   :  { %v4620_v51 = vpop.eup %4619  ;;  %v2733_v13 = vmul.f32 0.5, %v4618_v61 }
 0xa2e   :  { %v2739_v59 = vmul.f32 %v2737_v20, %v2725_v60  ;;  %v2726_v53 = vadd.f32 0.5, %v2724_v2  ;;  %v2734_v42 = vmul.f32 0.5, %v4620_v51 }
 0xa2f   :  { %v2735_v62 = vadd.f32 0.5, %v2733_v13 }
 0xa30   :  { %v2741_v32 = vadd.f32 %v2739_v59, %v2628_v14  ;;  %v2740_v33 = vmul.f32 %v2738_v28, %v2726_v53  ;;  %v2736_v9 = vadd.f32 0.5, %v2734_v42  ;;  %v2761_v28 = vunpack.c.h.bf16 %v6131_v6 }
 0xa31   :  { %v2745_v16 = vsub.f32 1.0, %v2735_v62  ;;  %v2749_v38 = vmul.f32 %v2735_v62, %v6261_v56 }
 0xa32   :  { %4621 = vtanh.f32 %v2741_v32  ;;  %v2742_v55 = vadd.f32 %v2740_v33, %v2631_v1  ;;  %v2746_v57 = vsub.f32 1.0, %v2736_v9  ;;  %v2750_v60 = vmul.f32 %v2736_v9, %v6263_v47 }
 0xa34   :  { %4623 = vtanh.f32 %v2742_v55 }
 0xa3c   :  { %v4622_v40 = vpop.eup %4621 }
 0xa3d   :  { %v2747_v23 = vmul.f32 %v4622_v40, %v2745_v16 }
 0xa3e   :  { %v4624_v44 = vpop.eup %4623 }
 0xa3f   :  { %v6311_v10 = vadd.f32 %v2749_v38, %v2747_v23  ;;  %v2748_v11 = vmul.f32 %v4624_v44, %v2746_v57 }
 0xa41   :  { %v6314_v20 = vadd.f32 %v2750_v60, %v2748_v11 }
 0xa43   :  { %v2762_v2 = vpack.c.bf16 %v6314_v20, %v6311_v10 }
 0xa45   :  { %2796 = vmatmul.mubr.bf16.vlgmr.msra.gmra.mrb[88].mxu0 %v2762_v2  ;;  %4233 = vmatmul.mubr.bf16.vlgmr.msra.gmra.mrb[88].mxu1 %v2762_v2  ;;  %v6372_v2 = vld [vmem:[%s6756_s7] ss:$12 sps:$4 sm:$0xff]  }
 0xa46   :  { %2894 = vmatpush1.bf16.msra.mxu0 %v5926_v54  ;;  %4237 = vmatpush3.bf16.msra.mxu1 %v5944_v45  ;;  %v2756_v54 = vunpack.c.l.bf16 %v6147_v58  ;;  %v2757_v45 = vunpack.c.l.bf16 %v6162_v35 }
 0xa47   :  { %2895 = vmatprep.subr.bf16.mxu0 %v5932_v37  ;;  %4238 = vmatprep.subr.bf16.mxu1 %v6824_v39 }
 0xa48   :  { %2925 = vmatprep.mubr.bf16.mxu0 %v6825_v15  ;;  %4252 = vmatprep.mubr.msk.bf16.mxu1 %vm4749_vm0, %v6824_v39 }
 0xa4a   :  { %2896 = vmatpush1.bf16.msra.mxu0 %v5938_v30  ;;  %4239 = vmatpush3.bf16.msra.mxu1 %v5961_v21 }
 0xa4b   :  { %2897 = vmatprep.subr.bf16.mxu0 %v5950_v3  ;;  %4240 = vmatprep.subr.bf16.mxu1 %v6824_v39 }
 0xa4e   :  { %2898 = vmatpush1.bf16.msra.mxu0 %v5955_v50  ;;  %4241 = vmatpush3.bf16.msra.mxu1 %v5968_v34  ;;  %v2759_v34 = vunpack.c.h.bf16 %v6147_v58 }
 0xa4f   :  { %2899 = vmatprep.subr.bf16.mxu0 %v5973_v17  ;;  %4242 = vmatprep.subr.bf16.mxu1 %v6824_v39 }
 0xa52   :  { %2900 = vmatpush1.bf16.msra.mxu0 %v5979_v43  ;;  %4243 = vmatpush3.bf16.msra.mxu1 %v5999_v27 }
 0xa53   :  { %2901 = vmatprep.subr.bf16.mxu0 %v5987_v36  ;;  %4244 = vmatprep.subr.bf16.mxu1 %v6824_v39 }
 0xa56   :  { %2902 = vmatpush1.bf16.msra.mxu0 %v5993_v4  ;;  %4245 = vmatpush3.bf16.msra.mxu1 %v6018_v25  ;;  %v2760_v4 = vunpack.c.h.bf16 %v6162_v35  ;;  %v2758_v35 = vunpack.c.l.bf16 %v6131_v6 }
 0xa57   :  { %2903 = vmatprep.subr.bf16.mxu0 %v6006_v46  ;;  %4246 = vmatprep.subr.bf16.mxu1 %v6824_v39 }
 0xa5a   :  { %2904 = vmatpush1.bf16.msra.mxu0 %v6012_v19  ;;  %4247 = vmatpush3.bf16.msra.mxu1 %v6050_v12 }
 0xa5b   :  { %2905 = vmatprep.subr.bf16.mxu0 %v6025_v7  ;;  %4248 = vmatprep.subr.bf16.mxu1 %v6824_v39 }
 0xa5e   :  { %2906 = vmatpush1.bf16.msra.mxu0 %v6031_v63  ;;  %4249 = vmatpush3.bf16.msra.mxu1 %v6060_v24 }
 0xa5f   :  { %2907 = vmatprep.subr.bf16.mxu0 %v6039_v29  ;;  %4250 = vmatprep.subr.bf16.mxu1 %v6824_v39 }
 0xa62   :  { %2908 = vmatpush1.bf16.msra.mxu0 %v6045_v52  ;;  %4251 = vmatpush3.bf16.msra.mxu1 %v6067_v31 }
 0xa63   :  { %3023 = vmatprep.subr.bf16.mxu0 %v5921_v22  ;;  %4256 = vmatprep.subr.bf16.mxu1 %v6824_v39 }
 0xb18   :  { %v2797_v37 = vpop.f32.mrb[88].mxu0  ;;  %v2840_v30 = vpop.f32.mrb[88].mxu1 }
 0xb19   :  { %v2847_v3 = vadd.f32 %v2797_v37, %v2756_v54  ;;  %v2799_v50 = vpop.f32.mrb[89].mxu0  ;;  %v4234_v21 = vpop.f32.mrb[89].mxu1  ;;  %v2867_v58 = vadd.f32 %v6255_v0, %v2840_v30  ;;  %v6394_v54 = vld [vmem:[%s6756_s7 + $0x18] ss:$12 sps:$4 sm:$0xff]   ;;  %v6400_v37 = vld [vmem:[%s6756_s7 + $0x20] ss:$12 sps:$4 sm:$0xff]  }
 0xb1a   :  { %v2857_v17 = vadd.f32 %v2799_v50, %v2757_v45  ;;  %v2801_v43 = vpop.f32.mrb[90].mxu0  ;;  %v2843_v36 = vpop.f32.mrb[90].mxu1  ;;  %v6406_v30 = vld [vmem:[%s6756_s7 + $0x34] ss:$12 sps:$4 sm:$0xff]   ;;  %v6413_v45 = vld [vmem:[%s6756_s7 + $0x30] ss:$12 sps:$4 sm:$0xff]  }
 0xb1b   :  { %v2849_v27 = vmul.f32 0.5, %v2847_v3  ;;  %v2848_v22 = vadd.f32 %v2801_v43, %v2759_v34  ;;  %v2803_v46 = vpop.f32.mrb[91].mxu0  ;;  %v4235_v19 = vpop.f32.mrb[91].mxu1  ;;  %v2868_v59 = vadd.f32 %v6255_v0, %v2843_v36  ;;  %v6419_v3 = vld [vmem:[%s6756_s7 + $0x38] ss:$12 sps:$4 sm:$0xff]  }
 0xb1c   :  { %v2858_v25 = vadd.f32 %v2803_v46, %v2760_v4  ;;  %v2859_v63 = vmul.f32 0.5, %v2857_v17  ;;  %v6425_v50 = vld [vmem:[%s6756_s7 + $0x4c] ss:$12 sps:$4 sm:$0xff]   ;;  %v6432_v21 = vld [vmem:[%s6756_s7 + $0x48] ss:$12 sps:$4 sm:$0xff]  }
 0xb1d   :  { %4625 = vtanh.f32 %v2849_v27  ;;  %v2850_v7 = vmul.f32 0.5, %v2848_v22  ;;  %v6438_v34 = vld [vmem:[%s6756_s7 + $0x50] ss:$12 sps:$4 sm:$0xff]   ;;  %v6451_v43 = vld [vmem:[%s6756_s7 + $0x60] ss:$12 sps:$4 sm:$0xff]  }
 0xb1e   :  { %v2860_v29 = vmul.f32 0.5, %v2858_v25  ;;  %v6444_v17 = vld [vmem:[%s6756_s7 + $0x64] ss:$12 sps:$4 sm:$0xff]   ;;  %v6457_v36 = vld [vmem:[%s6756_s7 + $0x68] ss:$12 sps:$4 sm:$0xff]  }
 0xb1f   :  { %4627 = vtanh.f32 %v2850_v7  ;;  %v6463_v4 = vld [vmem:[%s6756_s7 + $0x7c] ss:$12 sps:$4 sm:$0xff]   ;;  %v6470_v27 = vld [vmem:[%s6756_s7 + $0x78] ss:$12 sps:$4 sm:$0xff]   ;;  %v6476_v22 = vld [vmem:[%s6756_s7 + $0x80] ss:$12 sps:$4 sm:$0xff]  }
 0xb20   :  { %4629 = vtanh.f32 %v2859_v63  ;;  %v6482_v46 = vld [vmem:[%s6756_s7 + $0x94] ss:$12 sps:$4 sm:$0xff]   ;;  %v6489_v19 = vld [vmem:[%s6756_s7 + $0x90] ss:$12 sps:$4 sm:$0xff]   ;;  %v6495_v25 = vld [vmem:[%s6756_s7 + $0x98] ss:$12 sps:$4 sm:$0xff]  }
 0xb21   :  { %4631 = vtanh.f32 %v2860_v29  ;;  %v6501_v7 = vld [vmem:[%s6756_s7 + $0xac] ss:$12 sps:$4 sm:$0xff]   ;;  %v6508_v63 = vld [vmem:[%s6756_s7 + $0xa8] ss:$12 sps:$4 sm:$0xff]   ;;  %v6514_v29 = vld [vmem:[%s6756_s7 + $0xb0] ss:$12 sps:$4 sm:$0xff]  }
 0xb27   :  { %v4626_v52 = vpop.eup %4625 }
 0xb28   :  { %v2853_v12 = vmul.f32 0.5, %v4626_v52  ;;  %v6520_v52 = vld [vmem:[%s6756_s7 + $0x4] ss:$12 sps:$4 sm:$0xff]  }
 0xb29   :  { %v4628_v24 = vpop.eup %4627 }
 0xb2a   :  { %v2855_v31 = vadd.f32 0.5, %v2853_v12  ;;  %v2854_v56 = vmul.f32 0.5, %v4628_v24  ;;  %v4630_v53 = vpop.eup %4629  ;;  %v2886_v12 = vunpack.c.l.bf16 %v6172_v41 }
 0xb2b   :  { %v4632_v32 = vpop.eup %4631  ;;  %v2863_v51 = vmul.f32 0.5, %v4630_v53 }
 0xb2c   :  { %v2869_v47 = vmul.f32 %v2867_v58, %v2855_v31  ;;  %v2856_v14 = vadd.f32 0.5, %v2854_v56  ;;  %v2864_v55 = vmul.f32 0.5, %v4632_v32  ;;  %v2887_v58 = vunpack.c.l.bf16 %v6180_v8 }
 0xb2d   :  { %v2865_v13 = vadd.f32 0.5, %v2863_v51 }
 0xb2e   :  { %v2871_v61 = vadd.f32 %v2869_v47, %v2758_v35  ;;  %v2870_v1 = vmul.f32 %v2868_v59, %v2856_v14  ;;  %v2866_v42 = vadd.f32 0.5, %v2864_v55  ;;  %v2889_v14 = vunpack.c.h.bf16 %v6172_v41 }
 0xb2f   :  { %v2875_v62 = vsub.f32 1.0, %v2865_v13  ;;  %v2879_v40 = vmul.f32 %v2865_v13, %v6311_v10  ;;  %v6378_v10 = vld [vmem:[%s6756_s7 + $0x8] ss:$12 sps:$4 sm:$0xff]  }
 0xb30   :  { %4633 = vtanh.f32 %v2871_v61  ;;  %v2872_v33 = vadd.f32 %v2870_v1, %v2761_v28  ;;  %v2876_v23 = vsub.f32 1.0, %v2866_v42  ;;  %v2880_v44 = vmul.f32 %v2866_v42, %v6314_v20  ;;  %v6384_v20 = vld [vmem:[%s6756_s7 + $0x1c] ss:$12 sps:$4 sm:$0xff]  }
 0xb31   :  { %v2890_v61 = vunpack.c.h.bf16 %v6180_v8  ;;  %v2888_v8 = vunpack.c.l.bf16 %v6127_v18 }
 0xb32   :  { %4635 = vtanh.f32 %v2872_v33 }
 0xb3a   :  { %v4634_v9 = vpop.eup %4633 }
 0xb3b   :  { %v2877_v16 = vmul.f32 %v4634_v9, %v2875_v62 }
 0xb3c   :  { %v4636_v38 = vpop.eup %4635 }
 0xb3d   :  { %v6362_v57 = vadd.f32 %v2879_v40, %v2877_v16  ;;  %v2878_v6 = vmul.f32 %v4636_v38, %v2876_v23 }
 0xb3f   :  { %v6365_v11 = vadd.f32 %v2880_v44, %v2878_v6 }
 0xb41   :  { %v2892_v60 = vpack.c.bf16 %v6365_v11, %v6362_v57 }
 0xb43   :  { %2926 = vmatmul.mubr.bf16.vlgmr.msra.gmra.mrb[92].mxu0 %v2892_v60  ;;  %4253 = vmatmul.mubr.bf16.vlgmr.msra.gmra.mrb[92].mxu1 %v2892_v60 }
 0xb44   :  { %3024 = vmatpush1.bf16.msra.mxu0 %v6372_v2  ;;  %4257 = vmatpush3.bf16.msra.mxu1 %v6378_v10 }
 0xb45   :  { %3025 = vmatprep.subr.bf16.mxu0 %v6384_v20  ;;  %4258 = vmatprep.subr.bf16.mxu1 %v6824_v39 }
 0xb46   :  { %3055 = vmatprep.mubr.bf16.mxu0 %v6825_v15  ;;  %4272 = vmatprep.mubr.msk.bf16.mxu1 %vm4749_vm0, %v6824_v39 }
 0xb48   :  { %3026 = vmatpush1.bf16.msra.mxu0 %v6394_v54  ;;  %4259 = vmatpush3.bf16.msra.mxu1 %v6400_v37 }
 0xb49   :  { %3027 = vmatprep.subr.bf16.mxu0 %v6406_v30  ;;  %4260 = vmatprep.subr.bf16.mxu1 %v6824_v39 }
 0xb4c   :  { %3028 = vmatpush1.bf16.msra.mxu0 %v6413_v45  ;;  %4261 = vmatpush3.bf16.msra.mxu1 %v6419_v3 }
 0xb4d   :  { %3029 = vmatprep.subr.bf16.mxu0 %v6425_v50  ;;  %4262 = vmatprep.subr.bf16.mxu1 %v6824_v39 }
 0xb50   :  { %3030 = vmatpush1.bf16.msra.mxu0 %v6432_v21  ;;  %4263 = vmatpush3.bf16.msra.mxu1 %v6438_v34 }
 0xb51   :  { %3031 = vmatprep.subr.bf16.mxu0 %v6444_v17  ;;  %4264 = vmatprep.subr.bf16.mxu1 %v6824_v39 }
 0xb54   :  { %3032 = vmatpush1.bf16.msra.mxu0 %v6451_v43  ;;  %4265 = vmatpush3.bf16.msra.mxu1 %v6457_v36 }
 0xb55   :  { %3033 = vmatprep.subr.bf16.mxu0 %v6463_v4  ;;  %4266 = vmatprep.subr.bf16.mxu1 %v6824_v39 }
 0xb58   :  { %3034 = vmatpush1.bf16.msra.mxu0 %v6470_v27  ;;  %4267 = vmatpush3.bf16.msra.mxu1 %v6476_v22 }
 0xb59   :  { %3035 = vmatprep.subr.bf16.mxu0 %v6482_v46  ;;  %4268 = vmatprep.subr.bf16.mxu1 %v6824_v39 }
 0xb5c   :  { %3036 = vmatpush1.bf16.msra.mxu0 %v6489_v19  ;;  %4269 = vmatpush3.bf16.msra.mxu1 %v6495_v25 }
 0xb5d   :  { %3037 = vmatprep.subr.bf16.mxu0 %v6501_v7  ;;  %4270 = vmatprep.subr.bf16.mxu1 %v6824_v39 }
 0xb60   :  { %3038 = vmatpush1.bf16.msra.mxu0 %v6508_v63  ;;  %4271 = vmatpush3.bf16.msra.mxu1 %v6514_v29 }
 0xb61   :  { %3153 = vmatprep.subr.bf16.mxu0 %v6520_v52  ;;  %4276 = vmatprep.subr.bf16.mxu1 %v6824_v39 }
 0xc16   :  { %v2927_v24 = vpop.f32.mrb[92].mxu0  ;;  %v2970_v31 = vpop.f32.mrb[92].mxu1 }
 0xc17   :  { %v2977_v56 = vadd.f32 %v2927_v24, %v2886_v12  ;;  %v2929_v35 = vpop.f32.mrb[93].mxu0  ;;  %v4254_v47 = vpop.f32.mrb[93].mxu1  ;;  %v2997_v23 = vadd.f32 %v6255_v0, %v2970_v31  ;;  %v2891_v24 = vunpack.c.h.bf16 %v6127_v18 }
 0xc18   :  { %v2987_v59 = vadd.f32 %v2929_v35, %v2887_v58  ;;  %v2931_v53 = vpop.f32.mrb[94].mxu0  ;;  %v2973_v28 = vpop.f32.mrb[94].mxu1 }
 0xc19   :  { %v2979_v1 = vmul.f32 0.5, %v2977_v56  ;;  %v2978_v32 = vadd.f32 %v2931_v53, %v2889_v14  ;;  %v2933_v33 = vpop.f32.mrb[95].mxu0  ;;  %v4255_v51 = vpop.f32.mrb[95].mxu1  ;;  %v2998_v60 = vadd.f32 %v6255_v0, %v2973_v28 }
 0xc1a   :  { %v2988_v55 = vadd.f32 %v2933_v33, %v2890_v61  ;;  %v2989_v42 = vmul.f32 0.5, %v2987_v59 }
 0xc1b   :  { %4637 = vtanh.f32 %v2979_v1  ;;  %v2980_v13 = vmul.f32 0.5, %v2978_v32 }
 0xc1c   :  { %v2990_v62 = vmul.f32 0.5, %v2988_v55 }
 0xc1d   :  { %4639 = vtanh.f32 %v2980_v13 }
 0xc1e   :  { %4641 = vtanh.f32 %v2989_v42 }
 0xc1f   :  { %4643 = vtanh.f32 %v2990_v62 }
 0xc25   :  { %v4638_v9 = vpop.eup %4637 }
 0xc26   :  { %v2983_v16 = vmul.f32 0.5, %v4638_v9 }
 0xc27   :  { %v4640_v41 = vpop.eup %4639 }
 0xc28   :  { %v2985_v40 = vadd.f32 0.5, %v2983_v16  ;;  %v2984_v38 = vmul.f32 0.5, %v4640_v41  ;;  %v4642_v12 = vpop.eup %4641  ;;  %v3017_v16 = vunpack.c.l.bf16 %v6198_v26 }
 0xc29   :  { %v4644_v35 = vpop.eup %4643  ;;  %v2993_v14 = vmul.f32 0.5, %v4642_v12 }
 0xc2a   :  { %v2999_v6 = vmul.f32 %v2997_v23, %v2985_v40  ;;  %v2986_v44 = vadd.f32 0.5, %v2984_v38  ;;  %v2994_v59 = vmul.f32 0.5, %v4644_v35  ;;  %v3019_v38 = vunpack.c.h.bf16 %v6190_v5 }
 0xc2b   :  { %v2995_v53 = vadd.f32 0.5, %v2993_v14 }
 0xc2c   :  { %v3001_v58 = vadd.f32 %v2999_v6, %v2888_v8  ;;  %v3000_v56 = vmul.f32 %v2998_v60, %v2986_v44  ;;  %v2996_v31 = vadd.f32 0.5, %v2994_v59  ;;  %v3020_v60 = vunpack.c.h.bf16 %v6198_v26  ;;  %v6860_v26 = vld [vmem:[#allocation22_spill] sm:$0xff] }
 0xc2d   :  { %v3005_v61 = vsub.f32 1.0, %v2995_v53  ;;  %v3009_v33 = vmul.f32 %v2995_v53, %v6362_v57  ;;  %v3016_v57 = vunpack.c.l.bf16 %v6190_v5 }
 0xc2e   :  { %4645 = vtanh.f32 %v3001_v58  ;;  %v3002_v47 = vadd.f32 %v3000_v56, %v2891_v24  ;;  %v3006_v51 = vsub.f32 1.0, %v2996_v31  ;;  %v3010_v13 = vmul.f32 %v2996_v31, %v6365_v11 }
 0xc30   :  { %4647 = vtanh.f32 %v3002_v47 }
 0xc38   :  { %v4646_v1 = vpop.eup %4645 }
 0xc39   :  { %v3007_v32 = vmul.f32 %v4646_v1, %v3005_v61 }
 0xc3a   :  { %v4648_v28 = vpop.eup %4647 }
 0xc3b   :  { %v6533_v55 = vadd.f32 %v3009_v33, %v3007_v32  ;;  %v3008_v18 = vmul.f32 %v4648_v28, %v3006_v51  ;;  %v3018_v33 = vunpack.c.l.bf16 %v6860_v26 }
 0xc3d   :  { %v6536_v42 = vadd.f32 %v3010_v13, %v3008_v18 }
 0xc3f   :  { %v3022_v62 = vpack.c.bf16 %v6536_v42, %v6533_v55 }
 0xc41   :  { %3056 = vmatmul.mubr.bf16.vlgmr.msra.gmra.mrb[96].mxu0 %v3022_v62  ;;  %4273 = vmatmul.mubr.bf16.vlgmr.msra.gmra.mrb[96].mxu1 %v3022_v62  ;;  %v3021_v62 = vunpack.c.h.bf16 %v6860_v26 }
 0xc42   :  { %3154 = vmatpush1.bf16.msra.mxu0 %v6372_v2  ;;  %4277 = vmatpush3.bf16.msra.mxu1 %v6378_v10 }
 0xc43   :  { %3155 = vmatprep.subr.bf16.mxu0 %v6384_v20  ;;  %4278 = vmatprep.subr.bf16.mxu1 %v6824_v39 }
 0xc44   :  { %3185 = vmatprep.mubr.bf16.mxu0 %v6825_v15  ;;  %4292 = vmatprep.mubr.msk.bf16.mxu1 %vm4749_vm0, %v6824_v39 }
 0xc46   :  { %3156 = vmatpush1.bf16.msra.mxu0 %v6394_v54  ;;  %4279 = vmatpush3.bf16.msra.mxu1 %v6400_v37 }
 0xc47   :  { %3157 = vmatprep.subr.bf16.mxu0 %v6406_v30  ;;  %4280 = vmatprep.subr.bf16.mxu1 %v6824_v39 }
 0xc4a   :  { %3158 = vmatpush1.bf16.msra.mxu0 %v6413_v45  ;;  %4281 = vmatpush3.bf16.msra.mxu1 %v6419_v3 }
 0xc4b   :  { %3159 = vmatprep.subr.bf16.mxu0 %v6425_v50  ;;  %4282 = vmatprep.subr.bf16.mxu1 %v6824_v39 }
 0xc4e   :  { %3160 = vmatpush1.bf16.msra.mxu0 %v6432_v21  ;;  %4283 = vmatpush3.bf16.msra.mxu1 %v6438_v34 }
 0xc4f   :  { %3161 = vmatprep.subr.bf16.mxu0 %v6444_v17  ;;  %4284 = vmatprep.subr.bf16.mxu1 %v6824_v39 }
 0xc52   :  { %3162 = vmatpush1.bf16.msra.mxu0 %v6451_v43  ;;  %4285 = vmatpush3.bf16.msra.mxu1 %v6457_v36 }
 0xc53   :  { %3163 = vmatprep.subr.bf16.mxu0 %v6463_v4  ;;  %4286 = vmatprep.subr.bf16.mxu1 %v6824_v39 }
 0xc56   :  { %3164 = vmatpush1.bf16.msra.mxu0 %v6470_v27  ;;  %4287 = vmatpush3.bf16.msra.mxu1 %v6476_v22 }
 0xc57   :  { %3165 = vmatprep.subr.bf16.mxu0 %v6482_v46  ;;  %4288 = vmatprep.subr.bf16.mxu1 %v6824_v39 }
 0xc5a   :  { %3166 = vmatpush1.bf16.msra.mxu0 %v6489_v19  ;;  %4289 = vmatpush3.bf16.msra.mxu1 %v6495_v25 }
 0xc5b   :  { %3167 = vmatprep.subr.bf16.mxu0 %v6501_v7  ;;  %4290 = vmatprep.subr.bf16.mxu1 %v6824_v39 }
 0xc5e   :  { %3168 = vmatpush1.bf16.msra.mxu0 %v6508_v63  ;;  %4291 = vmatpush3.bf16.msra.mxu1 %v6514_v29 }
 0xc5f   :  { %3283 = vmatprep.subr.bf16.mxu0 %v6520_v52  ;;  %4296 = vmatprep.subr.bf16.mxu1 %v6824_v39 }
 0xd14   :  { %v3057_v11 = vpop.f32.mrb[96].mxu0  ;;  %v3100_v9 = vpop.f32.mrb[96].mxu1 }
 0xd15   :  { %v3107_v41 = vadd.f32 %v3057_v11, %v3016_v57  ;;  %v3059_v40 = vpop.f32.mrb[97].mxu0  ;;  %v4274_v23 = vpop.f32.mrb[97].mxu1  ;;  %v3127_v1 = vadd.f32 %v6255_v0, %v3100_v9 }
 0xd16   :  { %v3117_v8 = vadd.f32 %v3059_v40, %v3017_v16  ;;  %v3061_v6 = vpop.f32.mrb[98].mxu0  ;;  %v3103_v44 = vpop.f32.mrb[98].mxu1 }
 0xd17   :  { %v3109_v12 = vmul.f32 0.5, %v3107_v41  ;;  %v3108_v24 = vadd.f32 %v3061_v6, %v3019_v38  ;;  %v3063_v58 = vpop.f32.mrb[99].mxu0  ;;  %v4275_v56 = vpop.f32.mrb[99].mxu1  ;;  %v3128_v18 = vadd.f32 %v6255_v0, %v3103_v44 }
 0xd18   :  { %v3118_v35 = vadd.f32 %v3063_v58, %v3020_v60  ;;  %v3119_v14 = vmul.f32 0.5, %v3117_v8 }
 0xd19   :  { %4649 = vtanh.f32 %v3109_v12  ;;  %v3110_v47 = vmul.f32 0.5, %v3108_v24 }
 0xd1a   :  { %v3120_v59 = vmul.f32 0.5, %v3118_v35 }
 0xd1b   :  { %4651 = vtanh.f32 %v3110_v47 }
 0xd1c   :  { %4653 = vtanh.f32 %v3119_v14 }
 0xd1d   :  { %4655 = vtanh.f32 %v3120_v59 }
 0xd23   :  { %v4650_v53 = vpop.eup %4649 }
 0xd24   :  { %v3113_v31 = vmul.f32 0.5, %v4650_v53 }
 0xd25   :  { %v4652_v5 = vpop.eup %4651 }
 0xd26   :  { %v3115_v61 = vadd.f32 0.5, %v3113_v31  ;;  %v3114_v32 = vmul.f32 0.5, %v4652_v5  ;;  %v4654_v13 = vpop.eup %4653  ;;  %v6862_v31 = vld [vmem:[#allocation25_spill] sm:$0xff] }
 0xd27   :  { %v4656_v16 = vpop.eup %4655  ;;  %v3123_v40 = vmul.f32 0.5, %v4654_v13  ;;  %v3147_v5 = vunpack.c.l.bf16 %v6862_v31 }
 0xd28   :  { %v3129_v51 = vmul.f32 %v3127_v1, %v3115_v61  ;;  %v3116_v28 = vadd.f32 0.5, %v3114_v32  ;;  %v3124_v23 = vmul.f32 0.5, %v4656_v16 }
 0xd29   :  { %v3125_v38 = vadd.f32 0.5, %v3123_v40 }
 0xd2a   :  { %v3131_v57 = vadd.f32 %v3129_v51, %v3018_v33  ;;  %v3130_v11 = vmul.f32 %v3128_v18, %v3116_v28  ;;  %v3126_v9 = vadd.f32 0.5, %v3124_v23  ;;  %v3150_v18 = vunpack.c.h.bf16 %v6862_v31 }
 0xd2b   :  { %v3135_v8 = vsub.f32 1.0, %v3125_v38  ;;  %v3139_v12 = vmul.f32 %v3125_v38, %v6533_v55  ;;  %v6861_v55 = vld [vmem:[#allocation14_spill] sm:$0xff] }
 0xd2c   :  { %4657 = vtanh.f32 %v3131_v57  ;;  %v3132_v41 = vadd.f32 %v3130_v11, %v3021_v62  ;;  %v3136_v24 = vsub.f32 1.0, %v3126_v9  ;;  %v3140_v35 = vmul.f32 %v3126_v9, %v6536_v42 }
 0xd2d   :  { %v3146_v42 = vunpack.c.l.bf16 %v6861_v55  ;;  %v3149_v26 = vunpack.c.h.bf16 %v6861_v55 }
 0xd2e   :  { %4659 = vtanh.f32 %v3132_v41 }
 0xd36   :  { %v4658_v6 = vpop.eup %4657 }
 0xd37   :  { %v3137_v60 = vmul.f32 %v4658_v6, %v3135_v8 }
 0xd38   :  { %v4660_v44 = vpop.eup %4659 }
 0xd39   :  { %v6584_v58 = vadd.f32 %v3139_v12, %v3137_v60  ;;  %v3138_v56 = vmul.f32 %v4660_v44, %v3136_v24  ;;  %v6863_v12 = vld [vmem:[#allocation21_spill] sm:$0xff] }
 0xd3a   :  { %v3148_v24 = vunpack.c.l.bf16 %v6863_v12  ;;  %v3151_v55 = vunpack.c.h.bf16 %v6863_v12 }
 0xd3b   :  { %v6587_v47 = vadd.f32 %v3140_v35, %v3138_v56 }
 0xd3d   :  { %v3152_v14 = vpack.c.bf16 %v6587_v47, %v6584_v58 }
 0xd3f   :  { %3186 = vmatmul.mubr.bf16.vlgmr.msra.gmra.mrb[100].mxu0 %v3152_v14  ;;  %4293 = vmatmul.mubr.bf16.vlgmr.msra.gmra.mrb[100].mxu1 %v3152_v14 }
 0xd40   :  { %3284 = vmatpush1.bf16.msra.mxu0 %v6372_v2  ;;  %4297 = vmatpush3.bf16.msra.mxu1 %v6378_v10 }
 0xd41   :  { %3285 = vmatprep.subr.bf16.mxu0 %v6384_v20  ;;  %4298 = vmatprep.subr.bf16.mxu1 %v6824_v39 }
 0xd42   :  { %3315 = vmatprep.mubr.bf16.mxu0 %v6825_v15  ;;  %4312 = vmatprep.mubr.msk.bf16.mxu1 %vm4749_vm0, %v6824_v39 }
 0xd44   :  { %3286 = vmatpush1.bf16.msra.mxu0 %v6394_v54  ;;  %4299 = vmatpush3.bf16.msra.mxu1 %v6400_v37 }
 0xd45   :  { %3287 = vmatprep.subr.bf16.mxu0 %v6406_v30  ;;  %4300 = vmatprep.subr.bf16.mxu1 %v6824_v39 }
 0xd48   :  { %3288 = vmatpush1.bf16.msra.mxu0 %v6413_v45  ;;  %4301 = vmatpush3.bf16.msra.mxu1 %v6419_v3 }
 0xd49   :  { %3289 = vmatprep.subr.bf16.mxu0 %v6425_v50  ;;  %4302 = vmatprep.subr.bf16.mxu1 %v6824_v39 }
 0xd4c   :  { %3290 = vmatpush1.bf16.msra.mxu0 %v6432_v21  ;;  %4303 = vmatpush3.bf16.msra.mxu1 %v6438_v34 }
 0xd4d   :  { %3291 = vmatprep.subr.bf16.mxu0 %v6444_v17  ;;  %4304 = vmatprep.subr.bf16.mxu1 %v6824_v39 }
 0xd50   :  { %3292 = vmatpush1.bf16.msra.mxu0 %v6451_v43  ;;  %4305 = vmatpush3.bf16.msra.mxu1 %v6457_v36 }
 0xd51   :  { %3293 = vmatprep.subr.bf16.mxu0 %v6463_v4  ;;  %4306 = vmatprep.subr.bf16.mxu1 %v6824_v39 }
 0xd54   :  { %3294 = vmatpush1.bf16.msra.mxu0 %v6470_v27  ;;  %4307 = vmatpush3.bf16.msra.mxu1 %v6476_v22 }
 0xd55   :  { %3295 = vmatprep.subr.bf16.mxu0 %v6482_v46  ;;  %4308 = vmatprep.subr.bf16.mxu1 %v6824_v39 }
 0xd58   :  { %3296 = vmatpush1.bf16.msra.mxu0 %v6489_v19  ;;  %4309 = vmatpush3.bf16.msra.mxu1 %v6495_v25 }
 0xd59   :  { %3297 = vmatprep.subr.bf16.mxu0 %v6501_v7  ;;  %4310 = vmatprep.subr.bf16.mxu1 %v6824_v39 }
 0xd5c   :  { %3298 = vmatpush1.bf16.msra.mxu0 %v6508_v63  ;;  %4311 = vmatpush3.bf16.msra.mxu1 %v6514_v29 }
 0xd5d   :  { %3413 = vmatprep.subr.bf16.mxu0 %v6520_v52  ;;  %4316 = vmatprep.subr.bf16.mxu1 %v6824_v39 }
 0xe12   :  { %v3187_v59 = vpop.f32.mrb[100].mxu0  ;;  %v3230_v53 = vpop.f32.mrb[100].mxu1 }
 0xe13   :  { %v3237_v61 = vadd.f32 %v3187_v59, %v3146_v42  ;;  %v3189_v1 = vpop.f32.mrb[101].mxu0  ;;  %v4294_v32 = vpop.f32.mrb[101].mxu1  ;;  %v3257_v6 = vadd.f32 %v6255_v0, %v3230_v53 }
 0xe14   :  { %v3247_v33 = vadd.f32 %v3189_v1, %v3147_v5  ;;  %v3191_v51 = vpop.f32.mrb[102].mxu0  ;;  %v3233_v28 = vpop.f32.mrb[102].mxu1 }
 0xe15   :  { %v3239_v13 = vmul.f32 0.5, %v3237_v61  ;;  %v3238_v52 = vadd.f32 %v3191_v51, %v3149_v26  ;;  %v3193_v62 = vpop.f32.mrb[103].mxu0  ;;  %v4295_v57 = vpop.f32.mrb[103].mxu1  ;;  %v3258_v35 = vadd.f32 %v6255_v0, %v3233_v28 }
 0xe16   :  { %v3248_v11 = vadd.f32 %v3193_v62, %v3150_v18  ;;  %v3249_v41 = vmul.f32 0.5, %v3247_v33 }
 0xe17   :  { %4661 = vtanh.f32 %v3239_v13  ;;  %v3240_v16 = vmul.f32 0.5, %v3238_v52 }
 0xe18   :  { %v3250_v40 = vmul.f32 0.5, %v3248_v11 }
 0xe19   :  { %4663 = vtanh.f32 %v3240_v16  ;;  %v6683_v16 = vld [vmem:[%s6758_s9] ss:$0 sm:$0xff] }
 0xe1a   :  { %4665 = vtanh.f32 %v3249_v41 }
 0xe1b   :  { %4667 = vtanh.f32 %v3250_v40 }
 0xe21   :  { %v4662_v23 = vpop.eup %4661 }
 0xe22   :  { %v3243_v38 = vmul.f32 0.5, %v4662_v23  ;;  %v3278_v23 = vunpack.c.l.bf16 %v6244_v49 }
 0xe23   :  { %v4664_v9 = vpop.eup %4663 }
 0xe24   :  { %v3245_v8 = vadd.f32 0.5, %v3243_v38  ;;  %v3244_v60 = vmul.f32 0.5, %v4664_v9  ;;  %v4666_v14 = vpop.eup %4665 }
 0xe25   :  { %v4668_v31 = vpop.eup %4667  ;;  %v3253_v61 = vmul.f32 0.5, %v4666_v14 }
 0xe26   :  { %v3259_v44 = vmul.f32 %v3257_v6, %v3245_v8  ;;  %v3246_v56 = vadd.f32 0.5, %v3244_v60  ;;  %v3254_v1 = vmul.f32 0.5, %v4668_v31  ;;  %v3281_v60 = vunpack.c.h.bf16 %v6244_v49 }
 0xe27   :  { %v3255_v32 = vadd.f32 0.5, %v3253_v61 }
 0xe28   :  { %v3261_v42 = vadd.f32 %v3259_v44, %v3148_v24  ;;  %v3260_v59 = vmul.f32 %v3258_v35, %v3246_v56  ;;  %v3256_v53 = vadd.f32 0.5, %v3254_v1 }
 0xe29   :  { %v3265_v26 = vsub.f32 1.0, %v3255_v32  ;;  %v3269_v18 = vmul.f32 %v3255_v32, %v6584_v58 }
 0xe2a   :  { %4669 = vtanh.f32 %v3261_v42  ;;  %v3262_v5 = vadd.f32 %v3260_v59, %v3151_v55  ;;  %v3266_v13 = vsub.f32 1.0, %v3256_v53  ;;  %v3270_v62 = vmul.f32 %v3256_v53, %v6587_v47 }
 0xe2c   :  { %4671 = vtanh.f32 %v3262_v5 }
 0xe34   :  { %v4670_v33 = vpop.eup %4669 }
 0xe35   :  { %v3267_v51 = vmul.f32 %v4670_v33, %v3265_v26 }
 0xe36   :  { %v4672_v0 = vpop.eup %4671 }
 0xe37   :  { %v6635_v28 = vadd.f32 %v3269_v18, %v3267_v51  ;;  %v3268_v52 = vmul.f32 %v4672_v0, %v3266_v13  ;;  %v4497_v18 = vld [vmem:[%s6759_s10] sm:$0xff]   ;;  %v4498_v13 = vld [vmem:[%s6759_s10 + $0x8] sm:$0xff]   ;;  %v4499_v0 = vld [vmem:[%s6759_s10 + $0x10] sm:$0xff]  }
 0xe39   :  { %v6638_v57 = vadd.f32 %v3270_v62, %v3268_v52  ;;  %v4501_v52 = vld [vmem:[%s6759_s10 + $0x20] sm:$0xff]   ;;  %v4502_v62 = vld [vmem:[%s6759_s10 + $0x28] sm:$0xff]  }
 0xe3b   :  { %v3282_v11 = vpack.c.bf16 %v6638_v57, %v6635_v28 }
 0xe3d   :  { %3316 = vmatmul.mubr.bf16.vlgmr.msra.gmra.mrb[104].mxu0 %v3282_v11  ;;  %4313 = vmatmul.mubr.bf16.vlgmr.msra.gmra.mrb[104].mxu1 %v3282_v11  ;;  %v4504_v11 = vld [vmem:[%s6759_s10 + $0x38] sm:$0xff]  }
 0xe3e   :  { %3414 = vmatpush1.bf16.msra.mxu0 %v6372_v2  ;;  %4317 = vmatpush3.bf16.msra.mxu1 %v6378_v10 }
 0xe3f   :  { %3415 = vmatprep.subr.bf16.mxu0 %v6384_v20  ;;  %4318 = vmatprep.subr.bf16.mxu1 %v6824_v39 }
 0xe40   :  { %3445 = vmatprep.mubr.bf16.mxu0 %v6825_v15  ;;  %4332 = vmatprep.mubr.msk.bf16.mxu1 %vm4749_vm0, %v6824_v39  ;;  %v6864_v15 = vld [vmem:[#allocation26_spill] sm:$0xff] }
 0xe41   :  { %v3276_v2 = vunpack.c.l.bf16 %v6864_v15 }
 0xe42   :  { %3416 = vmatpush1.bf16.msra.mxu0 %v6394_v54  ;;  %4319 = vmatpush3.bf16.msra.mxu1 %v6400_v37  ;;  %v6865_v54 = vld [vmem:[#allocation13_spill] sm:$0xff] }
 0xe43   :  { %3417 = vmatprep.subr.bf16.mxu0 %v6406_v30  ;;  %4320 = vmatprep.subr.bf16.mxu1 %v6824_v39  ;;  %v3277_v37 = vunpack.c.l.bf16 %v6865_v54 }
 0xe46   :  { %3418 = vmatpush1.bf16.msra.mxu0 %v6413_v45  ;;  %4321 = vmatpush3.bf16.msra.mxu1 %v6419_v3 }
 0xe47   :  { %3419 = vmatprep.subr.bf16.mxu0 %v6425_v50  ;;  %4322 = vmatprep.subr.bf16.mxu1 %v6824_v39  ;;  %v3279_v50 = vunpack.c.h.bf16 %v6864_v15  ;;  %v3406_v15 = vunpack.c.l.bf16 %v6238_v48 }
 0xe4a   :  { %3420 = vmatpush1.bf16.msra.mxu0 %v6432_v21  ;;  %4323 = vmatpush3.bf16.msra.mxu1 %v6438_v34 }
 0xe4b   :  { %3421 = vmatprep.subr.bf16.mxu0 %v6444_v17  ;;  %4324 = vmatprep.subr.bf16.mxu1 %v6824_v39 }
 0xe4e   :  { %3422 = vmatpush1.bf16.msra.mxu0 %v6451_v43  ;;  %4325 = vmatpush3.bf16.msra.mxu1 %v6457_v36  ;;  %v3280_v43 = vunpack.c.h.bf16 %v6865_v54 }
 0xe4f   :  { %3423 = vmatprep.subr.bf16.mxu0 %v6463_v4  ;;  %4326 = vmatprep.subr.bf16.mxu1 %v6824_v39 }
 0xe52   :  { %3424 = vmatpush1.bf16.msra.mxu0 %v6470_v27  ;;  %4327 = vmatpush3.bf16.msra.mxu1 %v6476_v22 }
 0xe53   :  { %3425 = vmatprep.subr.bf16.mxu0 %v6482_v46  ;;  %4328 = vmatprep.subr.bf16.mxu1 %v6824_v39 }
 0xe56   :  { %3426 = vmatpush1.bf16.msra.mxu0 %v6489_v19  ;;  %4329 = vmatpush3.bf16.msra.mxu1 %v6495_v25 }
 0xe57   :  { %3427 = vmatprep.subr.bf16.mxu0 %v6501_v7  ;;  %4330 = vmatprep.subr.bf16.mxu1 %v6824_v39 }
 0xe5a   :  { %3428 = vmatpush1.bf16.msra.mxu0 %v6508_v63  ;;  %4331 = vmatpush3.bf16.msra.mxu1 %v6514_v29 }
 0xe5b   :  { %4336 = vmatprep.subr.bf16.mxu0 %v6824_v39 }
 0xf10   :  { %v3317_v10 = vpop.f32.mrb[104].mxu0  ;;  %v3360_v20 = vpop.f32.mrb[104].mxu1 }
 0xf11   :  { %v3367_v30 = vadd.f32 %v3317_v10, %v3276_v2  ;;  %v3319_v45 = vpop.f32.mrb[105].mxu0  ;;  %v4314_v3 = vpop.f32.mrb[105].mxu1  ;;  %v3387_v41 = vadd.f32 %v6683_v16, %v3360_v20  ;;  %v6866_v20 = vld [vmem:[#allocation5_spill] sm:$0xff] }
 0xf12   :  { %v3377_v21 = vadd.f32 %v3319_v45, %v3277_v37  ;;  %v3321_v34 = vpop.f32.mrb[106].mxu0  ;;  %v3363_v17 = vpop.f32.mrb[106].mxu1  ;;  %v3407_v54 = vunpack.c.l.bf16 %v6866_v20  ;;  %v3409_v3 = vunpack.c.h.bf16 %v6238_v48 }
 0xf13   :  { %v3369_v36 = vmul.f32 0.5, %v3367_v30  ;;  %v3368_v4 = vadd.f32 %v3321_v34, %v3279_v50  ;;  %v3323_v27 = vpop.f32.mrb[107].mxu0  ;;  %v4315_v22 = vpop.f32.mrb[107].mxu1  ;;  %v3388_v8 = vadd.f32 %v6683_v16, %v3363_v17 }
 0xf14   :  { %v3378_v46 = vadd.f32 %v3323_v27, %v3280_v43  ;;  %v3379_v25 = vmul.f32 0.5, %v3377_v21 }
 0xf15   :  { %4673 = vtanh.f32 %v3369_v36  ;;  %v3370_v19 = vmul.f32 0.5, %v3368_v4 }
 0xf16   :  { %v3380_v7 = vmul.f32 0.5, %v3378_v46 }
 0xf17   :  { %4675 = vtanh.f32 %v3370_v19 }
 0xf18   :  { %4677 = vtanh.f32 %v3379_v25 }
 0xf19   :  { %4679 = vtanh.f32 %v3380_v7 }
 0xf1f   :  { %v4674_v63 = vpop.eup %4673 }
 0xf20   :  { %v3373_v29 = vmul.f32 0.5, %v4674_v63 }
 0xf21   :  { %v4676_v58 = vpop.eup %4675 }
 0xf22   :  { %v3375_v47 = vadd.f32 0.5, %v3373_v29  ;;  %v3374_v40 = vmul.f32 0.5, %v4676_v58  ;;  %v4678_v6 = vpop.eup %4677 }
 0xf23   :  { %v4680_v44 = vpop.eup %4679  ;;  %v3383_v35 = vmul.f32 0.5, %v4678_v6 }
 0xf24   :  { %v3389_v38 = vmul.f32 %v3387_v41, %v3375_v47  ;;  %v3376_v9 = vadd.f32 0.5, %v3374_v40  ;;  %v3384_v14 = vmul.f32 0.5, %v4680_v44  ;;  %v6867_v47 = vld [vmem:[#allocation4_spill] sm:$0xff] }
 0xf25   :  { %v3385_v55 = vadd.f32 0.5, %v3383_v35  ;;  %v3408_v41 = vunpack.c.l.bf16 %v6867_v47 }
 0xf26   :  { %v3391_v12 = vadd.f32 %v3389_v38, %v3278_v23  ;;  %v3390_v24 = vmul.f32 %v3388_v8, %v3376_v9  ;;  %v3386_v42 = vadd.f32 0.5, %v3384_v14  ;;  %v3411_v8 = vunpack.c.h.bf16 %v6867_v47 }
 0xf27   :  { %v3395_v59 = vsub.f32 1.0, %v3385_v55  ;;  %v3399_v61 = vmul.f32 %v3385_v55, %v6635_v28  ;;  %v4500_v28 = vld [vmem:[%s6759_s10 + $0x18] sm:$0xff]  }
 0xf28   :  { %4681 = vtanh.f32 %v3391_v12  ;;  %v3392_v56 = vadd.f32 %v3390_v24, %v3281_v60  ;;  %v3396_v1 = vsub.f32 1.0, %v3386_v42  ;;  %v3400_v26 = vmul.f32 %v3386_v42, %v6638_v57  ;;  %v4503_v57 = vld [vmem:[%s6759_s10 + $0x30] sm:$0xff]  }
 0xf2a   :  { %4683 = vtanh.f32 %v3392_v56 }
 0xf32   :  { %v4682_v31 = vpop.eup %4681 }
 0xf33   :  { %v3397_v5 = vmul.f32 %v4682_v31, %v3395_v59 }
 0xf34   :  { %v4684_v32 = vpop.eup %4683 }
 0xf35   :  { %v6690_v53 = vadd.f32 %v3399_v61, %v3397_v5  ;;  %v3398_v49 = vmul.f32 %v4684_v32, %v3396_v1 }
 0xf37   :  { %v6693_v33 = vadd.f32 %v3400_v26, %v3398_v49 }
 0xf39   :  { %v3412_v51 = vpack.c.bf16 %v6693_v33, %v6690_v53 }
 0xf3b   :  { %3446 = vmatmul.mubr.bf16.vlgmr.msra.gmra.mrb[108].mxu0 %v3412_v51  ;;  %4333 = vmatmul.mubr.bf16.vlgmr.msra.gmra.mrb[108].mxu1 %v3412_v51  ;;  %v3758_v51 = vld [vmem:[%s6760_s11] ss:$0 sm:$0xff] }
 0xf3c   :  { %4352 = vmatprep.mubr.msk.bf16.mxu0 %vm4749_vm0, %v6824_v39  ;;  %4337 = vmatpush3.bf16.msra.mxu0 %v4497_v18 }
 0xf3d   :  { %4338 = vmatprep.subr.bf16.mxu0 %v6824_v39 }
 0xf40   :  { %4339 = vmatpush3.bf16.msra.mxu0 %v4498_v13 }
 0xf41   :  { %4340 = vmatprep.subr.bf16.mxu0 %v6824_v39 }
 0xf44   :  { %4341 = vmatpush3.bf16.msra.mxu0 %v4499_v0 }
 0xf45   :  { %4342 = vmatprep.subr.bf16.mxu0 %v6824_v39 }
 0xf48   :  { %4343 = vmatpush3.bf16.msra.mxu0 %v4500_v28 }
 0xf49   :  { %4344 = vmatprep.subr.bf16.mxu0 %v6824_v39 }
 0xf4c   :  { %4345 = vmatpush3.bf16.msra.mxu0 %v4501_v52 }
 0xf4d   :  { %4346 = vmatprep.subr.bf16.mxu0 %v6824_v39 }
 0xf50   :  { %4347 = vmatpush3.bf16.msra.mxu0 %v4502_v62 }
 0xf51   :  { %4348 = vmatprep.subr.bf16.mxu0 %v6824_v39 }
 0xf54   :  { %4349 = vmatpush3.bf16.msra.mxu0 %v4503_v57 }
 0xf55   :  { %4350 = vmatprep.subr.bf16.mxu0 %v6824_v39  ;;  %v3410_v39 = vunpack.c.h.bf16 %v6866_v20 }
 0xf58   :  { %4351 = vmatpush3.bf16.msra.mxu0 %v4504_v11 }
0x100e   :  { %v3447_v2 = vpop.f32.mrb[108].mxu0  ;;  %v3490_v10 = vpop.f32.mrb[108].mxu1 }
0x100f   :  { %v3497_v37 = vadd.f32 %v3447_v2, %v3406_v15  ;;  %v3449_v30 = vpop.f32.mrb[109].mxu0  ;;  %v4334_v45 = vpop.f32.mrb[109].mxu1  ;;  %v3517_v29 = vadd.f32 %v6683_v16, %v3490_v10 }
0x1010   :  { %v3507_v50 = vadd.f32 %v3449_v30, %v3407_v54  ;;  %v3451_v21 = vpop.f32.mrb[110].mxu0  ;;  %v3493_v34 = vpop.f32.mrb[110].mxu1 }
0x1011   :  { %v3499_v17 = vmul.f32 0.5, %v3497_v37  ;;  %v3498_v43 = vadd.f32 %v3451_v21, %v3409_v3  ;;  %v3453_v36 = vpop.f32.mrb[111].mxu0  ;;  %v4335_v4 = vpop.f32.mrb[111].mxu1  ;;  %v3518_v38 = vadd.f32 %v6683_v16, %v3493_v34 }
0x1012   :  { %v3508_v27 = vadd.f32 %v3453_v36, %v3410_v39  ;;  %v3509_v46 = vmul.f32 0.5, %v3507_v50 }
0x1013   :  { %4685 = vtanh.f32 %v3499_v17  ;;  %v3500_v22 = vmul.f32 0.5, %v3498_v43 }
0x1014   :  { %v3510_v19 = vmul.f32 0.5, %v3508_v27 }
0x1015   :  { %4687 = vtanh.f32 %v3500_v22 }
0x1016   :  { %4689 = vtanh.f32 %v3509_v46 }
0x1017   :  { %4691 = vtanh.f32 %v3510_v19 }
0x101d   :  { %v4686_v25 = vpop.eup %4685 }
0x101e   :  { %v3503_v7 = vmul.f32 0.5, %v4686_v25 }
0x101f   :  { %v4688_v48 = vpop.eup %4687 }
0x1020   :  { %v3505_v63 = vadd.f32 0.5, %v3503_v7  ;;  %v3504_v58 = vmul.f32 0.5, %v4688_v48  ;;  %v4690_v9 = vpop.eup %4689 }
0x1021   :  { %v4692_v12 = vpop.eup %4691  ;;  %v3513_v44 = vmul.f32 0.5, %v4690_v9 }
0x1022   :  { %v3519_v40 = vmul.f32 %v3517_v29, %v3505_v63  ;;  %v3506_v23 = vadd.f32 0.5, %v3504_v58  ;;  %v3514_v56 = vmul.f32 0.5, %v4692_v12 }
0x1023   :  { %v3515_v35 = vadd.f32 0.5, %v3513_v44 }
0x1024   :  { %v3521_v6 = vadd.f32 %v3519_v40, %v3408_v41  ;;  %v3520_v60 = vmul.f32 %v3518_v38, %v3506_v23  ;;  %v3516_v14 = vadd.f32 0.5, %v3514_v56 }
0x1025   :  { %v3525_v55 = vsub.f32 1.0, %v3515_v35  ;;  %v3529_v31 = vmul.f32 %v3515_v35, %v6690_v53 }
0x1026   :  { %4693 = vtanh.f32 %v3521_v6  ;;  %v3522_v24 = vadd.f32 %v3520_v60, %v3411_v8  ;;  %v3526_v5 = vsub.f32 1.0, %v3516_v14  ;;  %v3530_v32 = vmul.f32 %v3516_v14, %v6693_v33 }
0x1028   :  { %4695 = vtanh.f32 %v3522_v24 }
0x1030   :  { %v4694_v42 = vpop.eup %4693 }
0x1031   :  { %v3527_v59 = vmul.f32 %v4694_v42, %v3525_v55 }
0x1032   :  { %v4696_v16 = vpop.eup %4695 }
0x1033   :  { %v3531_v61 = vadd.f32 %v3529_v31, %v3527_v59  ;;  %v3528_v1 = vmul.f32 %v4696_v16, %v3526_v5 }
0x1035   :  { %v3532_v49 = vadd.f32 %v3530_v32, %v3528_v1 }
0x1037   :  { %v3533_v26 = vpack.c.bf16 %v3532_v49, %v3531_v61 }
0x1039   :  { %4353 = vmatmul.mubr.bf16.vlgmr.msra.gmra.mrb[112].mxu0 %v3533_v26 }
0x110c   :  { %v3639_v18 = vpop.f32.mrb[112].mxu0 }
0x110d   :  { %v3640_v13 = vadd.f32 %v3758_v51, %v3639_v18  ;;  %v4354_v0 = vpop.f32.mrb[113].mxu0 }
0x110e   :  { %v3642_v28 = vpop.f32.mrb[114].mxu0 }
0x110f   :  { %3646 = vst [vmem:[%s6761_s12] sm:$0xff] %v3640_v13  ;;  %v3643_v53 = vadd.f32 %v3758_v51, %v3642_v28  ;;  %v4355_v52 = vpop.f32.mrb[115].mxu0 }
0x1111   :  { %3647 = vst [vmem:[%s6761_s12 + $0x8] sm:$0xff] %v3643_v53 }

</bundles_post_ra>
